<compile_context>
chip_gen: v5e
topology: v5e:2x2
jax: 0.10.0
libtpu: 0.0.40
codegen_flags: <defaults>
</compile_context>

<pallas_src>
import functools

import jax
import jax.numpy as jnp
from jax import lax
from jax.experimental import pallas as pl
from jax.experimental.pallas import tpu as pltpu


def _round_up(n, m):
    return (n + m - 1) // m * m


def rnn_model_kernel(len_ref, x_ref, h0_ref,
                     wi_ref, bi_ref,
                     wh_ref, bhf_ref, bhb_ref,
                     wc_ref, shift_ref,
                     logits_ref, hidden_ref,
                     gi_ref,
                     *, s_chunk, unroll):
    Bp = h0_ref.shape[1]
    Hp = h0_ref.shape[2]
    S = x_ref.shape[0] // Bp
    H3 = 3 * Hp
    f32 = jnp.float32

    # ---- Phase 1: hoisted input projection for BOTH directions, chunked over S
    #      so each chunk's f32 matmul result stays small (vreg pressure), stored
    #      into a single bf16 scratch [S*Bp, 6Hp].
    rows_per_chunk = s_chunk * Bp
    n_chunks = S // s_chunk

    @pl.loop(0, n_chunks)
    def _(c):
        r0 = pl.multiple_of(c * rows_per_chunk, rows_per_chunk)
        gi_c = (jnp.dot(x_ref[pl.ds(r0, rows_per_chunk), :], wi_ref[...],
                        preferred_element_type=f32) + bi_ref[...])
        gi_ref[pl.ds(r0, rows_per_chunk), :] = gi_c.astype(gi_ref.dtype)

    # Loop-invariant loads / broadcasts hoisted out of the serial scan.
    wh_m = wh_ref[...]                                       # [Hp, 6Hp] bf16 (Wh_f|Wh_b)
    bh_f = jnp.broadcast_to(bhf_ref[...], (Bp, H3))          # [Bp, 3Hp] f32
    bh_b = jnp.broadcast_to(bhb_ref[...], (Bp, H3))
    lens_b = jnp.broadcast_to(len_ref[...], (Bp, Hp))        # int32 [Bp, Hp]

    def gru_gates(gi, gh, h):
        # PyTorch GRU gate order r, z, n; the n-gate recurrent bias sits inside
        # the r*() term (gh already carries b_hh).
        r = jax.nn.sigmoid(gi[:, :Hp] + gh[:, :Hp])
        z = jax.nn.sigmoid(gi[:, Hp:2 * Hp] + gh[:, Hp:2 * Hp])
        n = jnp.tanh(gi[:, 2 * Hp:] + r * gh[:, 2 * Hp:])
        return (1.0 - z) * n + z * h

    # ---- Phase 2: merged fwd/bwd recurrence -- ONE MXU issue per timestep.
    #      Only gh_all[:Bp, :3Hp] (h_f @ Wh_f) and gh_all[Bp:, 3Hp:] (h_b @ Wh_b)
    #      are valid; the cross blocks are garbage and are never read.
    def body(t, carry):
        h_f, h_b = carry
        tb = S - 1 - t
        h_lhs = jnp.concatenate([h_f, h_b], axis=0).astype(wh_m.dtype)  # [2Bp, Hp]
        gh_all = jnp.dot(h_lhs, wh_m, preferred_element_type=f32)       # [2Bp, 6Hp]
        gh_f = gh_all[:Bp, :H3] + bh_f
        gh_b = gh_all[Bp:, H3:] + bh_b
        row_f = pl.multiple_of(t * Bp, Bp)
        row_b = pl.multiple_of(tb * Bp, Bp)
        gi_f = gi_ref[pl.ds(row_f, Bp), :H3].astype(f32)
        gi_b = gi_ref[pl.ds(row_b, Bp), H3:].astype(f32)
        h_f_new = gru_gates(gi_f, gh_f, h_f)
        h_b_new = gru_gates(gi_b, gh_b, h_b)
        # Length freeze (packed-sequence semantics): keep old h once step >= len.
        h_f = jnp.where(lens_b > t, h_f_new, h_f)
        h_b = jnp.where(lens_b > tb, h_b_new, h_b)
        return h_f, h_b

    # h carries stay f32 (no compounding bf16 rounding over long S).
    # NOTE: h0_ref is aliased with hidden_ref -- it is read exactly once here,
    # strictly before any hidden_ref write; keep that ordering if editing.
    h_f, h_b = lax.fori_loop(0, S, body, (h0_ref[0], h0_ref[1]), unroll=unroll)

    hidden_ref[0] = h_f
    hidden_ref[1] = h_b

    # ---- Phase 3: classifier Linear(2H->C) with eval-BatchNorm folded into the
    #      pre-scaled weight/shift; single dot with K = 2Hp.
    h_comb = jnp.concatenate([h_f, h_b], axis=1).astype(wc_ref.dtype)   # [Bp, 2Hp]
    logits_ref[...] = (jnp.dot(h_comb, wc_ref[...],
                               preferred_element_type=f32) + shift_ref[...])


def init_params(key, vocab_size, emb_dim, n_hidden, n_classes, pad_idx=0):
    ks = jax.random.split(key, 12)
    s = 1.0 / jnp.sqrt(n_hidden)
    u = lambda k, shape: jax.random.uniform(k, shape, jnp.float32, -s, s)
    emb = jax.random.normal(ks[0], (vocab_size, emb_dim), jnp.float32) * 0.1
    emb = emb.at[pad_idx].set(0.0)  # padding_idx row is zero
    params = dict(
        emb=emb,
        # GRU weights (PyTorch shapes: W_ih [3H, E], W_hh [3H, H], biases [3H])
        w_ih_f=u(ks[1], (3 * n_hidden, emb_dim)),
        w_hh_f=u(ks[2], (3 * n_hidden, n_hidden)),
        b_ih_f=u(ks[3], (3 * n_hidden,)),
        b_hh_f=u(ks[4], (3 * n_hidden,)),
        w_ih_b=u(ks[5], (3 * n_hidden, emb_dim)),
        w_hh_b=u(ks[6], (3 * n_hidden, n_hidden)),
        b_ih_b=u(ks[7], (3 * n_hidden,)),
        b_hh_b=u(ks[8], (3 * n_hidden,)),
        # classifier Linear(2H -> C)
        w_cls=u(ks[9], (n_classes, 2 * n_hidden)),
        b_cls=u(ks[10], (n_classes,)),
        # BatchNorm1d(C) parameters / running stats (eval mode)
        bn_gamma=1.0 + 0.1 * jax.random.normal(ks[11], (n_classes,), jnp.float32),
        bn_beta=0.05 * jnp.ones((n_classes,), jnp.float32),
        bn_mean=0.01 * jnp.arange(n_classes, dtype=jnp.float32),
        bn_var=1.0 + 0.02 * jnp.arange(n_classes, dtype=jnp.float32),
    )
    return params


def rnn_model_forward(text_input, lengths, hidden0, params, *, bn_eps=1e-5):
    """text_input: [B, S] int32, lengths: [B] int32 (sorted desc, all >= 1),
    hidden0: [2, B, H]."""
    B, S = text_input.shape
    H = hidden0.shape[2]
    E = params["emb"].shape[1]
    C = params["w_cls"].shape[0]

    # Lane/sublane-friendly padded sizes: every gate slice lands on a 128-lane
    # boundary and the logits store is lane-dense.
    Bp = _round_up(B, 8)
    Hp = _round_up(H, 128)
    Ep = _round_up(E, 128)
    Cp = _round_up(C, 128)
    f32, bf16 = jnp.float32, jnp.bfloat16

    # Glue (XLA): embedding gather + Dropout(identity, eval), time-major, padded.
    embed = params["emb"][text_input]                   # [B, S, E]
    x = jnp.transpose(embed, (1, 0, 2))                 # [S, B, E]
    x = jnp.pad(x, ((0, 0), (0, Bp - B), (0, Ep - E)))
    x2 = x.reshape(S * Bp, Ep).astype(bf16)             # [S*Bp, Ep]

    # pack_padded_sequence requires lengths >= 1; zero-length rows would return h0.
    lens = jnp.pad(lengths.astype(jnp.int32), (0, Bp - B)).reshape(Bp, 1)
    h0 = jnp.pad(hidden0.astype(f32), ((0, 0), (0, Bp - B), (0, Hp - H)))

    def pad_gates_w(w, K, Kp):
        # [3H, K] (PyTorch layout) -> [Kp, 3*Hp]: per-gate zero-padding keeps the
        # r/z/n blocks 128-lane aligned; transposed so matmuls are (M,K)@(K,N).
        w3 = jnp.pad(w.reshape(3, H, K), ((0, 0), (0, Hp - H), (0, Kp - K)))
        return jnp.transpose(w3, (2, 0, 1)).reshape(Kp, 3 * Hp)

    def pad_gates_b(b):
        return jnp.pad(b.reshape(3, H), ((0, 0), (0, Hp - H))).reshape(1, 3 * Hp)

    # Combined (fwd|bwd) input-projection weight for the single hoisted matmul.
    wi = jnp.concatenate([pad_gates_w(params["w_ih_f"], E, Ep),
                          pad_gates_w(params["w_ih_b"], E, Ep)],
                         axis=1).astype(bf16)                      # [Ep, 6Hp]
    bi = jnp.concatenate([pad_gates_b(params["b_ih_f"]),
                          pad_gates_b(params["b_ih_b"])], axis=1)  # [1, 6Hp]
    # Combined recurrent weight (one MXU issue per step, K stays Hp=128).
    wh_m = jnp.concatenate([pad_gates_w(params["w_hh_f"], H, Hp),
                            pad_gates_w(params["w_hh_b"], H, Hp)],
                           axis=1).astype(bf16)                    # [Hp, 6Hp]
    bh_f = pad_gates_b(params["b_hh_f"])
    bh_b = pad_gates_b(params["b_hh_b"])

    # Classifier Linear(2H->C), eval BatchNorm folded; fwd/bwd halves stacked so
    # the kernel does ONE dot with K = 2Hp.
    scale = params["bn_gamma"] / jnp.sqrt(params["bn_var"] + bn_eps)   # [C]
    wc = params["w_cls"].T * scale[None, :]                            # [2H, C]
    wc_m = jnp.concatenate(
        [jnp.pad(wc[:H], ((0, Hp - H), (0, Cp - C))),
         jnp.pad(wc[H:], ((0, Hp - H), (0, Cp - C)))], axis=0).astype(bf16)  # [2Hp, Cp]
    shift = params["b_cls"] * scale + params["bn_beta"] - params["bn_mean"] * scale
    shift = jnp.pad(shift, (0, Cp - C)).reshape(1, Cp)

    # Phase-1 chunk size: largest divisor of S keeping the per-chunk f32 matmul
    # result <= ~128 KiB live (avoids the scaling cliff / vreg spills).
    s_chunk = 1
    for d in range(1, S + 1):
        if S % d == 0 and d * Bp * 6 * Hp * 4 <= (128 << 10):
            s_chunk = d
    # Recurrence unroll: full for short S, partial (code size / live ranges) beyond.
    unroll = True if S <= 16 else 8

    def nbytes(a):
        return int(a.size) * a.dtype.itemsize

    gi_scratch_bytes = S * Bp * 6 * Hp * 2       # single bf16 scratch
    out_bytes = Bp * Cp * 4 + 2 * Bp * Hp * 4
    footprint = (nbytes(x2) + nbytes(wi) + nbytes(bi) + nbytes(wh_m)
                 + nbytes(bh_f) + nbytes(bh_b) + nbytes(wc_m) + nbytes(shift)
                 + nbytes(lens) + nbytes(h0) + gi_scratch_bytes + out_bytes)
    # Headroomed VMEM limit: cover the resident footprint but leave compiler
    # scratch slack; never exceed 48 MiB (v7x physical VMEM is only 64 MiB/TC).
    vmem_limit = int(min(max(2 * footprint + (4 << 20), 32 << 20), 48 << 20))

    flops = int(2 * (S * Bp) * Ep * 6 * Hp          # hoisted input projection
                + 2 * S * (2 * Bp) * Hp * 6 * Hp    # merged recurrent matmuls
                + 2 * Bp * (2 * Hp) * Cp)           # fused classifier
    transcendentals = int(S * 2 * Bp * 3 * Hp)
    bytes_accessed = int(nbytes(x2) + nbytes(wi) + nbytes(wh_m) + nbytes(wc_m)
                         + nbytes(bi) + nbytes(bh_f) + nbytes(bh_b) + nbytes(shift)
                         + nbytes(lens) + nbytes(h0)
                         + 2 * gi_scratch_bytes + out_bytes)

    vmem = pl.BlockSpec(memory_space=pltpu.MemorySpace.VMEM)
    out_shape = (jax.ShapeDtypeStruct((Bp, Cp), f32),
                 jax.ShapeDtypeStruct((2, Bp, Hp), f32))

    kernel = functools.partial(rnn_model_kernel, s_chunk=s_chunk, unroll=unroll)
    logits_p, hidden_p = pl.pallas_call(
        kernel,
        out_shape=out_shape,
        in_specs=[vmem] * 10,
        out_specs=(vmem, vmem),
        scratch_shapes=[pltpu.VMEM((S * Bp, 6 * Hp), bf16)],   # hoisted gi (bf16)
        input_output_aliases={2: 1},   # h0 buffer reused for the hidden output
        cost_estimate=pl.CostEstimate(flops=flops,
                                      transcendentals=transcendentals,
                                      bytes_accessed=bytes_accessed),
        compiler_params=pltpu.CompilerParams(vmem_limit_bytes=vmem_limit),
    )(lens, x2, h0, wi, bi, wh_m, bh_f, bh_b, wc_m, shift)

    return logits_p[:B, :C], hidden_p[:, :B, :H]


def ref_forward(text_input, lengths, hidden0, params, *, bn_eps=1e-5):
    """Pure-JAX f32 reference (same math as the PyTorch module, eval mode)."""
    B, S = text_input.shape
    H = hidden0.shape[2]
    embed = params["emb"][text_input]
    x = jnp.transpose(embed, (1, 0, 2))
    mask = (jnp.arange(S)[:, None] < lengths[None, :]).astype(jnp.float32)[:, :, None]

    def cell(x_t, h, wi, wh, bi, bh):
        gi = x_t @ wi.T + bi
        gh = h @ wh.T + bh
        r = jax.nn.sigmoid(gi[:, :H] + gh[:, :H])
        z = jax.nn.sigmoid(gi[:, H:2 * H] + gh[:, H:2 * H])
        n = jnp.tanh(gi[:, 2 * H:] + r * gh[:, 2 * H:])
        return (1.0 - z) * n + z * h

    h_f = hidden0[0]
    for t in range(S):
        h_new = cell(x[t], h_f, params["w_ih_f"], params["w_hh_f"],
                     params["b_ih_f"], params["b_hh_f"])
        h_f = mask[t] * h_new + (1.0 - mask[t]) * h_f
    h_b = hidden0[1]
    for t in range(S - 1, -1, -1):
        h_new = cell(x[t], h_b, params["w_ih_b"], params["w_hh_b"],
                     params["b_ih_b"], params["b_hh_b"])
        h_b = mask[t] * h_new + (1.0 - mask[t]) * h_b

    combined = jnp.concatenate([h_f, h_b], axis=1)
    z = combined @ params["w_cls"].T + params["b_cls"]
    scale = params["bn_gamma"] / jnp.sqrt(params["bn_var"] + bn_eps)
    logits = (z - params["bn_mean"]) * scale + params["bn_beta"]
    return logits, jnp.stack([h_f, h_b], axis=0)


if __name__ == "__main__":
    # Small shapes; H/E/C deliberately NOT multiples of 128 to exercise padding.
    VOCAB, EMB_DIM, N_HIDDEN, N_CLASSES = 50, 64, 64, 32
    BATCH, SEQ = 8, 8
    PAD_IDX = 0

    key = jax.random.PRNGKey(0)
    k_param, k_tok = jax.random.split(key)
    params = init_params(k_param, VOCAB, EMB_DIM, N_HIDDEN, N_CLASSES, pad_idx=PAD_IDX)

    text_input = jax.random.randint(k_tok, (BATCH, SEQ), 1, VOCAB, dtype=jnp.int32)
    lengths = jnp.array([8, 8, 7, 6, 5, 4, 3, 2], dtype=jnp.int32)  # sorted desc
    assert int(lengths.min()) >= 1  # pack_padded_sequence requires lengths >= 1
    text_input = jnp.where(jnp.arange(SEQ)[None, :] < lengths[:, None], text_input, PAD_IDX)
    hidden0 = jnp.zeros((2, BATCH, N_HIDDEN), jnp.float32)          # init_hidden()

    fwd = jax.jit(lambda ti, ln, h0: rnn_model_forward(ti, ln, h0, params))
    logits, hidden = fwd(text_input, lengths, hidden0)
    jax.block_until_ready((logits, hidden))

    ref_logits, ref_hidden = ref_forward(text_input, lengths, hidden0, params)
    # Kernel feeds the MXU bf16 operands (f32 accumulation) and stores the hoisted
    # input projection in bf16, so compare against the pure-f32 reference with a
    # bf16-appropriate tolerance.
    max_dl = float(jnp.max(jnp.abs(logits - ref_logits)))
    max_dh = float(jnp.max(jnp.abs(hidden - ref_hidden)))
    assert jnp.allclose(logits, ref_logits, atol=4e-2, rtol=4e-2), max_dl
    assert jnp.allclose(hidden, ref_hidden, atol=4e-2, rtol=4e-2), max_dh
    print("KERNEL_OK")
</pallas_src>

<mosaic_0001>
module attributes {stable_mosaic.version = 11 : i64} {
  func.func @rnn_model_kernel(%arg0: memref<8x1xi32, #tpu.memory_space<vmem>>, %arg1: memref<64x128xbf16, #tpu.memory_space<vmem>>, %arg2: memref<2x8x128xf32, #tpu.memory_space<vmem>>, %arg3: memref<128x768xbf16, #tpu.memory_space<vmem>>, %arg4: memref<1x768xf32, #tpu.memory_space<vmem>>, %arg5: memref<128x768xbf16, #tpu.memory_space<vmem>>, %arg6: memref<1x384xf32, #tpu.memory_space<vmem>>, %arg7: memref<1x384xf32, #tpu.memory_space<vmem>>, %arg8: memref<256x128xbf16, #tpu.memory_space<vmem>>, %arg9: memref<1x128xf32, #tpu.memory_space<vmem>>, %arg10: memref<8x128xf32, #tpu.memory_space<vmem>>, %arg11: memref<2x8x128xf32, #tpu.memory_space<vmem>>, %arg12: memref<64x768xbf16, #tpu.memory_space<vmem>>) attributes {dimension_semantics = [], scalar_prefetch = 0 : i64, scratch_operands = 1 : i64, tpu.core_type = #tpu.core_type<tc>} {
    %c0_i32 = arith.constant 0 : i32
    %c2_i32 = arith.constant 2 : i32
    %0 = arith.addi %c0_i32, %c2_i32 : i32
    %c1_i32 = arith.constant 1 : i32
    scf.for %arg13 = %c0_i32 to %0 step %c1_i32  : i32 {
      %c1_i32_123 = arith.constant 1 : i32
      %637 = arith.muli %arg13, %c1_i32_123 : i32
      %c0_i32_124 = arith.constant 0 : i32
      %638 = arith.addi %c0_i32_124, %637 : i32
      %c32_i32 = arith.constant 32 : i32
      %639 = arith.muli %638, %c32_i32 : i32
      %640 = tpu.assume_multiple %639, 32 : i32
      %641 = arith.index_cast %640 : i32 to index
      %c0_125 = arith.constant 0 : index
      %642 = vector.load %arg1[%641, %c0_125] : memref<64x128xbf16, #tpu.memory_space<vmem>>, vector<32x128xbf16>
      %c0_126 = arith.constant 0 : index
      %c0_127 = arith.constant 0 : index
      %643 = vector.load %arg3[%c0_126, %c0_127] : memref<128x768xbf16, #tpu.memory_space<vmem>>, vector<128x768xbf16>
      %cst_128 = arith.constant dense<0.000000e+00> : vector<32x768xf32>
      %644 = tpu.matmul %642, %643, %cst_128 {dimension_numbers = #tpu.dot_dimension_numbers<[1], [0], [0], [1], [0, 0, 1, 1], [], []>} : vector<32x128xbf16>, vector<128x768xbf16>, vector<32x768xf32> -> vector<32x768xf32>
      %c0_129 = arith.constant 0 : index
      %c0_130 = arith.constant 0 : index
      %645 = vector.load %arg4[%c0_129, %c0_130] : memref<1x768xf32, #tpu.memory_space<vmem>>, vector<1x768xf32>
      %646 = vector.broadcast %645 : vector<1x768xf32> to vector<32x768xf32>
      %647 = arith.addf %644, %646 : vector<32x768xf32>
      %648 = arith.truncf %647 : vector<32x768xf32> to vector<32x768xbf16>
      %649 = arith.index_cast %640 : i32 to index
      %c0_131 = arith.constant 0 : index
      %650 = vector.load %arg12[%649, %c0_131] : memref<64x768xbf16, #tpu.memory_space<vmem>>, vector<32x768xbf16>
      tpu.vector_store %arg12[%649, %c0_131], %648 {strides = array<i32>} : memref<64x768xbf16, #tpu.memory_space<vmem>>, vector<32x768xbf16>,
    }
    %c2_i32_0 = arith.constant 2 : i32
    %c0 = arith.constant 0 : index
    %c0_1 = arith.constant 0 : index
    %1 = vector.load %arg5[%c0, %c0_1] : memref<128x768xbf16, #tpu.memory_space<vmem>>, vector<128x768xbf16>
    %c0_2 = arith.constant 0 : index
    %c0_3 = arith.constant 0 : index
    %2 = vector.load %arg6[%c0_2, %c0_3] : memref<1x384xf32, #tpu.memory_space<vmem>>, vector<1x384xf32>
    %3 = vector.shape_cast %2 : vector<1x384xf32> to vector<1x384xf32>
    %4 = vector.broadcast %3 : vector<1x384xf32> to vector<8x384xf32>
    %c0_4 = arith.constant 0 : index
    %c0_5 = arith.constant 0 : index
    %5 = vector.load %arg7[%c0_4, %c0_5] : memref<1x384xf32, #tpu.memory_space<vmem>>, vector<1x384xf32>
    %6 = vector.shape_cast %5 : vector<1x384xf32> to vector<1x384xf32>
    %7 = vector.broadcast %6 : vector<1x384xf32> to vector<8x384xf32>
    %c0_6 = arith.constant 0 : index
    %c0_7 = arith.constant 0 : index
    %8 = vector.load %arg0[%c0_6, %c0_7] : memref<8x1xi32, #tpu.memory_space<vmem>>, vector<8x1xi32>
    %9 = vector.shape_cast %8 : vector<8x1xi32> to vector<8x1xi32>
    %10 = vector.broadcast %9 : vector<8x1xi32> to vector<8x128xi32>
    %c0_8 = arith.constant 0 : index
    %c0_9 = arith.constant 0 : index
    %c0_10 = arith.constant 0 : index
    %11 = vector.load %arg2[%c0_8, %c0_9, %c0_10] : memref<2x8x128xf32, #tpu.memory_space<vmem>>, vector<1x8x128xf32>
    %12 = vector.shape_cast %11 : vector<1x8x128xf32> to vector<8x128xf32>
    %c1 = arith.constant 1 : index
    %c0_11 = arith.constant 0 : index
    %c0_12 = arith.constant 0 : index
    %13 = vector.load %arg2[%c1, %c0_11, %c0_12] : memref<2x8x128xf32, #tpu.memory_space<vmem>>, vector<1x8x128xf32>
    %14 = vector.shape_cast %13 : vector<1x8x128xf32> to vector<8x128xf32>
    %c0_i32_13 = arith.constant 0 : i32
    %c7_i32 = arith.constant 7 : i32
    %15 = arith.subi %c7_i32, %c0_i32_13 : i32
    %16 = tpu.concatenate %12, %14 in 0 : vector<8x128xf32>, vector<8x128xf32> -> vector<16x128xf32>
    %17 = arith.truncf %16 : vector<16x128xf32> to vector<16x128xbf16>
    %cst = arith.constant dense<0.000000e+00> : vector<16x768xf32>
    %18 = tpu.matmul %17, %1, %cst {dimension_numbers = #tpu.dot_dimension_numbers<[1], [0], [0], [1], [0, 0, 1, 1], [], []>} : vector<16x128xbf16>, vector<128x768xbf16>, vector<16x768xf32> -> vector<16x768xf32>
    %19 = vector.extract_strided_slice %18 {offsets = [0, 0], sizes = [8, 384], strides = [1, 1]} : vector<16x768xf32> to vector<8x384xf32>
    %20 = arith.addf %19, %4 : vector<8x384xf32>
    %21 = vector.extract_strided_slice %18 {offsets = [8, 384], sizes = [8, 384], strides = [1, 1]} : vector<16x768xf32> to vector<8x384xf32>
    %22 = arith.addf %21, %7 : vector<8x384xf32>
    %c8_i32 = arith.constant 8 : i32
    %23 = arith.muli %c0_i32_13, %c8_i32 : i32
    %24 = tpu.assume_multiple %23, 8 : i32
    %c8_i32_14 = arith.constant 8 : i32
    %25 = arith.muli %15, %c8_i32_14 : i32
    %26 = tpu.assume_multiple %25, 8 : i32
    %27 = arith.index_cast %24 : i32 to index
    %c0_15 = arith.constant 0 : index
    %28 = vector.load %arg12[%27, %c0_15] : memref<64x768xbf16, #tpu.memory_space<vmem>>, vector<8x384xbf16>
    %29 = arith.extf %28 : vector<8x384xbf16> to vector<8x384xf32>
    %30 = arith.index_cast %26 : i32 to index
    %c384 = arith.constant 384 : index
    %31 = vector.load %arg12[%30, %c384] : memref<64x768xbf16, #tpu.memory_space<vmem>>, vector<8x384xbf16>
    %32 = arith.extf %31 : vector<8x384xbf16> to vector<8x384xf32>
    %33 = vector.extract_strided_slice %29 {offsets = [0, 0], sizes = [8, 128], strides = [1, 1]} : vector<8x384xf32> to vector<8x128xf32>
    %34 = vector.extract_strided_slice %20 {offsets = [0, 0], sizes = [8, 128], strides = [1, 1]} : vector<8x384xf32> to vector<8x128xf32>
    %35 = arith.addf %33, %34 : vector<8x128xf32>
    %36 = arith.negf %35 : vector<8x128xf32>
    %37 = math.exp %36 : vector<8x128xf32>
    %cst_16 = arith.constant 1.000000e+00 : f32
    %38 = vector.broadcast %cst_16 : f32 to vector<8x128xf32>
    %39 = arith.addf %38, %37 : vector<8x128xf32>
    %40 = arith.divf %38, %39 : vector<8x128xf32>
    %41 = vector.extract_strided_slice %29 {offsets = [0, 128], sizes = [8, 128], strides = [1, 1]} : vector<8x384xf32> to vector<8x128xf32>
    %42 = vector.extract_strided_slice %20 {offsets = [0, 128], sizes = [8, 128], strides = [1, 1]} : vector<8x384xf32> to vector<8x128xf32>
    %43 = arith.addf %41, %42 : vector<8x128xf32>
    %44 = arith.negf %43 : vector<8x128xf32>
    %45 = math.exp %44 : vector<8x128xf32>
    %cst_17 = arith.constant 1.000000e+00 : f32
    %46 = vector.broadcast %cst_17 : f32 to vector<8x128xf32>
    %47 = arith.addf %46, %45 : vector<8x128xf32>
    %48 = arith.divf %46, %47 : vector<8x128xf32>
    %49 = vector.extract_strided_slice %29 {offsets = [0, 256], sizes = [8, 128], strides = [1, 1]} : vector<8x384xf32> to vector<8x128xf32>
    %50 = vector.extract_strided_slice %20 {offsets = [0, 256], sizes = [8, 128], strides = [1, 1]} : vector<8x384xf32> to vector<8x128xf32>
    %51 = arith.mulf %40, %50 : vector<8x128xf32>
    %52 = arith.addf %49, %51 : vector<8x128xf32>
    %53 = math.tanh %52 : vector<8x128xf32>
    %cst_18 = arith.constant 1.000000e+00 : f32
    %54 = vector.broadcast %cst_18 : f32 to vector<8x128xf32>
    %55 = arith.subf %54, %48 : vector<8x128xf32>
    %56 = arith.mulf %55, %53 : vector<8x128xf32>
    %57 = arith.mulf %48, %12 : vector<8x128xf32>
    %58 = arith.addf %56, %57 : vector<8x128xf32>
    %59 = vector.extract_strided_slice %32 {offsets = [0, 0], sizes = [8, 128], strides = [1, 1]} : vector<8x384xf32> to vector<8x128xf32>
    %60 = vector.extract_strided_slice %22 {offsets = [0, 0], sizes = [8, 128], strides = [1, 1]} : vector<8x384xf32> to vector<8x128xf32>
    %61 = arith.addf %59, %60 : vector<8x128xf32>
    %62 = arith.negf %61 : vector<8x128xf32>
    %63 = math.exp %62 : vector<8x128xf32>
    %cst_19 = arith.constant 1.000000e+00 : f32
    %64 = vector.broadcast %cst_19 : f32 to vector<8x128xf32>
    %65 = arith.addf %64, %63 : vector<8x128xf32>
    %66 = arith.divf %64, %65 : vector<8x128xf32>
    %67 = vector.extract_strided_slice %32 {offsets = [0, 128], sizes = [8, 128], strides = [1, 1]} : vector<8x384xf32> to vector<8x128xf32>
    %68 = vector.extract_strided_slice %22 {offsets = [0, 128], sizes = [8, 128], strides = [1, 1]} : vector<8x384xf32> to vector<8x128xf32>
    %69 = arith.addf %67, %68 : vector<8x128xf32>
    %70 = arith.negf %69 : vector<8x128xf32>
    %71 = math.exp %70 : vector<8x128xf32>
    %cst_20 = arith.constant 1.000000e+00 : f32
    %72 = vector.broadcast %cst_20 : f32 to vector<8x128xf32>
    %73 = arith.addf %72, %71 : vector<8x128xf32>
    %74 = arith.divf %72, %73 : vector<8x128xf32>
    %75 = vector.extract_strided_slice %32 {offsets = [0, 256], sizes = [8, 128], strides = [1, 1]} : vector<8x384xf32> to vector<8x128xf32>
    %76 = vector.extract_strided_slice %22 {offsets = [0, 256], sizes = [8, 128], strides = [1, 1]} : vector<8x384xf32> to vector<8x128xf32>
    %77 = arith.mulf %66, %76 : vector<8x128xf32>
    %78 = arith.addf %75, %77 : vector<8x128xf32>
    %79 = math.tanh %78 : vector<8x128xf32>
    %cst_21 = arith.constant 1.000000e+00 : f32
    %80 = vector.broadcast %cst_21 : f32 to vector<8x128xf32>
    %81 = arith.subf %80, %74 : vector<8x128xf32>
    %82 = arith.mulf %81, %79 : vector<8x128xf32>
    %83 = arith.mulf %74, %14 : vector<8x128xf32>
    %84 = arith.addf %82, %83 : vector<8x128xf32>
    %85 = vector.broadcast %c0_i32_13 : i32 to vector<8x128xi32>
    %86 = arith.cmpi sgt, %10, %85 : vector<8x128xi32>
    %87 = arith.select %86, %58, %12 : vector<8x128xi1>, vector<8x128xf32>
    %88 = vector.broadcast %15 : i32 to vector<8x128xi32>
    %89 = arith.cmpi sgt, %10, %88 : vector<8x128xi32>
    %90 = arith.select %89, %84, %14 : vector<8x128xi1>, vector<8x128xf32>
    %c1_i32_22 = arith.constant 1 : i32
    %c7_i32_23 = arith.constant 7 : i32
    %91 = arith.subi %c7_i32_23, %c1_i32_22 : i32
    %92 = tpu.concatenate %87, %90 in 0 : vector<8x128xf32>, vector<8x128xf32> -> vector<16x128xf32>
    %93 = arith.truncf %92 : vector<16x128xf32> to vector<16x128xbf16>
    %cst_24 = arith.constant dense<0.000000e+00> : vector<16x768xf32>
    %94 = tpu.matmul %93, %1, %cst_24 {dimension_numbers = #tpu.dot_dimension_numbers<[1], [0], [0], [1], [0, 0, 1, 1], [], []>} : vector<16x128xbf16>, vector<128x768xbf16>, vector<16x768xf32> -> vector<16x768xf32>
    %95 = vector.extract_strided_slice %94 {offsets = [0, 0], sizes = [8, 384], strides = [1, 1]} : vector<16x768xf32> to vector<8x384xf32>
    %96 = arith.addf %95, %4 : vector<8x384xf32>
    %97 = vector.extract_strided_slice %94 {offsets = [8, 384], sizes = [8, 384], strides = [1, 1]} : vector<16x768xf32> to vector<8x384xf32>
    %98 = arith.addf %97, %7 : vector<8x384xf32>
    %c8_i32_25 = arith.constant 8 : i32
    %99 = arith.muli %c1_i32_22, %c8_i32_25 : i32
    %100 = tpu.assume_multiple %99, 8 : i32
    %c8_i32_26 = arith.constant 8 : i32
    %101 = arith.muli %91, %c8_i32_26 : i32
    %102 = tpu.assume_multiple %101, 8 : i32
    %103 = arith.index_cast %100 : i32 to index
    %c0_27 = arith.constant 0 : index
    %104 = vector.load %arg12[%103, %c0_27] : memref<64x768xbf16, #tpu.memory_space<vmem>>, vector<8x384xbf16>
    %105 = arith.extf %104 : vector<8x384xbf16> to vector<8x384xf32>
    %106 = arith.index_cast %102 : i32 to index
    %c384_28 = arith.constant 384 : index
    %107 = vector.load %arg12[%106, %c384_28] : memref<64x768xbf16, #tpu.memory_space<vmem>>, vector<8x384xbf16>
    %108 = arith.extf %107 : vector<8x384xbf16> to vector<8x384xf32>
    %109 = vector.extract_strided_slice %105 {offsets = [0, 0], sizes = [8, 128], strides = [1, 1]} : vector<8x384xf32> to vector<8x128xf32>
    %110 = vector.extract_strided_slice %96 {offsets = [0, 0], sizes = [8, 128], strides = [1, 1]} : vector<8x384xf32> to vector<8x128xf32>
    %111 = arith.addf %109, %110 : vector<8x128xf32>
    %112 = arith.negf %111 : vector<8x128xf32>
    %113 = math.exp %112 : vector<8x128xf32>
    %cst_29 = arith.constant 1.000000e+00 : f32
    %114 = vector.broadcast %cst_29 : f32 to vector<8x128xf32>
    %115 = arith.addf %114, %113 : vector<8x128xf32>
    %116 = arith.divf %114, %115 : vector<8x128xf32>
    %117 = vector.extract_strided_slice %105 {offsets = [0, 128], sizes = [8, 128], strides = [1, 1]} : vector<8x384xf32> to vector<8x128xf32>
    %118 = vector.extract_strided_slice %96 {offsets = [0, 128], sizes = [8, 128], strides = [1, 1]} : vector<8x384xf32> to vector<8x128xf32>
    %119 = arith.addf %117, %118 : vector<8x128xf32>
    %120 = arith.negf %119 : vector<8x128xf32>
    %121 = math.exp %120 : vector<8x128xf32>
    %cst_30 = arith.constant 1.000000e+00 : f32
    %122 = vector.broadcast %cst_30 : f32 to vector<8x128xf32>
    %123 = arith.addf %122, %121 : vector<8x128xf32>
    %124 = arith.divf %122, %123 : vector<8x128xf32>
    %125 = vector.extract_strided_slice %105 {offsets = [0, 256], sizes = [8, 128], strides = [1, 1]} : vector<8x384xf32> to vector<8x128xf32>
    %126 = vector.extract_strided_slice %96 {offsets = [0, 256], sizes = [8, 128], strides = [1, 1]} : vector<8x384xf32> to vector<8x128xf32>
    %127 = arith.mulf %116, %126 : vector<8x128xf32>
    %128 = arith.addf %125, %127 : vector<8x128xf32>
    %129 = math.tanh %128 : vector<8x128xf32>
    %cst_31 = arith.constant 1.000000e+00 : f32
    %130 = vector.broadcast %cst_31 : f32 to vector<8x128xf32>
    %131 = arith.subf %130, %124 : vector<8x128xf32>
    %132 = arith.mulf %131, %129 : vector<8x128xf32>
    %133 = arith.mulf %124, %87 : vector<8x128xf32>
    %134 = arith.addf %132, %133 : vector<8x128xf32>
    %135 = vector.extract_strided_slice %108 {offsets = [0, 0], sizes = [8, 128], strides = [1, 1]} : vector<8x384xf32> to vector<8x128xf32>
    %136 = vector.extract_strided_slice %98 {offsets = [0, 0], sizes = [8, 128], strides = [1, 1]} : vector<8x384xf32> to vector<8x128xf32>
    %137 = arith.addf %135, %136 : vector<8x128xf32>
    %138 = arith.negf %137 : vector<8x128xf32>
    %139 = math.exp %138 : vector<8x128xf32>
    %cst_32 = arith.constant 1.000000e+00 : f32
    %140 = vector.broadcast %cst_32 : f32 to vector<8x128xf32>
    %141 = arith.addf %140, %139 : vector<8x128xf32>
    %142 = arith.divf %140, %141 : vector<8x128xf32>
    %143 = vector.extract_strided_slice %108 {offsets = [0, 128], sizes = [8, 128], strides = [1, 1]} : vector<8x384xf32> to vector<8x128xf32>
    %144 = vector.extract_strided_slice %98 {offsets = [0, 128], sizes = [8, 128], strides = [1, 1]} : vector<8x384xf32> to vector<8x128xf32>
    %145 = arith.addf %143, %144 : vector<8x128xf32>
    %146 = arith.negf %145 : vector<8x128xf32>
    %147 = math.exp %146 : vector<8x128xf32>
    %cst_33 = arith.constant 1.000000e+00 : f32
    %148 = vector.broadcast %cst_33 : f32 to vector<8x128xf32>
    %149 = arith.addf %148, %147 : vector<8x128xf32>
    %150 = arith.divf %148, %149 : vector<8x128xf32>
    %151 = vector.extract_strided_slice %108 {offsets = [0, 256], sizes = [8, 128], strides = [1, 1]} : vector<8x384xf32> to vector<8x128xf32>
    %152 = vector.extract_strided_slice %98 {offsets = [0, 256], sizes = [8, 128], strides = [1, 1]} : vector<8x384xf32> to vector<8x128xf32>
    %153 = arith.mulf %142, %152 : vector<8x128xf32>
    %154 = arith.addf %151, %153 : vector<8x128xf32>
    %155 = math.tanh %154 : vector<8x128xf32>
    %cst_34 = arith.constant 1.000000e+00 : f32
    %156 = vector.broadcast %cst_34 : f32 to vector<8x128xf32>
    %157 = arith.subf %156, %150 : vector<8x128xf32>
    %158 = arith.mulf %157, %155 : vector<8x128xf32>
    %159 = arith.mulf %150, %90 : vector<8x128xf32>
    %160 = arith.addf %158, %159 : vector<8x128xf32>
    %161 = vector.broadcast %c1_i32_22 : i32 to vector<8x128xi32>
    %162 = arith.cmpi sgt, %10, %161 : vector<8x128xi32>
    %163 = arith.select %162, %134, %87 : vector<8x128xi1>, vector<8x128xf32>
    %164 = vector.broadcast %91 : i32 to vector<8x128xi32>
    %165 = arith.cmpi sgt, %10, %164 : vector<8x128xi32>
    %166 = arith.select %165, %160, %90 : vector<8x128xi1>, vector<8x128xf32>
    %c2_i32_35 = arith.constant 2 : i32
    %c7_i32_36 = arith.constant 7 : i32
    %167 = arith.subi %c7_i32_36, %c2_i32_35 : i32
    %168 = tpu.concatenate %163, %166 in 0 : vector<8x128xf32>, vector<8x128xf32> -> vector<16x128xf32>
    %169 = arith.truncf %168 : vector<16x128xf32> to vector<16x128xbf16>
    %cst_37 = arith.constant dense<0.000000e+00> : vector<16x768xf32>
    %170 = tpu.matmul %169, %1, %cst_37 {dimension_numbers = #tpu.dot_dimension_numbers<[1], [0], [0], [1], [0, 0, 1, 1], [], []>} : vector<16x128xbf16>, vector<128x768xbf16>, vector<16x768xf32> -> vector<16x768xf32>
    %171 = vector.extract_strided_slice %170 {offsets = [0, 0], sizes = [8, 384], strides = [1, 1]} : vector<16x768xf32> to vector<8x384xf32>
    %172 = arith.addf %171, %4 : vector<8x384xf32>
    %173 = vector.extract_strided_slice %170 {offsets = [8, 384], sizes = [8, 384], strides = [1, 1]} : vector<16x768xf32> to vector<8x384xf32>
    %174 = arith.addf %173, %7 : vector<8x384xf32>
    %c8_i32_38 = arith.constant 8 : i32
    %175 = arith.muli %c2_i32_35, %c8_i32_38 : i32
    %176 = tpu.assume_multiple %175, 8 : i32
    %c8_i32_39 = arith.constant 8 : i32
    %177 = arith.muli %167, %c8_i32_39 : i32
    %178 = tpu.assume_multiple %177, 8 : i32
    %179 = arith.index_cast %176 : i32 to index
    %c0_40 = arith.constant 0 : index
    %180 = vector.load %arg12[%179, %c0_40] : memref<64x768xbf16, #tpu.memory_space<vmem>>, vector<8x384xbf16>
    %181 = arith.extf %180 : vector<8x384xbf16> to vector<8x384xf32>
    %182 = arith.index_cast %178 : i32 to index
    %c384_41 = arith.constant 384 : index
    %183 = vector.load %arg12[%182, %c384_41] : memref<64x768xbf16, #tpu.memory_space<vmem>>, vector<8x384xbf16>
    %184 = arith.extf %183 : vector<8x384xbf16> to vector<8x384xf32>
    %185 = vector.extract_strided_slice %181 {offsets = [0, 0], sizes = [8, 128], strides = [1, 1]} : vector<8x384xf32> to vector<8x128xf32>
    %186 = vector.extract_strided_slice %172 {offsets = [0, 0], sizes = [8, 128], strides = [1, 1]} : vector<8x384xf32> to vector<8x128xf32>
    %187 = arith.addf %185, %186 : vector<8x128xf32>
    %188 = arith.negf %187 : vector<8x128xf32>
    %189 = math.exp %188 : vector<8x128xf32>
    %cst_42 = arith.constant 1.000000e+00 : f32
    %190 = vector.broadcast %cst_42 : f32 to vector<8x128xf32>
    %191 = arith.addf %190, %189 : vector<8x128xf32>
    %192 = arith.divf %190, %191 : vector<8x128xf32>
    %193 = vector.extract_strided_slice %181 {offsets = [0, 128], sizes = [8, 128], strides = [1, 1]} : vector<8x384xf32> to vector<8x128xf32>
    %194 = vector.extract_strided_slice %172 {offsets = [0, 128], sizes = [8, 128], strides = [1, 1]} : vector<8x384xf32> to vector<8x128xf32>
    %195 = arith.addf %193, %194 : vector<8x128xf32>
    %196 = arith.negf %195 : vector<8x128xf32>
    %197 = math.exp %196 : vector<8x128xf32>
    %cst_43 = arith.constant 1.000000e+00 : f32
    %198 = vector.broadcast %cst_43 : f32 to vector<8x128xf32>
    %199 = arith.addf %198, %197 : vector<8x128xf32>
    %200 = arith.divf %198, %199 : vector<8x128xf32>
    %201 = vector.extract_strided_slice %181 {offsets = [0, 256], sizes = [8, 128], strides = [1, 1]} : vector<8x384xf32> to vector<8x128xf32>
    %202 = vector.extract_strided_slice %172 {offsets = [0, 256], sizes = [8, 128], strides = [1, 1]} : vector<8x384xf32> to vector<8x128xf32>
    %203 = arith.mulf %192, %202 : vector<8x128xf32>
    %204 = arith.addf %201, %203 : vector<8x128xf32>
    %205 = math.tanh %204 : vector<8x128xf32>
    %cst_44 = arith.constant 1.000000e+00 : f32
    %206 = vector.broadcast %cst_44 : f32 to vector<8x128xf32>
    %207 = arith.subf %206, %200 : vector<8x128xf32>
    %208 = arith.mulf %207, %205 : vector<8x128xf32>
    %209 = arith.mulf %200, %163 : vector<8x128xf32>
    %210 = arith.addf %208, %209 : vector<8x128xf32>
    %211 = vector.extract_strided_slice %184 {offsets = [0, 0], sizes = [8, 128], strides = [1, 1]} : vector<8x384xf32> to vector<8x128xf32>
    %212 = vector.extract_strided_slice %174 {offsets = [0, 0], sizes = [8, 128], strides = [1, 1]} : vector<8x384xf32> to vector<8x128xf32>
    %213 = arith.addf %211, %212 : vector<8x128xf32>
    %214 = arith.negf %213 : vector<8x128xf32>
    %215 = math.exp %214 : vector<8x128xf32>
    %cst_45 = arith.constant 1.000000e+00 : f32
    %216 = vector.broadcast %cst_45 : f32 to vector<8x128xf32>
    %217 = arith.addf %216, %215 : vector<8x128xf32>
    %218 = arith.divf %216, %217 : vector<8x128xf32>
    %219 = vector.extract_strided_slice %184 {offsets = [0, 128], sizes = [8, 128], strides = [1, 1]} : vector<8x384xf32> to vector<8x128xf32>
    %220 = vector.extract_strided_slice %174 {offsets = [0, 128], sizes = [8, 128], strides = [1, 1]} : vector<8x384xf32> to vector<8x128xf32>
    %221 = arith.addf %219, %220 : vector<8x128xf32>
    %222 = arith.negf %221 : vector<8x128xf32>
    %223 = math.exp %222 : vector<8x128xf32>
    %cst_46 = arith.constant 1.000000e+00 : f32
    %224 = vector.broadcast %cst_46 : f32 to vector<8x128xf32>
    %225 = arith.addf %224, %223 : vector<8x128xf32>
    %226 = arith.divf %224, %225 : vector<8x128xf32>
    %227 = vector.extract_strided_slice %184 {offsets = [0, 256], sizes = [8, 128], strides = [1, 1]} : vector<8x384xf32> to vector<8x128xf32>
    %228 = vector.extract_strided_slice %174 {offsets = [0, 256], sizes = [8, 128], strides = [1, 1]} : vector<8x384xf32> to vector<8x128xf32>
    %229 = arith.mulf %218, %228 : vector<8x128xf32>
    %230 = arith.addf %227, %229 : vector<8x128xf32>
    %231 = math.tanh %230 : vector<8x128xf32>
    %cst_47 = arith.constant 1.000000e+00 : f32
    %232 = vector.broadcast %cst_47 : f32 to vector<8x128xf32>
    %233 = arith.subf %232, %226 : vector<8x128xf32>
    %234 = arith.mulf %233, %231 : vector<8x128xf32>
    %235 = arith.mulf %226, %166 : vector<8x128xf32>
    %236 = arith.addf %234, %235 : vector<8x128xf32>
    %237 = vector.broadcast %c2_i32_35 : i32 to vector<8x128xi32>
    %238 = arith.cmpi sgt, %10, %237 : vector<8x128xi32>
    %239 = arith.select %238, %210, %163 : vector<8x128xi1>, vector<8x128xf32>
    %240 = vector.broadcast %167 : i32 to vector<8x128xi32>
    %241 = arith.cmpi sgt, %10, %240 : vector<8x128xi32>
    %242 = arith.select %241, %236, %166 : vector<8x128xi1>, vector<8x128xf32>
    %c3_i32 = arith.constant 3 : i32
    %c7_i32_48 = arith.constant 7 : i32
    %243 = arith.subi %c7_i32_48, %c3_i32 : i32
    %244 = tpu.concatenate %239, %242 in 0 : vector<8x128xf32>, vector<8x128xf32> -> vector<16x128xf32>
    %245 = arith.truncf %244 : vector<16x128xf32> to vector<16x128xbf16>
    %cst_49 = arith.constant dense<0.000000e+00> : vector<16x768xf32>
    %246 = tpu.matmul %245, %1, %cst_49 {dimension_numbers = #tpu.dot_dimension_numbers<[1], [0], [0], [1], [0, 0, 1, 1], [], []>} : vector<16x128xbf16>, vector<128x768xbf16>, vector<16x768xf32> -> vector<16x768xf32>
    %247 = vector.extract_strided_slice %246 {offsets = [0, 0], sizes = [8, 384], strides = [1, 1]} : vector<16x768xf32> to vector<8x384xf32>
    %248 = arith.addf %247, %4 : vector<8x384xf32>
    %249 = vector.extract_strided_slice %246 {offsets = [8, 384], sizes = [8, 384], strides = [1, 1]} : vector<16x768xf32> to vector<8x384xf32>
    %250 = arith.addf %249, %7 : vector<8x384xf32>
    %c8_i32_50 = arith.constant 8 : i32
    %251 = arith.muli %c3_i32, %c8_i32_50 : i32
    %252 = tpu.assume_multiple %251, 8 : i32
    %c8_i32_51 = arith.constant 8 : i32
    %253 = arith.muli %243, %c8_i32_51 : i32
    %254 = tpu.assume_multiple %253, 8 : i32
    %255 = arith.index_cast %252 : i32 to index
    %c0_52 = arith.constant 0 : index
    %256 = vector.load %arg12[%255, %c0_52] : memref<64x768xbf16, #tpu.memory_space<vmem>>, vector<8x384xbf16>
    %257 = arith.extf %256 : vector<8x384xbf16> to vector<8x384xf32>
    %258 = arith.index_cast %254 : i32 to index
    %c384_53 = arith.constant 384 : index
    %259 = vector.load %arg12[%258, %c384_53] : memref<64x768xbf16, #tpu.memory_space<vmem>>, vector<8x384xbf16>
    %260 = arith.extf %259 : vector<8x384xbf16> to vector<8x384xf32>
    %261 = vector.extract_strided_slice %257 {offsets = [0, 0], sizes = [8, 128], strides = [1, 1]} : vector<8x384xf32> to vector<8x128xf32>
    %262 = vector.extract_strided_slice %248 {offsets = [0, 0], sizes = [8, 128], strides = [1, 1]} : vector<8x384xf32> to vector<8x128xf32>
    %263 = arith.addf %261, %262 : vector<8x128xf32>
    %264 = arith.negf %263 : vector<8x128xf32>
    %265 = math.exp %264 : vector<8x128xf32>
    %cst_54 = arith.constant 1.000000e+00 : f32
    %266 = vector.broadcast %cst_54 : f32 to vector<8x128xf32>
    %267 = arith.addf %266, %265 : vector<8x128xf32>
    %268 = arith.divf %266, %267 : vector<8x128xf32>
    %269 = vector.extract_strided_slice %257 {offsets = [0, 128], sizes = [8, 128], strides = [1, 1]} : vector<8x384xf32> to vector<8x128xf32>
    %270 = vector.extract_strided_slice %248 {offsets = [0, 128], sizes = [8, 128], strides = [1, 1]} : vector<8x384xf32> to vector<8x128xf32>
    %271 = arith.addf %269, %270 : vector<8x128xf32>
    %272 = arith.negf %271 : vector<8x128xf32>
    %273 = math.exp %272 : vector<8x128xf32>
    %cst_55 = arith.constant 1.000000e+00 : f32
    %274 = vector.broadcast %cst_55 : f32 to vector<8x128xf32>
    %275 = arith.addf %274, %273 : vector<8x128xf32>
    %276 = arith.divf %274, %275 : vector<8x128xf32>
    %277 = vector.extract_strided_slice %257 {offsets = [0, 256], sizes = [8, 128], strides = [1, 1]} : vector<8x384xf32> to vector<8x128xf32>
    %278 = vector.extract_strided_slice %248 {offsets = [0, 256], sizes = [8, 128], strides = [1, 1]} : vector<8x384xf32> to vector<8x128xf32>
    %279 = arith.mulf %268, %278 : vector<8x128xf32>
    %280 = arith.addf %277, %279 : vector<8x128xf32>
    %281 = math.tanh %280 : vector<8x128xf32>
    %cst_56 = arith.constant 1.000000e+00 : f32
    %282 = vector.broadcast %cst_56 : f32 to vector<8x128xf32>
    %283 = arith.subf %282, %276 : vector<8x128xf32>
    %284 = arith.mulf %283, %281 : vector<8x128xf32>
    %285 = arith.mulf %276, %239 : vector<8x128xf32>
    %286 = arith.addf %284, %285 : vector<8x128xf32>
    %287 = vector.extract_strided_slice %260 {offsets = [0, 0], sizes = [8, 128], strides = [1, 1]} : vector<8x384xf32> to vector<8x128xf32>
    %288 = vector.extract_strided_slice %250 {offsets = [0, 0], sizes = [8, 128], strides = [1, 1]} : vector<8x384xf32> to vector<8x128xf32>
    %289 = arith.addf %287, %288 : vector<8x128xf32>
    %290 = arith.negf %289 : vector<8x128xf32>
    %291 = math.exp %290 : vector<8x128xf32>
    %cst_57 = arith.constant 1.000000e+00 : f32
    %292 = vector.broadcast %cst_57 : f32 to vector<8x128xf32>
    %293 = arith.addf %292, %291 : vector<8x128xf32>
    %294 = arith.divf %292, %293 : vector<8x128xf32>
    %295 = vector.extract_strided_slice %260 {offsets = [0, 128], sizes = [8, 128], strides = [1, 1]} : vector<8x384xf32> to vector<8x128xf32>
    %296 = vector.extract_strided_slice %250 {offsets = [0, 128], sizes = [8, 128], strides = [1, 1]} : vector<8x384xf32> to vector<8x128xf32>
    %297 = arith.addf %295, %296 : vector<8x128xf32>
    %298 = arith.negf %297 : vector<8x128xf32>
    %299 = math.exp %298 : vector<8x128xf32>
    %cst_58 = arith.constant 1.000000e+00 : f32
    %300 = vector.broadcast %cst_58 : f32 to vector<8x128xf32>
    %301 = arith.addf %300, %299 : vector<8x128xf32>
    %302 = arith.divf %300, %301 : vector<8x128xf32>
    %303 = vector.extract_strided_slice %260 {offsets = [0, 256], sizes = [8, 128], strides = [1, 1]} : vector<8x384xf32> to vector<8x128xf32>
    %304 = vector.extract_strided_slice %250 {offsets = [0, 256], sizes = [8, 128], strides = [1, 1]} : vector<8x384xf32> to vector<8x128xf32>
    %305 = arith.mulf %294, %304 : vector<8x128xf32>
    %306 = arith.addf %303, %305 : vector<8x128xf32>
    %307 = math.tanh %306 : vector<8x128xf32>
    %cst_59 = arith.constant 1.000000e+00 : f32
    %308 = vector.broadcast %cst_59 : f32 to vector<8x128xf32>
    %309 = arith.subf %308, %302 : vector<8x128xf32>
    %310 = arith.mulf %309, %307 : vector<8x128xf32>
    %311 = arith.mulf %302, %242 : vector<8x128xf32>
    %312 = arith.addf %310, %311 : vector<8x128xf32>
    %313 = vector.broadcast %c3_i32 : i32 to vector<8x128xi32>
    %314 = arith.cmpi sgt, %10, %313 : vector<8x128xi32>
    %315 = arith.select %314, %286, %239 : vector<8x128xi1>, vector<8x128xf32>
    %316 = vector.broadcast %243 : i32 to vector<8x128xi32>
    %317 = arith.cmpi sgt, %10, %316 : vector<8x128xi32>
    %318 = arith.select %317, %312, %242 : vector<8x128xi1>, vector<8x128xf32>
    %c4_i32 = arith.constant 4 : i32
    %c7_i32_60 = arith.constant 7 : i32
    %319 = arith.subi %c7_i32_60, %c4_i32 : i32
    %320 = tpu.concatenate %315, %318 in 0 : vector<8x128xf32>, vector<8x128xf32> -> vector<16x128xf32>
    %321 = arith.truncf %320 : vector<16x128xf32> to vector<16x128xbf16>
    %cst_61 = arith.constant dense<0.000000e+00> : vector<16x768xf32>
    %322 = tpu.matmul %321, %1, %cst_61 {dimension_numbers = #tpu.dot_dimension_numbers<[1], [0], [0], [1], [0, 0, 1, 1], [], []>} : vector<16x128xbf16>, vector<128x768xbf16>, vector<16x768xf32> -> vector<16x768xf32>
    %323 = vector.extract_strided_slice %322 {offsets = [0, 0], sizes = [8, 384], strides = [1, 1]} : vector<16x768xf32> to vector<8x384xf32>
    %324 = arith.addf %323, %4 : vector<8x384xf32>
    %325 = vector.extract_strided_slice %322 {offsets = [8, 384], sizes = [8, 384], strides = [1, 1]} : vector<16x768xf32> to vector<8x384xf32>
    %326 = arith.addf %325, %7 : vector<8x384xf32>
    %c8_i32_62 = arith.constant 8 : i32
    %327 = arith.muli %c4_i32, %c8_i32_62 : i32
    %328 = tpu.assume_multiple %327, 8 : i32
    %c8_i32_63 = arith.constant 8 : i32
    %329 = arith.muli %319, %c8_i32_63 : i32
    %330 = tpu.assume_multiple %329, 8 : i32
    %331 = arith.index_cast %328 : i32 to index
    %c0_64 = arith.constant 0 : index
    %332 = vector.load %arg12[%331, %c0_64] : memref<64x768xbf16, #tpu.memory_space<vmem>>, vector<8x384xbf16>
    %333 = arith.extf %332 : vector<8x384xbf16> to vector<8x384xf32>
    %334 = arith.index_cast %330 : i32 to index
    %c384_65 = arith.constant 384 : index
    %335 = vector.load %arg12[%334, %c384_65] : memref<64x768xbf16, #tpu.memory_space<vmem>>, vector<8x384xbf16>
    %336 = arith.extf %335 : vector<8x384xbf16> to vector<8x384xf32>
    %337 = vector.extract_strided_slice %333 {offsets = [0, 0], sizes = [8, 128], strides = [1, 1]} : vector<8x384xf32> to vector<8x128xf32>
    %338 = vector.extract_strided_slice %324 {offsets = [0, 0], sizes = [8, 128], strides = [1, 1]} : vector<8x384xf32> to vector<8x128xf32>
    %339 = arith.addf %337, %338 : vector<8x128xf32>
    %340 = arith.negf %339 : vector<8x128xf32>
    %341 = math.exp %340 : vector<8x128xf32>
    %cst_66 = arith.constant 1.000000e+00 : f32
    %342 = vector.broadcast %cst_66 : f32 to vector<8x128xf32>
    %343 = arith.addf %342, %341 : vector<8x128xf32>
    %344 = arith.divf %342, %343 : vector<8x128xf32>
    %345 = vector.extract_strided_slice %333 {offsets = [0, 128], sizes = [8, 128], strides = [1, 1]} : vector<8x384xf32> to vector<8x128xf32>
    %346 = vector.extract_strided_slice %324 {offsets = [0, 128], sizes = [8, 128], strides = [1, 1]} : vector<8x384xf32> to vector<8x128xf32>
    %347 = arith.addf %345, %346 : vector<8x128xf32>
    %348 = arith.negf %347 : vector<8x128xf32>
    %349 = math.exp %348 : vector<8x128xf32>
    %cst_67 = arith.constant 1.000000e+00 : f32
    %350 = vector.broadcast %cst_67 : f32 to vector<8x128xf32>
    %351 = arith.addf %350, %349 : vector<8x128xf32>
    %352 = arith.divf %350, %351 : vector<8x128xf32>
    %353 = vector.extract_strided_slice %333 {offsets = [0, 256], sizes = [8, 128], strides = [1, 1]} : vector<8x384xf32> to vector<8x128xf32>
    %354 = vector.extract_strided_slice %324 {offsets = [0, 256], sizes = [8, 128], strides = [1, 1]} : vector<8x384xf32> to vector<8x128xf32>
    %355 = arith.mulf %344, %354 : vector<8x128xf32>
    %356 = arith.addf %353, %355 : vector<8x128xf32>
    %357 = math.tanh %356 : vector<8x128xf32>
    %cst_68 = arith.constant 1.000000e+00 : f32
    %358 = vector.broadcast %cst_68 : f32 to vector<8x128xf32>
    %359 = arith.subf %358, %352 : vector<8x128xf32>
    %360 = arith.mulf %359, %357 : vector<8x128xf32>
    %361 = arith.mulf %352, %315 : vector<8x128xf32>
    %362 = arith.addf %360, %361 : vector<8x128xf32>
    %363 = vector.extract_strided_slice %336 {offsets = [0, 0], sizes = [8, 128], strides = [1, 1]} : vector<8x384xf32> to vector<8x128xf32>
    %364 = vector.extract_strided_slice %326 {offsets = [0, 0], sizes = [8, 128], strides = [1, 1]} : vector<8x384xf32> to vector<8x128xf32>
    %365 = arith.addf %363, %364 : vector<8x128xf32>
    %366 = arith.negf %365 : vector<8x128xf32>
    %367 = math.exp %366 : vector<8x128xf32>
    %cst_69 = arith.constant 1.000000e+00 : f32
    %368 = vector.broadcast %cst_69 : f32 to vector<8x128xf32>
    %369 = arith.addf %368, %367 : vector<8x128xf32>
    %370 = arith.divf %368, %369 : vector<8x128xf32>
    %371 = vector.extract_strided_slice %336 {offsets = [0, 128], sizes = [8, 128], strides = [1, 1]} : vector<8x384xf32> to vector<8x128xf32>
    %372 = vector.extract_strided_slice %326 {offsets = [0, 128], sizes = [8, 128], strides = [1, 1]} : vector<8x384xf32> to vector<8x128xf32>
    %373 = arith.addf %371, %372 : vector<8x128xf32>
    %374 = arith.negf %373 : vector<8x128xf32>
    %375 = math.exp %374 : vector<8x128xf32>
    %cst_70 = arith.constant 1.000000e+00 : f32
    %376 = vector.broadcast %cst_70 : f32 to vector<8x128xf32>
    %377 = arith.addf %376, %375 : vector<8x128xf32>
    %378 = arith.divf %376, %377 : vector<8x128xf32>
    %379 = vector.extract_strided_slice %336 {offsets = [0, 256], sizes = [8, 128], strides = [1, 1]} : vector<8x384xf32> to vector<8x128xf32>
    %380 = vector.extract_strided_slice %326 {offsets = [0, 256], sizes = [8, 128], strides = [1, 1]} : vector<8x384xf32> to vector<8x128xf32>
    %381 = arith.mulf %370, %380 : vector<8x128xf32>
    %382 = arith.addf %379, %381 : vector<8x128xf32>
    %383 = math.tanh %382 : vector<8x128xf32>
    %cst_71 = arith.constant 1.000000e+00 : f32
    %384 = vector.broadcast %cst_71 : f32 to vector<8x128xf32>
    %385 = arith.subf %384, %378 : vector<8x128xf32>
    %386 = arith.mulf %385, %383 : vector<8x128xf32>
    %387 = arith.mulf %378, %318 : vector<8x128xf32>
    %388 = arith.addf %386, %387 : vector<8x128xf32>
    %389 = vector.broadcast %c4_i32 : i32 to vector<8x128xi32>
    %390 = arith.cmpi sgt, %10, %389 : vector<8x128xi32>
    %391 = arith.select %390, %362, %315 : vector<8x128xi1>, vector<8x128xf32>
    %392 = vector.broadcast %319 : i32 to vector<8x128xi32>
    %393 = arith.cmpi sgt, %10, %392 : vector<8x128xi32>
    %394 = arith.select %393, %388, %318 : vector<8x128xi1>, vector<8x128xf32>
    %c5_i32 = arith.constant 5 : i32
    %c7_i32_72 = arith.constant 7 : i32
    %395 = arith.subi %c7_i32_72, %c5_i32 : i32
    %396 = tpu.concatenate %391, %394 in 0 : vector<8x128xf32>, vector<8x128xf32> -> vector<16x128xf32>
    %397 = arith.truncf %396 : vector<16x128xf32> to vector<16x128xbf16>
    %cst_73 = arith.constant dense<0.000000e+00> : vector<16x768xf32>
    %398 = tpu.matmul %397, %1, %cst_73 {dimension_numbers = #tpu.dot_dimension_numbers<[1], [0], [0], [1], [0, 0, 1, 1], [], []>} : vector<16x128xbf16>, vector<128x768xbf16>, vector<16x768xf32> -> vector<16x768xf32>
    %399 = vector.extract_strided_slice %398 {offsets = [0, 0], sizes = [8, 384], strides = [1, 1]} : vector<16x768xf32> to vector<8x384xf32>
    %400 = arith.addf %399, %4 : vector<8x384xf32>
    %401 = vector.extract_strided_slice %398 {offsets = [8, 384], sizes = [8, 384], strides = [1, 1]} : vector<16x768xf32> to vector<8x384xf32>
    %402 = arith.addf %401, %7 : vector<8x384xf32>
    %c8_i32_74 = arith.constant 8 : i32
    %403 = arith.muli %c5_i32, %c8_i32_74 : i32
    %404 = tpu.assume_multiple %403, 8 : i32
    %c8_i32_75 = arith.constant 8 : i32
    %405 = arith.muli %395, %c8_i32_75 : i32
    %406 = tpu.assume_multiple %405, 8 : i32
    %407 = arith.index_cast %404 : i32 to index
    %c0_76 = arith.constant 0 : index
    %408 = vector.load %arg12[%407, %c0_76] : memref<64x768xbf16, #tpu.memory_space<vmem>>, vector<8x384xbf16>
    %409 = arith.extf %408 : vector<8x384xbf16> to vector<8x384xf32>
    %410 = arith.index_cast %406 : i32 to index
    %c384_77 = arith.constant 384 : index
    %411 = vector.load %arg12[%410, %c384_77] : memref<64x768xbf16, #tpu.memory_space<vmem>>, vector<8x384xbf16>
    %412 = arith.extf %411 : vector<8x384xbf16> to vector<8x384xf32>
    %413 = vector.extract_strided_slice %409 {offsets = [0, 0], sizes = [8, 128], strides = [1, 1]} : vector<8x384xf32> to vector<8x128xf32>
    %414 = vector.extract_strided_slice %400 {offsets = [0, 0], sizes = [8, 128], strides = [1, 1]} : vector<8x384xf32> to vector<8x128xf32>
    %415 = arith.addf %413, %414 : vector<8x128xf32>
    %416 = arith.negf %415 : vector<8x128xf32>
    %417 = math.exp %416 : vector<8x128xf32>
    %cst_78 = arith.constant 1.000000e+00 : f32
    %418 = vector.broadcast %cst_78 : f32 to vector<8x128xf32>
    %419 = arith.addf %418, %417 : vector<8x128xf32>
    %420 = arith.divf %418, %419 : vector<8x128xf32>
    %421 = vector.extract_strided_slice %409 {offsets = [0, 128], sizes = [8, 128], strides = [1, 1]} : vector<8x384xf32> to vector<8x128xf32>
    %422 = vector.extract_strided_slice %400 {offsets = [0, 128], sizes = [8, 128], strides = [1, 1]} : vector<8x384xf32> to vector<8x128xf32>
    %423 = arith.addf %421, %422 : vector<8x128xf32>
    %424 = arith.negf %423 : vector<8x128xf32>
    %425 = math.exp %424 : vector<8x128xf32>
    %cst_79 = arith.constant 1.000000e+00 : f32
    %426 = vector.broadcast %cst_79 : f32 to vector<8x128xf32>
    %427 = arith.addf %426, %425 : vector<8x128xf32>
    %428 = arith.divf %426, %427 : vector<8x128xf32>
    %429 = vector.extract_strided_slice %409 {offsets = [0, 256], sizes = [8, 128], strides = [1, 1]} : vector<8x384xf32> to vector<8x128xf32>
    %430 = vector.extract_strided_slice %400 {offsets = [0, 256], sizes = [8, 128], strides = [1, 1]} : vector<8x384xf32> to vector<8x128xf32>
    %431 = arith.mulf %420, %430 : vector<8x128xf32>
    %432 = arith.addf %429, %431 : vector<8x128xf32>
    %433 = math.tanh %432 : vector<8x128xf32>
    %cst_80 = arith.constant 1.000000e+00 : f32
    %434 = vector.broadcast %cst_80 : f32 to vector<8x128xf32>
    %435 = arith.subf %434, %428 : vector<8x128xf32>
    %436 = arith.mulf %435, %433 : vector<8x128xf32>
    %437 = arith.mulf %428, %391 : vector<8x128xf32>
    %438 = arith.addf %436, %437 : vector<8x128xf32>
    %439 = vector.extract_strided_slice %412 {offsets = [0, 0], sizes = [8, 128], strides = [1, 1]} : vector<8x384xf32> to vector<8x128xf32>
    %440 = vector.extract_strided_slice %402 {offsets = [0, 0], sizes = [8, 128], strides = [1, 1]} : vector<8x384xf32> to vector<8x128xf32>
    %441 = arith.addf %439, %440 : vector<8x128xf32>
    %442 = arith.negf %441 : vector<8x128xf32>
    %443 = math.exp %442 : vector<8x128xf32>
    %cst_81 = arith.constant 1.000000e+00 : f32
    %444 = vector.broadcast %cst_81 : f32 to vector<8x128xf32>
    %445 = arith.addf %444, %443 : vector<8x128xf32>
    %446 = arith.divf %444, %445 : vector<8x128xf32>
    %447 = vector.extract_strided_slice %412 {offsets = [0, 128], sizes = [8, 128], strides = [1, 1]} : vector<8x384xf32> to vector<8x128xf32>
    %448 = vector.extract_strided_slice %402 {offsets = [0, 128], sizes = [8, 128], strides = [1, 1]} : vector<8x384xf32> to vector<8x128xf32>
    %449 = arith.addf %447, %448 : vector<8x128xf32>
    %450 = arith.negf %449 : vector<8x128xf32>
    %451 = math.exp %450 : vector<8x128xf32>
    %cst_82 = arith.constant 1.000000e+00 : f32
    %452 = vector.broadcast %cst_82 : f32 to vector<8x128xf32>
    %453 = arith.addf %452, %451 : vector<8x128xf32>
    %454 = arith.divf %452, %453 : vector<8x128xf32>
    %455 = vector.extract_strided_slice %412 {offsets = [0, 256], sizes = [8, 128], strides = [1, 1]} : vector<8x384xf32> to vector<8x128xf32>
    %456 = vector.extract_strided_slice %402 {offsets = [0, 256], sizes = [8, 128], strides = [1, 1]} : vector<8x384xf32> to vector<8x128xf32>
    %457 = arith.mulf %446, %456 : vector<8x128xf32>
    %458 = arith.addf %455, %457 : vector<8x128xf32>
    %459 = math.tanh %458 : vector<8x128xf32>
    %cst_83 = arith.constant 1.000000e+00 : f32
    %460 = vector.broadcast %cst_83 : f32 to vector<8x128xf32>
    %461 = arith.subf %460, %454 : vector<8x128xf32>
    %462 = arith.mulf %461, %459 : vector<8x128xf32>
    %463 = arith.mulf %454, %394 : vector<8x128xf32>
    %464 = arith.addf %462, %463 : vector<8x128xf32>
    %465 = vector.broadcast %c5_i32 : i32 to vector<8x128xi32>
    %466 = arith.cmpi sgt, %10, %465 : vector<8x128xi32>
    %467 = arith.select %466, %438, %391 : vector<8x128xi1>, vector<8x128xf32>
    %468 = vector.broadcast %395 : i32 to vector<8x128xi32>
    %469 = arith.cmpi sgt, %10, %468 : vector<8x128xi32>
    %470 = arith.select %469, %464, %394 : vector<8x128xi1>, vector<8x128xf32>
    %c6_i32 = arith.constant 6 : i32
    %c7_i32_84 = arith.constant 7 : i32
    %471 = arith.subi %c7_i32_84, %c6_i32 : i32
    %472 = tpu.concatenate %467, %470 in 0 : vector<8x128xf32>, vector<8x128xf32> -> vector<16x128xf32>
    %473 = arith.truncf %472 : vector<16x128xf32> to vector<16x128xbf16>
    %cst_85 = arith.constant dense<0.000000e+00> : vector<16x768xf32>
    %474 = tpu.matmul %473, %1, %cst_85 {dimension_numbers = #tpu.dot_dimension_numbers<[1], [0], [0], [1], [0, 0, 1, 1], [], []>} : vector<16x128xbf16>, vector<128x768xbf16>, vector<16x768xf32> -> vector<16x768xf32>
    %475 = vector.extract_strided_slice %474 {offsets = [0, 0], sizes = [8, 384], strides = [1, 1]} : vector<16x768xf32> to vector<8x384xf32>
    %476 = arith.addf %475, %4 : vector<8x384xf32>
    %477 = vector.extract_strided_slice %474 {offsets = [8, 384], sizes = [8, 384], strides = [1, 1]} : vector<16x768xf32> to vector<8x384xf32>
    %478 = arith.addf %477, %7 : vector<8x384xf32>
    %c8_i32_86 = arith.constant 8 : i32
    %479 = arith.muli %c6_i32, %c8_i32_86 : i32
    %480 = tpu.assume_multiple %479, 8 : i32
    %c8_i32_87 = arith.constant 8 : i32
    %481 = arith.muli %471, %c8_i32_87 : i32
    %482 = tpu.assume_multiple %481, 8 : i32
    %483 = arith.index_cast %480 : i32 to index
    %c0_88 = arith.constant 0 : index
    %484 = vector.load %arg12[%483, %c0_88] : memref<64x768xbf16, #tpu.memory_space<vmem>>, vector<8x384xbf16>
    %485 = arith.extf %484 : vector<8x384xbf16> to vector<8x384xf32>
    %486 = arith.index_cast %482 : i32 to index
    %c384_89 = arith.constant 384 : index
    %487 = vector.load %arg12[%486, %c384_89] : memref<64x768xbf16, #tpu.memory_space<vmem>>, vector<8x384xbf16>
    %488 = arith.extf %487 : vector<8x384xbf16> to vector<8x384xf32>
    %489 = vector.extract_strided_slice %485 {offsets = [0, 0], sizes = [8, 128], strides = [1, 1]} : vector<8x384xf32> to vector<8x128xf32>
    %490 = vector.extract_strided_slice %476 {offsets = [0, 0], sizes = [8, 128], strides = [1, 1]} : vector<8x384xf32> to vector<8x128xf32>
    %491 = arith.addf %489, %490 : vector<8x128xf32>
    %492 = arith.negf %491 : vector<8x128xf32>
    %493 = math.exp %492 : vector<8x128xf32>
    %cst_90 = arith.constant 1.000000e+00 : f32
    %494 = vector.broadcast %cst_90 : f32 to vector<8x128xf32>
    %495 = arith.addf %494, %493 : vector<8x128xf32>
    %496 = arith.divf %494, %495 : vector<8x128xf32>
    %497 = vector.extract_strided_slice %485 {offsets = [0, 128], sizes = [8, 128], strides = [1, 1]} : vector<8x384xf32> to vector<8x128xf32>
    %498 = vector.extract_strided_slice %476 {offsets = [0, 128], sizes = [8, 128], strides = [1, 1]} : vector<8x384xf32> to vector<8x128xf32>
    %499 = arith.addf %497, %498 : vector<8x128xf32>
    %500 = arith.negf %499 : vector<8x128xf32>
    %501 = math.exp %500 : vector<8x128xf32>
    %cst_91 = arith.constant 1.000000e+00 : f32
    %502 = vector.broadcast %cst_91 : f32 to vector<8x128xf32>
    %503 = arith.addf %502, %501 : vector<8x128xf32>
    %504 = arith.divf %502, %503 : vector<8x128xf32>
    %505 = vector.extract_strided_slice %485 {offsets = [0, 256], sizes = [8, 128], strides = [1, 1]} : vector<8x384xf32> to vector<8x128xf32>
    %506 = vector.extract_strided_slice %476 {offsets = [0, 256], sizes = [8, 128], strides = [1, 1]} : vector<8x384xf32> to vector<8x128xf32>
    %507 = arith.mulf %496, %506 : vector<8x128xf32>
    %508 = arith.addf %505, %507 : vector<8x128xf32>
    %509 = math.tanh %508 : vector<8x128xf32>
    %cst_92 = arith.constant 1.000000e+00 : f32
    %510 = vector.broadcast %cst_92 : f32 to vector<8x128xf32>
    %511 = arith.subf %510, %504 : vector<8x128xf32>
    %512 = arith.mulf %511, %509 : vector<8x128xf32>
    %513 = arith.mulf %504, %467 : vector<8x128xf32>
    %514 = arith.addf %512, %513 : vector<8x128xf32>
    %515 = vector.extract_strided_slice %488 {offsets = [0, 0], sizes = [8, 128], strides = [1, 1]} : vector<8x384xf32> to vector<8x128xf32>
    %516 = vector.extract_strided_slice %478 {offsets = [0, 0], sizes = [8, 128], strides = [1, 1]} : vector<8x384xf32> to vector<8x128xf32>
    %517 = arith.addf %515, %516 : vector<8x128xf32>
    %518 = arith.negf %517 : vector<8x128xf32>
    %519 = math.exp %518 : vector<8x128xf32>
    %cst_93 = arith.constant 1.000000e+00 : f32
    %520 = vector.broadcast %cst_93 : f32 to vector<8x128xf32>
    %521 = arith.addf %520, %519 : vector<8x128xf32>
    %522 = arith.divf %520, %521 : vector<8x128xf32>
    %523 = vector.extract_strided_slice %488 {offsets = [0, 128], sizes = [8, 128], strides = [1, 1]} : vector<8x384xf32> to vector<8x128xf32>
    %524 = vector.extract_strided_slice %478 {offsets = [0, 128], sizes = [8, 128], strides = [1, 1]} : vector<8x384xf32> to vector<8x128xf32>
    %525 = arith.addf %523, %524 : vector<8x128xf32>
    %526 = arith.negf %525 : vector<8x128xf32>
    %527 = math.exp %526 : vector<8x128xf32>
    %cst_94 = arith.constant 1.000000e+00 : f32
    %528 = vector.broadcast %cst_94 : f32 to vector<8x128xf32>
    %529 = arith.addf %528, %527 : vector<8x128xf32>
    %530 = arith.divf %528, %529 : vector<8x128xf32>
    %531 = vector.extract_strided_slice %488 {offsets = [0, 256], sizes = [8, 128], strides = [1, 1]} : vector<8x384xf32> to vector<8x128xf32>
    %532 = vector.extract_strided_slice %478 {offsets = [0, 256], sizes = [8, 128], strides = [1, 1]} : vector<8x384xf32> to vector<8x128xf32>
    %533 = arith.mulf %522, %532 : vector<8x128xf32>
    %534 = arith.addf %531, %533 : vector<8x128xf32>
    %535 = math.tanh %534 : vector<8x128xf32>
    %cst_95 = arith.constant 1.000000e+00 : f32
    %536 = vector.broadcast %cst_95 : f32 to vector<8x128xf32>
    %537 = arith.subf %536, %530 : vector<8x128xf32>
    %538 = arith.mulf %537, %535 : vector<8x128xf32>
    %539 = arith.mulf %530, %470 : vector<8x128xf32>
    %540 = arith.addf %538, %539 : vector<8x128xf32>
    %541 = vector.broadcast %c6_i32 : i32 to vector<8x128xi32>
    %542 = arith.cmpi sgt, %10, %541 : vector<8x128xi32>
    %543 = arith.select %542, %514, %467 : vector<8x128xi1>, vector<8x128xf32>
    %544 = vector.broadcast %471 : i32 to vector<8x128xi32>
    %545 = arith.cmpi sgt, %10, %544 : vector<8x128xi32>
    %546 = arith.select %545, %540, %470 : vector<8x128xi1>, vector<8x128xf32>
    %c7_i32_96 = arith.constant 7 : i32
    %c7_i32_97 = arith.constant 7 : i32
    %547 = arith.subi %c7_i32_97, %c7_i32_96 : i32
    %548 = tpu.concatenate %543, %546 in 0 : vector<8x128xf32>, vector<8x128xf32> -> vector<16x128xf32>
    %549 = arith.truncf %548 : vector<16x128xf32> to vector<16x128xbf16>
    %cst_98 = arith.constant dense<0.000000e+00> : vector<16x768xf32>
    %550 = tpu.matmul %549, %1, %cst_98 {dimension_numbers = #tpu.dot_dimension_numbers<[1], [0], [0], [1], [0, 0, 1, 1], [], []>} : vector<16x128xbf16>, vector<128x768xbf16>, vector<16x768xf32> -> vector<16x768xf32>
    %551 = vector.extract_strided_slice %550 {offsets = [0, 0], sizes = [8, 384], strides = [1, 1]} : vector<16x768xf32> to vector<8x384xf32>
    %552 = arith.addf %551, %4 : vector<8x384xf32>
    %553 = vector.extract_strided_slice %550 {offsets = [8, 384], sizes = [8, 384], strides = [1, 1]} : vector<16x768xf32> to vector<8x384xf32>
    %554 = arith.addf %553, %7 : vector<8x384xf32>
    %c8_i32_99 = arith.constant 8 : i32
    %555 = arith.muli %c7_i32_96, %c8_i32_99 : i32
    %556 = tpu.assume_multiple %555, 8 : i32
    %c8_i32_100 = arith.constant 8 : i32
    %557 = arith.muli %547, %c8_i32_100 : i32
    %558 = tpu.assume_multiple %557, 8 : i32
    %559 = arith.index_cast %556 : i32 to index
    %c0_101 = arith.constant 0 : index
    %560 = vector.load %arg12[%559, %c0_101] : memref<64x768xbf16, #tpu.memory_space<vmem>>, vector<8x384xbf16>
    %561 = arith.extf %560 : vector<8x384xbf16> to vector<8x384xf32>
    %562 = arith.index_cast %558 : i32 to index
    %c384_102 = arith.constant 384 : index
    %563 = vector.load %arg12[%562, %c384_102] : memref<64x768xbf16, #tpu.memory_space<vmem>>, vector<8x384xbf16>
    %564 = arith.extf %563 : vector<8x384xbf16> to vector<8x384xf32>
    %565 = vector.extract_strided_slice %561 {offsets = [0, 0], sizes = [8, 128], strides = [1, 1]} : vector<8x384xf32> to vector<8x128xf32>
    %566 = vector.extract_strided_slice %552 {offsets = [0, 0], sizes = [8, 128], strides = [1, 1]} : vector<8x384xf32> to vector<8x128xf32>
    %567 = arith.addf %565, %566 : vector<8x128xf32>
    %568 = arith.negf %567 : vector<8x128xf32>
    %569 = math.exp %568 : vector<8x128xf32>
    %cst_103 = arith.constant 1.000000e+00 : f32
    %570 = vector.broadcast %cst_103 : f32 to vector<8x128xf32>
    %571 = arith.addf %570, %569 : vector<8x128xf32>
    %572 = arith.divf %570, %571 : vector<8x128xf32>
    %573 = vector.extract_strided_slice %561 {offsets = [0, 128], sizes = [8, 128], strides = [1, 1]} : vector<8x384xf32> to vector<8x128xf32>
    %574 = vector.extract_strided_slice %552 {offsets = [0, 128], sizes = [8, 128], strides = [1, 1]} : vector<8x384xf32> to vector<8x128xf32>
    %575 = arith.addf %573, %574 : vector<8x128xf32>
    %576 = arith.negf %575 : vector<8x128xf32>
    %577 = math.exp %576 : vector<8x128xf32>
    %cst_104 = arith.constant 1.000000e+00 : f32
    %578 = vector.broadcast %cst_104 : f32 to vector<8x128xf32>
    %579 = arith.addf %578, %577 : vector<8x128xf32>
    %580 = arith.divf %578, %579 : vector<8x128xf32>
    %581 = vector.extract_strided_slice %561 {offsets = [0, 256], sizes = [8, 128], strides = [1, 1]} : vector<8x384xf32> to vector<8x128xf32>
    %582 = vector.extract_strided_slice %552 {offsets = [0, 256], sizes = [8, 128], strides = [1, 1]} : vector<8x384xf32> to vector<8x128xf32>
    %583 = arith.mulf %572, %582 : vector<8x128xf32>
    %584 = arith.addf %581, %583 : vector<8x128xf32>
    %585 = math.tanh %584 : vector<8x128xf32>
    %cst_105 = arith.constant 1.000000e+00 : f32
    %586 = vector.broadcast %cst_105 : f32 to vector<8x128xf32>
    %587 = arith.subf %586, %580 : vector<8x128xf32>
    %588 = arith.mulf %587, %585 : vector<8x128xf32>
    %589 = arith.mulf %580, %543 : vector<8x128xf32>
    %590 = arith.addf %588, %589 : vector<8x128xf32>
    %591 = vector.extract_strided_slice %564 {offsets = [0, 0], sizes = [8, 128], strides = [1, 1]} : vector<8x384xf32> to vector<8x128xf32>
    %592 = vector.extract_strided_slice %554 {offsets = [0, 0], sizes = [8, 128], strides = [1, 1]} : vector<8x384xf32> to vector<8x128xf32>
    %593 = arith.addf %591, %592 : vector<8x128xf32>
    %594 = arith.negf %593 : vector<8x128xf32>
    %595 = math.exp %594 : vector<8x128xf32>
    %cst_106 = arith.constant 1.000000e+00 : f32
    %596 = vector.broadcast %cst_106 : f32 to vector<8x128xf32>
    %597 = arith.addf %596, %595 : vector<8x128xf32>
    %598 = arith.divf %596, %597 : vector<8x128xf32>
    %599 = vector.extract_strided_slice %564 {offsets = [0, 128], sizes = [8, 128], strides = [1, 1]} : vector<8x384xf32> to vector<8x128xf32>
    %600 = vector.extract_strided_slice %554 {offsets = [0, 128], sizes = [8, 128], strides = [1, 1]} : vector<8x384xf32> to vector<8x128xf32>
    %601 = arith.addf %599, %600 : vector<8x128xf32>
    %602 = arith.negf %601 : vector<8x128xf32>
    %603 = math.exp %602 : vector<8x128xf32>
    %cst_107 = arith.constant 1.000000e+00 : f32
    %604 = vector.broadcast %cst_107 : f32 to vector<8x128xf32>
    %605 = arith.addf %604, %603 : vector<8x128xf32>
    %606 = arith.divf %604, %605 : vector<8x128xf32>
    %607 = vector.extract_strided_slice %564 {offsets = [0, 256], sizes = [8, 128], strides = [1, 1]} : vector<8x384xf32> to vector<8x128xf32>
    %608 = vector.extract_strided_slice %554 {offsets = [0, 256], sizes = [8, 128], strides = [1, 1]} : vector<8x384xf32> to vector<8x128xf32>
    %609 = arith.mulf %598, %608 : vector<8x128xf32>
    %610 = arith.addf %607, %609 : vector<8x128xf32>
    %611 = math.tanh %610 : vector<8x128xf32>
    %cst_108 = arith.constant 1.000000e+00 : f32
    %612 = vector.broadcast %cst_108 : f32 to vector<8x128xf32>
    %613 = arith.subf %612, %606 : vector<8x128xf32>
    %614 = arith.mulf %613, %611 : vector<8x128xf32>
    %615 = arith.mulf %606, %546 : vector<8x128xf32>
    %616 = arith.addf %614, %615 : vector<8x128xf32>
    %617 = vector.broadcast %c7_i32_96 : i32 to vector<8x128xi32>
    %618 = arith.cmpi sgt, %10, %617 : vector<8x128xi32>
    %619 = arith.select %618, %590, %543 : vector<8x128xi1>, vector<8x128xf32>
    %620 = vector.broadcast %547 : i32 to vector<8x128xi32>
    %621 = arith.cmpi sgt, %10, %620 : vector<8x128xi32>
    %622 = arith.select %621, %616, %546 : vector<8x128xi1>, vector<8x128xf32>
    %c8_i32_109 = arith.constant 8 : i32
    %c0_110 = arith.constant 0 : index
    %c0_111 = arith.constant 0 : index
    %c0_112 = arith.constant 0 : index
    %623 = vector.load %arg11[%c0_110, %c0_111, %c0_112] : memref<2x8x128xf32, #tpu.memory_space<vmem>>, vector<1x8x128xf32>
    %624 = vector.shape_cast %623 : vector<1x8x128xf32> to vector<8x128xf32>
    %625 = vector.shape_cast %619 : vector<8x128xf32> to vector<1x8x128xf32>
    tpu.vector_store %arg11[%c0_110, %c0_111, %c0_112], %625 {strides = array<i32>} : memref<2x8x128xf32, #tpu.memory_space<vmem>>, vector<1x8x128xf32>,
    %c1_113 = arith.constant 1 : index
    %c0_114 = arith.constant 0 : index
    %c0_115 = arith.constant 0 : index
    %626 = vector.load %arg11[%c1_113, %c0_114, %c0_115] : memref<2x8x128xf32, #tpu.memory_space<vmem>>, vector<1x8x128xf32>
    %627 = vector.shape_cast %626 : vector<1x8x128xf32> to vector<8x128xf32>
    %628 = vector.shape_cast %622 : vector<8x128xf32> to vector<1x8x128xf32>
    tpu.vector_store %arg11[%c1_113, %c0_114, %c0_115], %628 {strides = array<i32>} : memref<2x8x128xf32, #tpu.memory_space<vmem>>, vector<1x8x128xf32>,
    %629 = tpu.concatenate %619, %622 in 1 : vector<8x128xf32>, vector<8x128xf32> -> vector<8x256xf32>
    %630 = arith.truncf %629 : vector<8x256xf32> to vector<8x256xbf16>
    %c0_116 = arith.constant 0 : index
    %c0_117 = arith.constant 0 : index
    %631 = vector.load %arg8[%c0_116, %c0_117] : memref<256x128xbf16, #tpu.memory_space<vmem>>, vector<256x128xbf16>
    %cst_118 = arith.constant dense<0.000000e+00> : vector<8x128xf32>
    %632 = tpu.matmul %630, %631, %cst_118 {dimension_numbers = #tpu.dot_dimension_numbers<[1], [0], [0], [1], [0, 0, 1, 1], [], []>} : vector<8x256xbf16>, vector<256x128xbf16>, vector<8x128xf32> -> vector<8x128xf32>
    %c0_119 = arith.constant 0 : index
    %c0_120 = arith.constant 0 : index
    %633 = vector.load %arg9[%c0_119, %c0_120] : memref<1x128xf32, #tpu.memory_space<vmem>>, vector<1x128xf32>
    %634 = vector.broadcast %633 : vector<1x128xf32> to vector<8x128xf32>
    %635 = arith.addf %632, %634 : vector<8x128xf32>
    %c0_121 = arith.constant 0 : index
    %c0_122 = arith.constant 0 : index
    %636 = vector.load %arg10[%c0_121, %c0_122] : memref<8x128xf32, #tpu.memory_space<vmem>>, vector<8x128xf32>
    tpu.vector_store %arg10[%c0_121, %c0_122], %635 {strides = array<i32>} : memref<8x128xf32, #tpu.memory_space<vmem>>, vector<8x128xf32>,
    return
  }
}

</mosaic_0001>

<bundles_post_ra>
// kernel: _lambda_.1
= control target key start
LH: loop header
LB: loop body
LE: loop exit
PB: predicated region body
PF: predicated region fallthrough
CT: control target
= control target key end

     0   :  { %17 = vsyncpa [#allocation4], 0  ;;  %s4729_s0 = inlined_call_operand.vmem [shape: s32[8,1], index: 0, kind: input, shape index: {}]   ;;  %s4730_s1 = inlined_call_operand.vmem [shape: bf16[64,128], index: 1, kind: input, shape index: {}]   ;;  %s4731_s2 = inlined_call_operand.vmem [shape: f32[2,8,128], index: 2, kind: input, shape index: {}, may-alias: {2,11}]   ;;  %s4732_s3 = inlined_call_operand.hbm [shape: bf16[128,768], index: 3, kind: input, shape index: {}]   ;;  %s4733_s4 = inlined_call_operand.vmem [shape: f32[1,768], index: 4, kind: input, shape index: {}]   ;;  %s4734_s5 = inlined_call_operand.vmem [shape: bf16[128,768], index: 5, kind: input, shape index: {}]   ;;  %s4735_s6 = inlined_call_operand.vmem [shape: f32[1,384], index: 6, kind: input, shape index: {}]   ;;  %s4736_s7 = inlined_call_operand.vmem [shape: f32[1,384], index: 7, kind: input, shape index: {}]   ;;  %s4737_s8 = inlined_call_operand.hbm [shape: bf16[256,128], index: 8, kind: input, shape index: {}]   ;;  %s4738_s9 = inlined_call_operand.vmem [shape: f32[1,128], index: 9, kind: input, shape index: {}]   ;;  %s4739_s10 = inlined_call_operand.hbm [shape: f32[8,128], index: 10, kind: output, shape index: {0}]   ;;  %s4740_s11 = inlined_call_operand.vmem [shape: f32[2,8,128], index: 11, kind: output, shape index: {1}, may-alias: {2,11}]  }
   0x1   :  { %18 = vsyncpa [#allocation7], 0 }
   0x2   :  { %19 = vsyncpa [#allocation5], 0  ;;  %s30_s19 = sshll.u32 %s4732_s3, 4  ;;  %s3501_s20 = smov [#allocation3]   ;;  %s31_s19 = int_to_ptr.hbm [resolvable:$true] %s30_s19 }
   0x3   :  { %s32_s21 = sshll.u32 %s3501_s20, 4  ;;  %s51_s24 = sshll.u32 %s4737_s8, 4  ;;  %s33_s21 = int_to_ptr.vmem [resolvable:$true] %s32_s21  ;;  %s52_s24 = int_to_ptr.hbm [resolvable:$true] %s51_s24 }
   0x4   :  { %s3502_s25 = smov 384   ;;  %s3503_s26 = smov 24  }
   0x5   :  { %38 = dma.hbm_to_vmem [thread:$0]  %s31_s19, 6144, %s33_s21, [#allocation4], %s3502_s25, %s3502_s25, %s3503_s26  }
   0x6   :  { %s3504_s27 = smov [#allocation6]   ;;  %s3505_s29 = smov 64  }
   0x7   :  { %s53_s28 = sshll.u32 %s3504_s27, 4  ;;  %s3506_s30 = smov 4   ;;  %s54_s28 = int_to_ptr.vmem [resolvable:$true] %s53_s28 }
   0x8   :  { %59 = dma.hbm_to_vmem [thread:$0]  %s52_s24, 2048, %s54_s28, [#allocation7], %s3505_s29, %s3505_s29, %s3506_s30  }
   0x9   :  { %3491 = dma.done.wait [#allocation4], 6144  }
   0xa   :  { %3492 = vsyncadd [#allocation4], 4294961152 }
   0xb   :  { %3493 = dma.done.wait [#allocation7], 2048  }
   0xc   :  { %3494 = vsyncadd [#allocation7], 4294965248  ;;  %s3575_s3 = smov 0  }
   0xd LB: > { %v2793_v0 = vld [vmem:[#allocation3 + $0x150] sm:$0xf]  ;;  %v3153_v1 = vld [vmem:[#allocation3 + $0x164] sm:$0xf0]  ;;  %v3150_v2 = vld [vmem:[#allocation3 + $0x154] sm:$0xf]  ;;  %s3499_s3 = sphi %s3575_s3, %s75_s3  }
   0xe   : > { %v2794_v3 = vor.u32 %v3153_v1, %v2793_v0  ;;  %v2795_v4 = vld [vmem:[#allocation3 + $0x168] sm:$0xf0]  ;;  %v2801_v5 = vld [vmem:[#allocation3 + $0x158] sm:$0xf]  ;;  %v3154_v6 = vld [vmem:[#allocation3 + $0x16c] sm:$0xf0] }
   0xf   : > { %v2798_v7 = vor.u32 %v3150_v2, %v2795_v4  ;;  %v2802_v8 = vor.u32 %v3154_v6, %v2801_v5  ;;  %v3151_v9 = vld [vmem:[#allocation3 + $0x15c] sm:$0xf]  ;;  %v2803_v10 = vld [vmem:[#allocation3 + $0x170] sm:$0xf0]  ;;  %v2769_v11 = vld [vmem:[#allocation3 + $0x120] sm:$0xf] }
  0x10   : > { %399 = vmatpush.bf16.msra.mxu0 %v2794_v3  ;;  %v2806_v12 = vor.u32 %v3151_v9, %v2803_v10  ;;  %v3147_v13 = vld [vmem:[#allocation3 + $0x134] sm:$0xf0]  ;;  %v3144_v14 = vld [vmem:[#allocation3 + $0x124] sm:$0xf]  ;;  %v2771_v15 = vld [vmem:[#allocation3 + $0x138] sm:$0xf0] }
  0x11   : > { %418 = vmatpush.bf16.msra.mxu1 %v2798_v7  ;;  %437 = vmatpush.bf16.msra.mxu2 %v2802_v8  ;;  %v2770_v16 = vor.u32 %v3147_v13, %v2769_v11  ;;  %v2774_v17 = vor.u32 %v3144_v14, %v2771_v15  ;;  %v2777_v18 = vld [vmem:[#allocation3 + $0x128] sm:$0xf]  ;;  %v3148_v19 = vld [vmem:[#allocation3 + $0x13c] sm:$0xf0]  ;;  %v3145_v20 = vld [vmem:[#allocation3 + $0x12c] sm:$0xf] }
  0x12   : > { %456 = vmatpush.bf16.msra.mxu3 %v2806_v12  ;;  %v2778_v21 = vor.u32 %v3148_v19, %v2777_v18  ;;  %v2779_v22 = vld [vmem:[#allocation3 + $0x140] sm:$0xf0]  ;;  %v2745_v23 = vld [vmem:[#allocation3 + $0xf0] sm:$0xf]  ;;  %v3141_v24 = vld [vmem:[#allocation3 + $0x104] sm:$0xf0] }
  0x13   : > { %v2782_v25 = vor.u32 %v3145_v20, %v2779_v22  ;;  %v3138_v26 = vld [vmem:[#allocation3 + $0xf4] sm:$0xf]  ;;  %v2747_v27 = vld [vmem:[#allocation3 + $0x108] sm:$0xf0]  ;;  %v2753_v28 = vld [vmem:[#allocation3 + $0xf8] sm:$0xf]  ;;  %v2746_v29 = vor.u32 %v3141_v24, %v2745_v23 }
  0x14   : > { %400 = vmatpush.bf16.msra.mxu0 %v2770_v16  ;;  %v3142_v30 = vld [vmem:[#allocation3 + $0x10c] sm:$0xf0]  ;;  %v3139_v31 = vld [vmem:[#allocation3 + $0xfc] sm:$0xf]  ;;  %v2755_v32 = vld [vmem:[#allocation3 + $0x110] sm:$0xf0]  ;;  %v2750_v33 = vor.u32 %v3138_v26, %v2747_v27 }
  0x15   : > { %419 = vmatpush.bf16.msra.mxu1 %v2774_v17  ;;  %438 = vmatpush.bf16.msra.mxu2 %v2778_v21  ;;  %v2754_v34 = vor.u32 %v3142_v30, %v2753_v28  ;;  %v2721_v35 = vld [vmem:[#allocation3 + $0xc0] sm:$0xf]  ;;  %v3135_v36 = vld [vmem:[#allocation3 + $0xd4] sm:$0xf0]  ;;  %v3132_v37 = vld [vmem:[#allocation3 + $0xc4] sm:$0xf]  ;;  %v2758_v38 = vor.u32 %v3139_v31, %v2755_v32 }
  0x16   : > { %457 = vmatpush.bf16.msra.mxu3 %v2782_v25  ;;  %v2723_v39 = vld [vmem:[#allocation3 + $0xd8] sm:$0xf0]  ;;  %v2729_v40 = vld [vmem:[#allocation3 + $0xc8] sm:$0xf]  ;;  %v3136_v41 = vld [vmem:[#allocation3 + $0xdc] sm:$0xf0]  ;;  %v2722_v44 = vor.u32 %v3135_v36, %v2721_v35 }
  0x17   : > { %v3133_v42 = vld [vmem:[#allocation3 + $0xcc] sm:$0xf]  ;;  %v2731_v43 = vld [vmem:[#allocation3 + $0xe0] sm:$0xf0]  ;;  %v2726_v45 = vor.u32 %v3132_v37, %v2723_v39  ;;  %v2730_v46 = vor.u32 %v3136_v41, %v2729_v40  ;;  %v2697_v47 = vld [vmem:[#allocation3 + $0x90] sm:$0xf] }
  0x18   : > { %401 = vmatpush.bf16.msra.mxu0 %v2746_v29  ;;  %v3129_v48 = vld [vmem:[#allocation3 + $0xa4] sm:$0xf0]  ;;  %v3126_v49 = vld [vmem:[#allocation3 + $0x94] sm:$0xf]  ;;  %v2734_v50 = vor.u32 %v3133_v42, %v2731_v43  ;;  %v2699_v51 = vld [vmem:[#allocation3 + $0xa8] sm:$0xf0] }
  0x19   : > { %420 = vmatpush.bf16.msra.mxu1 %v2750_v33  ;;  %439 = vmatpush.bf16.msra.mxu2 %v2754_v34  ;;  %v2705_v52 = vld [vmem:[#allocation3 + $0x98] sm:$0xf]  ;;  %v3130_v53 = vld [vmem:[#allocation3 + $0xac] sm:$0xf0]  ;;  %v3127_v54 = vld [vmem:[#allocation3 + $0x9c] sm:$0xf]  ;;  %v2698_v56 = vor.u32 %v3129_v48, %v2697_v47  ;;  %v2702_v57 = vor.u32 %v3126_v49, %v2699_v51 }
  0x1a   : > { %458 = vmatpush.bf16.msra.mxu3 %v2758_v38  ;;  %v2707_v55 = vld [vmem:[#allocation3 + $0xb0] sm:$0xf0]  ;;  %v2706_v58 = vor.u32 %v3130_v53, %v2705_v52  ;;  %v2673_v59 = vld [vmem:[#allocation3 + $0x60] sm:$0xf]  ;;  %v3123_v60 = vld [vmem:[#allocation3 + $0x74] sm:$0xf0] }
  0x1b   : > { %v3120_v61 = vld [vmem:[#allocation3 + $0x64] sm:$0xf]  ;;  %v2710_v62 = vor.u32 %v3127_v54, %v2707_v55  ;;  %v2675_v63 = vld [vmem:[#allocation3 + $0x78] sm:$0xf0]  ;;  %v2681_v0 = vld [vmem:[#allocation3 + $0x68] sm:$0xf]  ;;  %v2674_v4 = vor.u32 %v3123_v60, %v2673_v59 }
  0x1c   : > { %402 = vmatpush.bf16.msra.mxu0 %v2722_v44  ;;  %v3124_v1 = vld [vmem:[#allocation3 + $0x7c] sm:$0xf0]  ;;  %v3121_v2 = vld [vmem:[#allocation3 + $0x6c] sm:$0xf]  ;;  %v2683_v3 = vld [vmem:[#allocation3 + $0x80] sm:$0xf0]  ;;  %v2678_v6 = vor.u32 %v3120_v61, %v2675_v63 }
  0x1d   : > { %421 = vmatpush.bf16.msra.mxu1 %v2726_v45  ;;  %440 = vmatpush.bf16.msra.mxu2 %v2730_v46  ;;  %v2649_v5 = vld [vmem:[#allocation3 + $0x30] sm:$0xf]  ;;  %v2682_v7 = vor.u32 %v3124_v1, %v2681_v0  ;;  %v3117_v8 = vld [vmem:[#allocation3 + $0x44] sm:$0xf0]  ;;  %v3114_v9 = vld [vmem:[#allocation3 + $0x34] sm:$0xf]  ;;  %v2686_v11 = vor.u32 %v3121_v2, %v2683_v3 }
  0x1e   : > { %459 = vmatpush.bf16.msra.mxu3 %v2734_v50  ;;  %v2651_v10 = vld [vmem:[#allocation3 + $0x48] sm:$0xf0]  ;;  %v2657_v12 = vld [vmem:[#allocation3 + $0x38] sm:$0xf]  ;;  %v3118_v13 = vld [vmem:[#allocation3 + $0x4c] sm:$0xf0]  ;;  %v2650_v16 = vor.u32 %v3117_v8, %v2649_v5 }
  0x1f   : > { %s2613_s8 = sshll.u32 %s3499_s3, 5  ;;  %v3115_v14 = vld [vmem:[#allocation3 + $0x3c] sm:$0xf]  ;;  %v2659_v15 = vld [vmem:[#allocation3 + $0x50] sm:$0xf0]  ;;  %v2654_v19 = vor.u32 %v3114_v9, %v2651_v10  ;;  %v2658_v20 = vor.u32 %v3118_v13, %v2657_v12  ;;  %s75_s3 = sadd.s32 1, %s3499_s3  }
  0x20   : > { %403 = vmatpush.bf16.msra.mxu0 %v2698_v56  ;;  %s3581_s12 = sshra.s32 %s2613_s8, 3  ;;  %v2625_v17 = vld [vmem:[#allocation3] sm:$0xf]  ;;  %v3111_v18 = vld [vmem:[#allocation3 + $0x14] sm:$0xf0]  ;;  %v2662_v23 = vor.u32 %v3115_v14, %v2659_v15  ;;  %p72_p0 = scmp.ge.s32.totalorder %s75_s3, 2  }
  0x21   : > { %422 = vmatpush.bf16.msra.mxu1 %v2702_v57  ;;  %441 = vmatpush.bf16.msra.mxu2 %v2706_v58  ;;  %v3108_v21 = vld [vmem:[#allocation3 + $0x4] sm:$0xf]  ;;  %v2627_v22 = vld [vmem:[#allocation3 + $0x18] sm:$0xf0]  ;;  %s2614_s13 = sshll.u32 %s3581_s12, 2  ;;  %v2626_v30 = vor.u32 %v3111_v18, %v2625_v17  ;;  %s3156_s19 = smul.u32 24, %s3581_s12 }
  0x22   : > { %460 = vmatpush.bf16.msra.mxu3 %v2710_v62  ;;  %v2633_v24 = vld [vmem:[#allocation3 + $0x8] sm:$0xf]  ;;  %v3112_v25 = vld [vmem:[#allocation3 + $0x1c] sm:$0xf0]  ;;  %v3109_v26 = vld [vmem:[#allocation3 + $0xc] sm:$0xf]  ;;  %s3587_s16 = scalar_lea.vmem %s4730_s1, %s2614_s13  ;;  %v2630_v33 = vor.u32 %v3108_v21, %v2627_v22 }
  0x23   : > { %v2635_v27 = vld [vmem:[#allocation3 + $0x20] sm:$0xf0]  ;;  %v2809_v28 = vld [vmem:[#allocation3 + $0x160] sm:$0xf]  ;;  %v3155_v29 = vld [vmem:[#allocation3 + $0x174] sm:$0xf0]  ;;  %v2634_v34 = vor.u32 %v3112_v25, %v2633_v24 }
  0x24   : > { %404 = vmatpush.bf16.msra.mxu0 %v2674_v4  ;;  %v3152_v31 = vld [vmem:[#allocation3 + $0x164] sm:$0xf]  ;;  %v2811_v32 = vld [vmem:[#allocation3 + $0x178] sm:$0xf0]  ;;  %v2638_v35 = vor.u32 %v3109_v26, %v2635_v27  ;;  %v2810_v36 = vor.u32 %v3155_v29, %v2809_v28  ;;  %v2785_v39 = vld [vmem:[#allocation3 + $0x130] sm:$0xf] }
  0x25   : > { %423 = vmatpush.bf16.msra.mxu1 %v2678_v6  ;;  %442 = vmatpush.bf16.msra.mxu2 %v2682_v7  ;;  %v3590_v37 = vld [vmem:[%s3587_s16] sm:$0xff]  ;;  %v2814_v38 = vor.u32 %v3152_v31, %v2811_v32  ;;  %v3149_v40 = vld [vmem:[#allocation3 + $0x144] sm:$0xf0]  ;;  %v3146_v41 = vld [vmem:[#allocation3 + $0x134] sm:$0xf]  ;;  %s3603_s20 = scalar_lea.vmem [#allocation2], %s3156_s19 }
  0x26   : > { %461 = vmatpush.bf16.msra.mxu3 %v2686_v11  ;;  %v2787_v42 = vld [vmem:[#allocation3 + $0x148] sm:$0xf0]  ;;  %v2786_v43 = vor.u32 %v3149_v40, %v2785_v39  ;;  %v2761_v45 = vld [vmem:[#allocation3 + $0x100] sm:$0xf]  ;;  %v3143_v46 = vld [vmem:[#allocation3 + $0x114] sm:$0xf0] }
  0x27   : > { %v2790_v44 = vor.u32 %v3146_v41, %v2787_v42  ;;  %v3140_v47 = vld [vmem:[#allocation3 + $0x104] sm:$0xf]  ;;  %v2763_v48 = vld [vmem:[#allocation3 + $0x118] sm:$0xf0]  ;;  %v2762_v49 = vor.u32 %v3143_v46, %v2761_v45  ;;  %v2737_v51 = vld [vmem:[#allocation3 + $0xd0] sm:$0xf] }
  0x28   : > { %405 = vmatpush.bf16.msra.mxu0 %v2650_v16  ;;  %v2766_v50 = vor.u32 %v3140_v47, %v2763_v48  ;;  %v3137_v52 = vld [vmem:[#allocation3 + $0xe4] sm:$0xf0]  ;;  %v3134_v53 = vld [vmem:[#allocation3 + $0xd4] sm:$0xf]  ;;  %v2739_v54 = vld [vmem:[#allocation3 + $0xe8] sm:$0xf0] }
  0x29   : > { %424 = vmatpush.bf16.msra.mxu1 %v2654_v19  ;;  %443 = vmatpush.bf16.msra.mxu2 %v2658_v20  ;;  %v2738_v55 = vor.u32 %v3137_v52, %v2737_v51  ;;  %v2742_v56 = vor.u32 %v3134_v53, %v2739_v54  ;;  %v2713_v57 = vld [vmem:[#allocation3 + $0xa0] sm:$0xf]  ;;  %v3131_v58 = vld [vmem:[#allocation3 + $0xb4] sm:$0xf0]  ;;  %v3128_v59 = vld [vmem:[#allocation3 + $0xa4] sm:$0xf] }
  0x2a   : > { %462 = vmatpush.bf16.msra.mxu3 %v2662_v23  ;;  %v2715_v60 = vld [vmem:[#allocation3 + $0xb8] sm:$0xf0]  ;;  %v2714_v61 = vor.u32 %v3131_v58, %v2713_v57  ;;  %v3107_v62 = vld [vmem:[%s3587_s16 + $0x8] sm:$0xff]  ;;  %v2689_v0 = vld [vmem:[#allocation3 + $0x70] sm:$0xf]  ;;  %s3508_s13 = smov (%p72_p0), [#allocation8]  }
  0x2b   : > { %v2718_v63 = vor.u32 %v3128_v59, %v2715_v60  ;;  %v3125_v1 = vld [vmem:[#allocation3 + $0x84] sm:$0xf0]  ;;  %v3122_v2 = vld [vmem:[#allocation3 + $0x74] sm:$0xf]  ;;  %v2691_v3 = vld [vmem:[#allocation3 + $0x88] sm:$0xf0] }
  0x2c   : > { %406 = vmatpush.bf16.msra.mxu0 %v2626_v30  ;;  %v2690_v4 = vor.u32 %v3125_v1, %v2689_v0  ;;  %v2694_v5 = vor.u32 %v3122_v2, %v2691_v3  ;;  %v2665_v6 = vld [vmem:[#allocation3 + $0x40] sm:$0xf]  ;;  %v3119_v7 = vld [vmem:[#allocation3 + $0x54] sm:$0xf0]  ;;  %v3116_v8 = vld [vmem:[#allocation3 + $0x44] sm:$0xf] }
  0x2d   : > { %425 = vmatpush.bf16.msra.mxu1 %v2630_v33  ;;  %444 = vmatpush.bf16.msra.mxu2 %v2634_v34  ;;  %v2667_v9 = vld [vmem:[#allocation3 + $0x58] sm:$0xf0]  ;;  %v2666_v10 = vor.u32 %v3119_v7, %v2665_v6  ;;  %v2641_v12 = vld [vmem:[#allocation3 + $0x10] sm:$0xf]  ;;  %v3113_v13 = vld [vmem:[#allocation3 + $0x24] sm:$0xf0] }
  0x2e   : > { %463 = vmatpush.bf16.msra.mxu3 %v2638_v35  ;;  %v2670_v11 = vor.u32 %v3116_v8, %v2667_v9  ;;  %v3110_v14 = vld [vmem:[#allocation3 + $0x14] sm:$0xf]  ;;  %v2643_v15 = vld [vmem:[#allocation3 + $0x28] sm:$0xf0]  ;;  %v2642_v16 = vor.u32 %v3113_v13, %v2641_v12  ;;  %v133_v18 = vld [vmem:[%s4733_s4] sm:$0x3f] }
  0x2f   : > { %407 = vmatmul.bf16.vlgmr.msra.gmra.mxu0 %v3590_v37  ;;  %v2646_v17 = vor.u32 %v3110_v14, %v2643_v15  ;;  %v135_v19 = vperm.slane %v133_v18, 0  ;;  %v136_v20 = vperm.slane %v133_v18, 1  ;;  %v137_v26 = vperm.slane %v133_v18, 2  ;;  %s2582_s16 = sshll.u32 (%p72_p0), %s4739_s10, 4  ;;  %s2583_s16 = int_to_ptr.hbm [resolvable:$true] %s2582_s16 }
  0x30   : > { %426 = vmatmul.bf16.vlgmr.msra.gmra.mxu1 %v3590_v37  ;;  %445 = vmatmul.bf16.vlgmr.msra.gmra.mxu2 %v3590_v37  ;;  %v138_v27 = vperm.slane %v133_v18, 3  ;;  %v139_v58 = vperm.slane %v133_v18, 4  ;;  %v140_v60 = vperm.slane %v133_v18, 5 }
  0x31   : > { %3221 = vmatpush.bf16.msrb.mxu2 %v2810_v36  ;;  %464 = vmatmul.bf16.vlgmr.msra.gmra.mxu3 %v3590_v37 }
  0x32   : > { %3229 = vmatpush.bf16.msrb.mxu3 %v2814_v38  ;;  %475 = vmatpush.bf16.msrb.mxu0 %v2810_v36 }
  0x33   : > { %494 = vmatpush.bf16.msrb.mxu1 %v2814_v38 }
  0x35   : > { %3222 = vmatpush.bf16.msrb.mxu2 %v2786_v43 }
  0x36   : > { %3230 = vmatpush.bf16.msrb.mxu3 %v2790_v44  ;;  %476 = vmatpush.bf16.msrb.mxu0 %v2786_v43 }
  0x37   : > { %495 = vmatpush.bf16.msrb.mxu1 %v2790_v44 }
  0x39   : > { %3223 = vmatpush.bf16.msrb.mxu2 %v2762_v49 }
  0x3a   : > { %3231 = vmatpush.bf16.msrb.mxu3 %v2766_v50  ;;  %477 = vmatpush.bf16.msrb.mxu0 %v2762_v49 }
  0x3b   : > { %496 = vmatpush.bf16.msrb.mxu1 %v2766_v50 }
  0x3d   : > { %3224 = vmatpush.bf16.msrb.mxu2 %v2738_v55 }
  0x3e   : > { %3232 = vmatpush.bf16.msrb.mxu3 %v2742_v56  ;;  %478 = vmatpush.bf16.msrb.mxu0 %v2738_v55 }
  0x3f   : > { %497 = vmatpush.bf16.msrb.mxu1 %v2742_v56  ;;  %412 = vmatmul.bf16.gmra.mxu0 %v3107_v62 }
  0x40   : > { %431 = vmatmul.bf16.gmra.mxu1 %v3107_v62  ;;  %450 = vmatmul.bf16.gmra.mxu2 %v3107_v62 }
  0x41   : > { %3225 = vmatpush.bf16.msrb.mxu2 %v2714_v61  ;;  %469 = vmatmul.bf16.gmra.mxu3 %v3107_v62 }
  0x42   : > { %3233 = vmatpush.bf16.msrb.mxu3 %v2718_v63  ;;  %479 = vmatpush.bf16.msrb.mxu0 %v2714_v61 }
  0x43   : > { %498 = vmatpush.bf16.msrb.mxu1 %v2718_v63 }
  0x45   : > { %3226 = vmatpush.bf16.msrb.mxu2 %v2690_v4 }
  0x46   : > { %3234 = vmatpush.bf16.msrb.mxu3 %v2694_v5  ;;  %480 = vmatpush.bf16.msrb.mxu0 %v2690_v4 }
  0x47   : > { %499 = vmatpush.bf16.msrb.mxu1 %v2694_v5 }
  0x49   : > { %3227 = vmatpush.bf16.msrb.mxu2 %v2666_v10 }
  0x4a   : > { %3235 = vmatpush.bf16.msrb.mxu3 %v2670_v11  ;;  %481 = vmatpush.bf16.msrb.mxu0 %v2666_v10 }
  0x4b   : > { %500 = vmatpush.bf16.msrb.mxu1 %v2670_v11 }
  0x4d   : > { %3228 = vmatpush.bf16.msrb.mxu2 %v2642_v16 }
  0x4e   : > { %3236 = vmatpush.bf16.msrb.mxu3 %v2646_v17  ;;  %482 = vmatpush.bf16.msrb.mxu0 %v2642_v16 }
  0x4f   : > { %501 = vmatpush.bf16.msrb.mxu1 %v2646_v17 }
  0x50   : > { %488 = vmatmul.bf16.vlgmr.msrb.gmra.mxu2 %v3107_v62 }
  0x51   : > { %483 = vmatmul.bf16.vlgmr.msrb.gmra.mxu0 %v3590_v37  ;;  %507 = vmatmul.bf16.vlgmr.msrb.gmra.mxu3 %v3107_v62 }
  0x52   : > { %502 = vmatmul.bf16.vlgmr.msrb.gmra.mxu1 %v3590_v37 }
  0xac   : > { %v408_v21 = vpop.f32.mrf.mxu0 }
  0xad   : > { %v409_v22 = vadd.f32 %v408_v21, %v135_v19  ;;  %v427_v23 = vpop.f32.mrf.mxu1  ;;  %v2987_v21 = vld [vmem:[%s4734_s5 + $0x150] sm:$0xf] (%p72_p0) }
  0xae   : > { %v428_v24 = vadd.f32 %v427_v23, %v136_v20  ;;  %v3200_v23 = vld [vmem:[%s4734_s5 + $0x15c] sm:$0xf] (%p72_p0) }
  0xb0   : > { %v513_v25 = vpack.c.bf16 %v428_v24, %v409_v22  ;;  %v3202_v22 = vld [vmem:[%s4734_s5 + $0x164] sm:$0xf0] (%p72_p0) }
  0xb1   :  { %v3629_v24 = vor.u32 (%p72_p0), %v3202_v22, %v2987_v21  ;;  %v2923_v21 = vld [vmem:[%s4734_s5 + $0xc8] sm:$0xf] (%p72_p0)  ;;  %v3185_v22 = vld [vmem:[%s4734_s5 + $0xdc] sm:$0xf0] (%p72_p0) }
  0xb2   : > { %528 = vst [vmem:[%s3603_s20] sm:$0xff] %v513_v25  ;;  %v2997_v25 = vld [vmem:[%s4734_s5 + $0x170] sm:$0xf0] (%p72_p0) }
  0xb3   : > { %v446_v28 = vpop.f32.mrf.mxu2  ;;  %852 = vmatpush.bf16.msra.mxu0 (%p72_p0), %v3629_v24 }
  0xb4   : > { %v447_v29 = vadd.f32 %v446_v28, %v137_v26  ;;  %v465_v30 = vpop.f32.mrf.mxu3  ;;  %v410_v31 = vpop.f32.mrf.mxu0  ;;  %v3640_v28 = vor.u32 (%p72_p0), %v3200_v23, %v2997_v25  ;;  %v3164_v23 = vld [vmem:[%s4734_s5 + $0x3c] sm:$0xf] (%p72_p0)  ;;  %v2853_v25 = vld [vmem:[%s4734_s5 + $0x50] sm:$0xf0] (%p72_p0) }
  0xb5   : > { %v466_v32 = vadd.f32 %v465_v30, %v138_v27  ;;  %v411_v33 = vadd.f32 %v410_v31, %v135_v19  ;;  %v429_v34 = vpop.f32.mrf.mxu1  ;;  %v2973_v30 = vld [vmem:[%s4734_s5 + $0x140] sm:$0xf0] (%p72_p0)  ;;  %v3199_v31 = vld [vmem:[%s4734_s5 + $0x154] sm:$0xf] (%p72_p0) }
  0xb6   : > { %v430_v35 = vadd.f32 %v429_v34, %v136_v20  ;;  %891 = vmatpush.bf16.msra.mxu3 (%p72_p0), %v3640_v28 }
  0xb7   : > { %v514_v36 = vpack.c.bf16 %v466_v32, %v447_v29  ;;  %v3194_v29 = vld [vmem:[%s4734_s5 + $0x12c] sm:$0xf] (%p72_p0) }
  0xb8   : > { %v516_v37 = vpack.c.bf16 %v430_v35, %v411_v33  ;;  %v2989_v33 = vld [vmem:[%s4734_s5 + $0x168] sm:$0xf0] (%p72_p0)  ;;  %v3658_v34 = vor.u32 (%p72_p0), %v3194_v29, %v2973_v30  ;;  %v3160_v30 = vld [vmem:[%s4734_s5 + $0x14] sm:$0xf0] (%p72_p0) }
  0xb9   : > { %529 = vst [vmem:[%s3603_s20 + $0x8] sm:$0xff] %v514_v36  ;;  %v3660_v35 = vor.u32 (%p72_p0), %v3199_v31, %v2989_v33  ;;  %v2939_v36 = vld [vmem:[%s4734_s5 + $0xf0] sm:$0xf] (%p72_p0)  ;;  %v3163_v31 = vld [vmem:[%s4734_s5 + $0x34] sm:$0xf] (%p72_p0) }
  0xba   : > { %531 = vst [vmem:[%s3603_s20 + $0x18] sm:$0xff] %v516_v37  ;;  %v3190_v37 = vld [vmem:[%s4734_s5 + $0x104] sm:$0xf0] (%p72_p0)  ;;  %892 = vmatpush.bf16.msra.mxu3 (%p72_p0), %v3658_v34  ;;  %v2845_v33 = vld [vmem:[%s4734_s5 + $0x48] sm:$0xf0] (%p72_p0) }
  0xbb   : > { %v448_v38 = vpop.f32.mrf.mxu2  ;;  %4785 = vst [vmem:[#allocation13_spill] sm:$0xff] (%p72_p0), %v3660_v35  ;;  %865 = vmatpush.bf16.msra.mxu1 (%p72_p0), %v3660_v35 }
  0xbc   : > { %v449_v39 = vadd.f32 %v448_v38, %v137_v26  ;;  %v467_v40 = vpop.f32.mrf.mxu3  ;;  %v413_v41 = vpop.f32.mrf.mxu0  ;;  %v3193_v38 = vld [vmem:[%s4734_s5 + $0x124] sm:$0xf] (%p72_p0) }
  0xbd   : > { %v468_v42 = vadd.f32 %v467_v40, %v138_v27  ;;  %v414_v43 = vadd.f32 %v413_v41, %v135_v19  ;;  %v432_v44 = vpop.f32.mrf.mxu1  ;;  %v2949_v40 = vld [vmem:[%s4734_s5 + $0x110] sm:$0xf0] (%p72_p0)  ;;  %v2965_v41 = vld [vmem:[%s4734_s5 + $0x138] sm:$0xf0] (%p72_p0) }
  0xbe   : > { %v433_v45 = vadd.f32 %v432_v44, %v136_v20  ;;  %v3187_v44 = vld [vmem:[%s4734_s5 + $0xf4] sm:$0xf] (%p72_p0) }
  0xbf   : > { %v517_v46 = vpack.c.bf16 %v468_v42, %v449_v39  ;;  %v3188_v39 = vld [vmem:[%s4734_s5 + $0xfc] sm:$0xf] (%p72_p0)  ;;  %v3681_v42 = vor.u32 (%p72_p0), %v3193_v38, %v2965_v41  ;;  %v3158_v38 = vld [vmem:[%s4734_s5 + $0xc] sm:$0xf] (%p72_p0)  ;;  %v2829_v41 = vld [vmem:[%s4734_s5 + $0x20] sm:$0xf0] (%p72_p0) }
  0xc0   : > { %v519_v47 = vpack.c.bf16 %v433_v45, %v414_v43  ;;  %v3684_v43 = vor.u32 (%p72_p0), %v3190_v37, %v2939_v36  ;;  %v2941_v45 = vld [vmem:[%s4734_s5 + $0x108] sm:$0xf0] (%p72_p0)  ;;  %v3839_v36 = vor.u32 (%p72_p0), %v3185_v22, %v2923_v21  ;;  %v3842_v37 = vor.u32 (%p72_p0), %v3164_v23, %v2853_v25  ;;  %v604_v22 = vld [vmem:[%s4729_s0] sm:$0xff] (%p72_p0)  ;;  %v2931_v25 = vld [vmem:[%s4734_s5 + $0xd0] sm:$0xf] (%p72_p0)  ;;  %s2580_s0 = sshll.u32 (%p72_p0), %s3508_s13, 4  ;;  %s2581_s0 = int_to_ptr.vmem [resolvable:$true] %s2580_s0 }
  0xc1   : > { %532 = vst [vmem:[%s3603_s20 + $0x20] sm:$0xff] %v517_v46  ;;  %v3693_v46 = vor.u32 (%p72_p0), %v3188_v39, %v2949_v40  ;;  %866 = vmatpush.bf16.msra.mxu1 (%p72_p0), %v3681_v42  ;;  %v2899_v39 = vld [vmem:[%s4734_s5 + $0x98] sm:$0xf] (%p72_p0)  ;;  %v3179_v40 = vld [vmem:[%s4734_s5 + $0xac] sm:$0xf0] (%p72_p0) }
  0xc2   : > { %534 = vst [vmem:[%s3603_s20 + $0x30] sm:$0xff] %v519_v47  ;;  %v2915_v47 = vld [vmem:[%s4734_s5 + $0xc0] sm:$0xf] (%p72_p0) }
  0xc3   : > { %v451_v48 = vpop.f32.mrf.mxu2  ;;  %4786 = vst [vmem:[#allocation14_spill] sm:$0xff] (%p72_p0), %v3681_v42  ;;  %893 = vmatpush.bf16.msra.mxu3 (%p72_p0), %v3693_v46 }
  0xc4   : > { %v452_v49 = vadd.f32 %v451_v48, %v137_v26  ;;  %v470_v50 = vpop.f32.mrf.mxu3  ;;  %v415_v51 = vpop.f32.mrf.mxu0  ;;  %4787 = vst [vmem:[#allocation15_spill] sm:$0xff] (%p72_p0), %v3684_v43  ;;  %v3184_v48 = vld [vmem:[%s4734_s5 + $0xd4] sm:$0xf0] (%p72_p0) }
  0xc5   : > { %v471_v52 = vadd.f32 %v470_v50, %v138_v27  ;;  %v416_v53 = vadd.f32 %v415_v51, %v135_v19  ;;  %v434_v54 = vpop.f32.mrf.mxu1  ;;  %v2925_v50 = vld [vmem:[%s4734_s5 + $0xe0] sm:$0xf0] (%p72_p0)  ;;  %v3708_v51 = vor.u32 (%p72_p0), %v3187_v44, %v2941_v45  ;;  %v3003_v44 = vld [vmem:[%s4734_s5 + $0x160] sm:$0xf] (%p72_p0)  ;;  %v3204_v45 = vld [vmem:[%s4734_s5 + $0x174] sm:$0xf0] (%p72_p0) }
  0xc6   : > { %v435_v55 = vadd.f32 %v434_v54, %v136_v20  ;;  %v3181_v54 = vld [vmem:[%s4734_s5 + $0xc4] sm:$0xf] (%p72_p0) }
  0xc7   : > { %v520_v56 = vpack.c.bf16 %v471_v52, %v452_v49  ;;  %v3182_v49 = vld [vmem:[%s4734_s5 + $0xcc] sm:$0xf] (%p72_p0)  ;;  %4788 = vst [vmem:[#allocation16_spill] sm:$0xff] (%p72_p0), %v3708_v51  ;;  %v3711_v52 = vor.u32 (%p72_p0), %v3184_v48, %v2915_v47  ;;  %867 = vmatpush.bf16.msra.mxu1 (%p72_p0), %v3708_v51  ;;  %v3866_v47 = vld [vmem:[%s4731_s2] sm:$0xff] (%p72_p0)  ;;  %v3868_v48 = vor.u32 (%p72_p0), %v3163_v31, %v2845_v33  ;;  %v3186_v33 = vld [vmem:[%s4734_s5 + $0xe4] sm:$0xf0] (%p72_p0) }
  0xc8   : > { %v522_v57 = vpack.c.bf16 %v435_v55, %v416_v53  ;;  %v2891_v53 = vld [vmem:[%s4734_s5 + $0x90] sm:$0xf] (%p72_p0)  ;;  %v2917_v55 = vld [vmem:[%s4734_s5 + $0xd8] sm:$0xf0] (%p72_p0) }
  0xc9   : > { %535 = vst [vmem:[%s3603_s20 + $0x38] sm:$0xff] %v520_v56  ;;  %v3723_v56 = vor.u32 (%p72_p0), %v3182_v49, %v2925_v50  ;;  %v3876_v50 = vld [vmem:[%s4731_s2 + $0x8] sm:$0xff] (%p72_p0) }
  0xca   : > { %537 = vst [vmem:[%s3603_s20 + $0x48] sm:$0xff] %v522_v57  ;;  %v3178_v57 = vld [vmem:[%s4734_s5 + $0xa4] sm:$0xf0] (%p72_p0) }
  0xcb   : > { %v453_v59 = vpop.f32.mrf.mxu2  ;;  %4789 = vst [vmem:[#allocation17_spill] sm:$0xff] (%p72_p0), %v3711_v52  ;;  %894 = vmatpush.bf16.msra.mxu3 (%p72_p0), %v3723_v56 }
  0xcc   : > { %v454_v61 = vadd.f32 %v453_v59, %v137_v26  ;;  %v472_v62 = vpop.f32.mrf.mxu3  ;;  %v2963_v26 = vld [vmem:[%s4734_s5 + $0x120] sm:$0xf] (%p72_p0)  ;;  %v3203_v59 = vld [vmem:[%s4734_s5 + $0x16c] sm:$0xf0] (%p72_p0)  ;;  %4796 = vst [vmem:[#allocation24_spill] sm:$0xff] (%p72_p0), %v3868_v48 }
  0xcd   : > { %v473_v63 = vadd.f32 %v472_v62, %v138_v27  ;;  %v3196_v27 = vld [vmem:[%s4734_s5 + $0x134] sm:$0xf0] (%p72_p0) }
  0xce   : > { %v484_v0 = vpop.f32.mrf.mxu0  ;;  %v3652_v32 = vor.u32 (%p72_p0), %v3196_v27, %v2963_v26  ;;  %v2819_v27 = vld [vmem:[%s4734_s5] sm:$0xf] (%p72_p0) }
  0xcf   : > { %v485_v1 = vadd.f32 %v484_v0, %v139_v58  ;;  %v503_v2 = vpop.f32.mrf.mxu1  ;;  %v523_v3 = vpack.c.bf16 %v473_v63, %v454_v61  ;;  %v2901_v61 = vld [vmem:[%s4734_s5 + $0xb0] sm:$0xf0] (%p72_p0)  ;;  %v3743_v63 = vor.u32 (%p72_p0), %v3181_v54, %v2917_v55  ;;  %v2971_v0 = vld [vmem:[%s4734_s5 + $0x128] sm:$0xf] (%p72_p0)  ;;  %v3871_v49 = vor.u32 (%p72_p0), %v3160_v30, %v2819_v27  ;;  %v2821_v54 = vld [vmem:[%s4734_s5 + $0x18] sm:$0xf0] (%p72_p0) }
  0xd0   : > { %v504_v4 = vadd.f32 %v503_v2, %v140_v60  ;;  %4784 = vst [vmem:[#allocation12_spill] sm:$0xff] (%p72_p0), %v3652_v32  ;;  %853 = vmatpush.bf16.msra.mxu0 (%p72_p0), %v3652_v32  ;;  %v3175_v2 = vld [vmem:[%s4734_s5 + $0x94] sm:$0xf] (%p72_p0)  ;;  %v3885_v55 = vor.u32 (%p72_p0), %v3179_v40, %v2899_v39  ;;  %v3189_v27 = vld [vmem:[%s4734_s5 + $0x104] sm:$0xf] (%p72_p0)  ;;  %v3507_v40 = vmov (%p72_p0), 0  }
  0xd1   : > { %538 = vst [vmem:[%s3603_s20 + $0x50] sm:$0xff] %v523_v3  ;;  %v2893_v3 = vld [vmem:[%s4734_s5 + $0xa8] sm:$0xf0] (%p72_p0)  ;;  %868 = vmatpush.bf16.msra.mxu1 (%p72_p0), %v3743_v63  ;;  %v2957_v30 = vld [vmem:[%s4734_s5 + $0x118] sm:$0xf0] (%p72_p0)  ;;  %3253 = vset.pattern.permute.xlu0 (%p72_p0), %v3507_v40 }
  0xd2   : > { %v515_v5 = vpack.c.bf16 %v504_v4, %v485_v1  ;;  %4790 = vst [vmem:[#allocation18_spill] sm:$0xff] (%p72_p0), %v3743_v63  ;;  %v3749_v1 = vor.u32 (%p72_p0), %v3178_v57, %v2891_v53  ;;  %v3197_v4 = vld [vmem:[%s4734_s5 + $0x13c] sm:$0xf0] (%p72_p0)  ;;  %v3157_v53 = vld [vmem:[%s4734_s5 + $0x4] sm:$0xf] (%p72_p0)  ;;  %v3888_v57 = vor.u32 (%p72_p0), %v3158_v38, %v2829_v41  ;;  %606 = vperm.xlu0 (%p72_p0), %3253, %v604_v22  }
  0xd3   : > { %v489_v6 = vpop.f32.mrf.mxu2  ;;  %4797 = vst [vmem:[#allocation25_spill] sm:$0xff] (%p72_p0), %v3871_v49  ;;  %v2827_v38 = vld [vmem:[%s4734_s5 + $0x8] sm:$0xf] (%p72_p0)  ;;  %v3161_v39 = vld [vmem:[%s4734_s5 + $0x1c] sm:$0xf0] (%p72_p0)  ;;  %v3982_v41 = vor.u32 (%p72_p0), %v3189_v27, %v2957_v30 }
  0xd4   : > { %530 = vst [vmem:[%s3603_s20 + $0x10] sm:$0xff] %v515_v5  ;;  %v490_v7 = vadd.f32 %v489_v6, %v139_v58  ;;  %v508_v8 = vpop.f32.mrf.mxu3  ;;  %854 = vmatpush.bf16.msra.mxu0 (%p72_p0), %v3684_v43  ;;  %v2867_v6 = vld [vmem:[%s4734_s5 + $0x60] sm:$0xf] (%p72_p0)  ;;  %v3162_v40 = vld [vmem:[%s4734_s5 + $0x24] sm:$0xf0] (%p72_p0) }
  0xd5   : > { %v509_v9 = vadd.f32 %v508_v8, %v140_v60  ;;  %4791 = vst [vmem:[#allocation19_spill] sm:$0xff] (%p72_p0), %v3749_v1  ;;  %v3770_v8 = vor.u32 (%p72_p0), %v3197_v4, %v2971_v0  ;;  %v3198_v0 = vld [vmem:[%s4734_s5 + $0x144] sm:$0xf0] (%p72_p0)  ;;  %v3912_v4 = vpack.c.bf16 (%p72_p0), %v3876_v50, %v3866_v47  ;;  %v2859_v22 = vld [vmem:[%s4734_s5 + $0x40] sm:$0xf] (%p72_p0) }
  0xd6   : > { %v486_v10 = vpop.f32.mrf.mxu0 }
  0xd7   : > { %v487_v11 = vadd.f32 %v486_v10, %v139_v58  ;;  %v505_v12 = vpop.f32.mrf.mxu1  ;;  %v521_v13 = vpack.c.bf16 %v509_v9, %v490_v7  ;;  %v3172_v7 = vld [vmem:[%s4734_s5 + $0x74] sm:$0xf0] (%p72_p0)  ;;  %v3170_v9 = vld [vmem:[%s4734_s5 + $0x6c] sm:$0xf] (%p72_p0)  ;;  %v2877_v10 = vld [vmem:[%s4734_s5 + $0x80] sm:$0xf0] (%p72_p0) }
  0xd8   : > { %v506_v14 = vadd.f32 %v505_v12, %v140_v60  ;;  %855 = vmatpush.bf16.msra.mxu0 (%p72_p0), %v3711_v52  ;;  %v2947_v12 = vld [vmem:[%s4734_s5 + $0xf8] sm:$0xf] (%p72_p0) }
  0xd9   : > { %536 = vst [vmem:[%s3603_s20 + $0x40] sm:$0xff] %v521_v13  ;;  %v3191_v13 = vld [vmem:[%s4734_s5 + $0x10c] sm:$0xf0] (%p72_p0) }
  0xda   : > { %v518_v15 = vpack.c.bf16 %v506_v14, %v487_v11  ;;  %v3779_v11 = vor.u32 (%p72_p0), %v3175_v2, %v2893_v3  ;;  %v3788_v14 = vor.u32 (%p72_p0), %v3172_v7, %v2867_v6  ;;  %v2875_v2 = vld [vmem:[%s4734_s5 + $0x68] sm:$0xf] (%p72_p0)  ;;  %v3173_v3 = vld [vmem:[%s4734_s5 + $0x7c] sm:$0xf0] (%p72_p0)  ;;  %v3915_v6 = vor.u32 (%p72_p0), %v3157_v53, %v2821_v54  ;;  %v2933_v53 = vld [vmem:[%s4734_s5 + $0xe8] sm:$0xf0] (%p72_p0) }
  0xdb   : > { %v491_v16 = vpop.f32.mrf.mxu2  ;;  %v3994_v54 = vor.u32 (%p72_p0), %v3161_v39, %v2827_v38  ;;  %v2861_v38 = vld [vmem:[%s4734_s5 + $0x58] sm:$0xf0] (%p72_p0)  ;;  %v2835_v39 = vld [vmem:[%s4734_s5 + $0x10] sm:$0xf] (%p72_p0) }
  0xdc   : > { %533 = vst [vmem:[%s3603_s20 + $0x28] sm:$0xff] %v518_v15  ;;  %v492_v17 = vadd.f32 %v491_v16, %v139_v58  ;;  %v510_v18 = vpop.f32.mrf.mxu3  ;;  %v2995_v58 = vld [vmem:[%s4734_s5 + $0x158] sm:$0xf] (%p72_p0)  ;;  %856 = vmatpush.bf16.msra.mxu0 (%p72_p0), %v3749_v1  ;;  %v2843_v15 = vld [vmem:[%s4734_s5 + $0x30] sm:$0xf] (%p72_p0)  ;;  %869 = vmatpush.bf16.msra.mxu1 (%p72_p0), %v3779_v11 }
  0xdd   : > { %v511_v19 = vadd.f32 %v510_v18, %v140_v60  ;;  %74 = sbr.rel (!%p72_p0) target bundleno = 13 (0xd), region = 95  ;;  %v3176_v60 = vld [vmem:[%s4734_s5 + $0x9c] sm:$0xf] (%p72_p0)  ;;  %v3740_v62 = vor.u32 (%p72_p0), %v3203_v59, %v2995_v58  ;;  %4792 = vst [vmem:[#allocation20_spill] sm:$0xff] (%p72_p0), %v3779_v11  ;;  %v3169_v16 = vld [vmem:[%s4734_s5 + $0x64] sm:$0xf] (%p72_p0)  ;;  %v3800_v18 = vor.u32 (%p72_p0), %v3191_v13, %v2947_v12  ;;  %v3890_v58 = vor.u32 (%p72_p0), %v3204_v45, %v3003_v44 }
  0xde   :  { %v3762_v5 = vor.u32 (%p72_p0), %v3176_v60, %v2901_v61  ;;  %4793 = vst [vmem:[#allocation21_spill] sm:$0xff] (%p72_p0), %v3788_v14  ;;  %v2979_v59 = vld [vmem:[%s4734_s5 + $0x130] sm:$0xf] (%p72_p0)  ;;  %v3201_v60 = vld [vmem:[%s4734_s5 + $0x164] sm:$0xf] (%p72_p0)  ;;  %v3985_v44 = vor.u32 (%p72_p0), %v3186_v33, %v2931_v25 }
  0xdf   : > { %v524_v20 = vpack.c.bf16 %v511_v19, %v492_v17  ;;  %878 = vmatpush.bf16.msra.mxu2 (%p72_p0), %v3740_v62  ;;  %v2869_v17 = vld [vmem:[%s4734_s5 + $0x78] sm:$0xf0] (%p72_p0)  ;;  %v3803_v19 = vor.u32 (%p72_p0), %v3170_v9, %v2877_v10  ;;  %4798 = vst [vmem:[#allocation26_spill] sm:$0xff] (%p72_p0), %v3915_v6  ;;  %v2955_v9 = vld [vmem:[%s4734_s5 + $0x100] sm:$0xf] (%p72_p0)  ;;  %v3926_v10 = vor.u32 (%p72_p0), %v3198_v0, %v2979_v59 }
  0xe0   :  { %895 = vmatpush.bf16.msra.mxu3 (%p72_p0), %v3762_v5  ;;  %v3821_v26 = vor.u32 (%p72_p0), %v3169_v16, %v2869_v17  ;;  %857 = vmatpush.bf16.msra.mxu0 (%p72_p0), %v3788_v14  ;;  %v3005_v61 = vld [vmem:[%s4734_s5 + $0x178] sm:$0xf0] (%p72_p0)  ;;  %v3195_v12 = vld [vmem:[%s4734_s5 + $0x134] sm:$0xf] (%p72_p0)  ;;  %v2981_v13 = vld [vmem:[%s4734_s5 + $0x148] sm:$0xf0] (%p72_p0) }
  0xe1   : > { %539 = vst [vmem:[%s3603_s20 + $0x58] sm:$0xff] %v524_v20  ;;  %v3166_v20 = vld [vmem:[%s4734_s5 + $0x44] sm:$0xf0] (%p72_p0)  ;;  %v3918_v7 = vor.u32 (%p72_p0), %v3201_v60, %v3005_v61  ;;  %v3192_v16 = vld [vmem:[%s4734_s5 + $0x114] sm:$0xf0] (%p72_p0)  ;;  %v3950_v21 = vor.u32 (%p72_p0), %v3195_v12, %v2981_v13 }
  0xe2   :  { %4794 = vst [vmem:[#allocation22_spill] sm:$0xff] %v3821_v26  ;;  %v3827_v29 = vor.u32 %v3166_v20, %v2843_v15  ;;  %870 = vmatpush.bf16.msra.mxu1 %v3821_v26  ;;  %v3934_v15 = vor.u32 %v3173_v3, %v2875_v2  ;;  %v2851_v17 = vld [vmem:[%s4734_s5 + $0x38] sm:$0xf]  ;;  %v3167_v20 = vld [vmem:[%s4734_s5 + $0x4c] sm:$0xf0]  ;;  %v3956_v23 = vor.u32 %v3192_v16, %v2955_v9 }
  0xe3   :  { %879 = vmatpush.bf16.msra.mxu2 %v3770_v8  ;;  %v3968_v31 = vor.u32 %v3167_v20, %v2851_v17  ;;  %v3183_v45 = vld [vmem:[%s4734_s5 + $0xd4] sm:$0xf]  ;;  %v2907_v59 = vld [vmem:[%s4734_s5 + $0xa0] sm:$0xf]  ;;  %v3180_v60 = vld [vmem:[%s4734_s5 + $0xb4] sm:$0xf0] }
  0xe4   :  { %4795 = vst [vmem:[#allocation23_spill] sm:$0xff] %v3827_v29  ;;  %896 = vmatpush.bf16.msra.mxu3 %v3803_v19  ;;  %858 = vmatpush.bf16.msra.mxu0 %v3827_v29  ;;  %v4004_v61 = vor.u32 %v3183_v45, %v2933_v53  ;;  %v4007_v0 = vor.u32 %v3180_v60, %v2907_v59  ;;  %v3177_v2 = vld [vmem:[%s4734_s5 + $0xa4] sm:$0xf]  ;;  %v2909_v3 = vld [vmem:[%s4734_s5 + $0xb8] sm:$0xf0] }
  0xe5   :  { %v2883_v9 = vld [vmem:[%s4734_s5 + $0x70] sm:$0xf]  ;;  %v3174_v12 = vld [vmem:[%s4734_s5 + $0x84] sm:$0xf0]  ;;  %v4025_v13 = vor.u32 %v3177_v2, %v2909_v3  ;;  %v3171_v17 = vld [vmem:[%s4734_s5 + $0x74] sm:$0xf]  ;;  %v4069_v53 = vor.u32 %v3162_v40, %v2835_v39 }
  0xe6   :  { %871 = vmatpush.bf16.msra.mxu1 %v3868_v48  ;;  %v4029_v16 = vor.u32 %v3174_v12, %v2883_v9  ;;  %v2885_v20 = vld [vmem:[%s4734_s5 + $0x88] sm:$0xf0]  ;;  %v3168_v25 = vld [vmem:[%s4734_s5 + $0x54] sm:$0xf0]  ;;  %v3165_v33 = vld [vmem:[%s4734_s5 + $0x44] sm:$0xf] }
  0xe7   :  { %880 = vmatpush.bf16.msra.mxu2 %v3800_v18  ;;  %v4046_v27 = vor.u32 %v3171_v17, %v2885_v20  ;;  %v4049_v30 = vor.u32 %v3168_v25, %v2859_v22  ;;  %v4066_v45 = vor.u32 %v3165_v33, %v2861_v38  ;;  %v3159_v59 = vld [vmem:[%s4734_s5 + $0x14] sm:$0xf]  ;;  %v2837_v60 = vld [vmem:[%s4734_s5 + $0x28] sm:$0xf0] }
  0xe8   :  { %897 = vmatpush.bf16.msra.mxu3 %v3842_v37  ;;  %859 = vmatpush.bf16.msra.mxu0 %v3871_v49  ;;  %v4080_v2 = vor.u32 %v3159_v59, %v2837_v60  ;;  %v939_v3 = vld [vmem:[#allocation2] sm:$0xff] }
  0xe9   :  { %v941_v12 = vunpack.c.l.bf16 %v939_v3  ;;  %v942_v59 = vunpack.c.h.bf16 %v939_v3 }
  0xea   :  { %872 = vmatpush.bf16.msra.mxu1 %v3915_v6 }
  0xeb   :  { %881 = vmatpush.bf16.msra.mxu2 %v3839_v36  ;;  %860 = vmatmul.bf16.vlgmr.msra.gmra.mxu0 %v3912_v4 }
  0xec   :  { %898 = vmatpush.bf16.msra.mxu3 %v3888_v57  ;;  %904 = vmatpush.bf16.msrb.mxu0 %v3890_v58 }
  0xed   :  { %873 = vmatmul.bf16.vlgmr.msra.gmra.mxu1 %v3912_v4 }
  0xee   :  { %917 = vmatpush.bf16.msrb.mxu1 %v3918_v7 }
  0xef   :  { %882 = vmatpush.bf16.msra.mxu2 %v3885_v55  ;;  %899 = vmatmul.bf16.vlgmr.msra.gmra.mxu3 %v3912_v4 }
  0xf0   :  { %1064 = vmatpush.bf16.msrb.mxu3 %v3660_v35  ;;  %905 = vmatpush.bf16.msrb.mxu0 %v3926_v10 }
  0xf2   :  { %918 = vmatpush.bf16.msrb.mxu1 %v3950_v21 }
  0xf3   :  { %883 = vmatpush.bf16.msra.mxu2 %v3934_v15 }
  0xf4   :  { %1065 = vmatpush.bf16.msrb.mxu3 %v3681_v42  ;;  %906 = vmatpush.bf16.msrb.mxu0 %v3956_v23 }
  0xf6   :  { %919 = vmatpush.bf16.msrb.mxu1 %v3982_v41 }
  0xf7   :  { %884 = vmatpush.bf16.msra.mxu2 %v3968_v31 }
  0xf8   :  { %1066 = vmatpush.bf16.msrb.mxu3 %v3708_v51  ;;  %907 = vmatpush.bf16.msrb.mxu0 %v3985_v44 }
  0xfa   :  { %920 = vmatpush.bf16.msrb.mxu1 %v4004_v61 }
  0xfb   :  { %885 = vmatpush.bf16.msra.mxu2 %v3994_v54 }
  0xfc   :  { %1067 = vmatpush.bf16.msrb.mxu3 %v3743_v63  ;;  %908 = vmatpush.bf16.msrb.mxu0 %v4007_v0 }
  0xfe   :  { %886 = vmatmul.bf16.vlgmr.msra.gmra.mxu2 %v3912_v4  ;;  %921 = vmatpush.bf16.msrb.mxu1 %v4025_v13 }
  0xff   :  { %1051 = vmatpush.bf16.msrb.mxu2 %v3629_v24 }
 0x100   :  { %1068 = vmatpush.bf16.msrb.mxu3 %v3779_v11  ;;  %909 = vmatpush.bf16.msrb.mxu0 %v4029_v16 }
 0x102   :  { %922 = vmatpush.bf16.msrb.mxu1 %v4046_v27 }
 0x103   :  { %1052 = vmatpush.bf16.msrb.mxu2 %v3652_v32 }
 0x104   :  { %1069 = vmatpush.bf16.msrb.mxu3 %v3821_v26  ;;  %910 = vmatpush.bf16.msrb.mxu0 %v4049_v30 }
 0x106   :  { %923 = vmatpush.bf16.msrb.mxu1 %v4066_v45 }
 0x107   :  { %1053 = vmatpush.bf16.msrb.mxu2 %v3684_v43 }
 0x108   :  { %1070 = vmatpush.bf16.msrb.mxu3 %v3868_v48  ;;  %911 = vmatpush.bf16.msrb.mxu0 %v4069_v53 }
 0x10a   :  { %924 = vmatpush.bf16.msrb.mxu1 %v4080_v2 }
 0x10b   :  { %1054 = vmatpush.bf16.msrb.mxu2 %v3711_v52  ;;  %912 = vmatmul.bf16.vlgmr.msrb.gmra.mxu0 %v3912_v4 }
 0x10c   :  { %1077 = vmatpush.bf16.msra.mxu0 %v3740_v62  ;;  %1071 = vmatpush.bf16.msrb.mxu3 %v3915_v6 }
 0x10d   :  { %925 = vmatmul.bf16.vlgmr.msrb.gmra.mxu1 %v3912_v4  ;;  %v588_v4 = vld [vmem:[%s4735_s6] sm:$0x7] }
 0x10e   :  { %1090 = vmatpush.bf16.msra.mxu1 %v3640_v28  ;;  %v4142_v9 = vperm.slane %v588_v4, 0  ;;  %v4145_v25 = vperm.slane %v588_v4, 1 }
 0x10f   :  { %1055 = vmatpush.bf16.msrb.mxu2 %v3749_v1 }
 0x110   :  { %1116 = vmatpush.bf16.msra.mxu3 %v3918_v7  ;;  %1078 = vmatpush.bf16.msra.mxu0 %v3770_v8  ;;  %4799 = vst [vmem:[#allocation27_spill] sm:$0xff] %v4142_v9 }
 0x111   :  { %4800 = vst [vmem:[#allocation28_spill] sm:$0xff] %v4145_v25 }
 0x112   :  { %1091 = vmatpush.bf16.msra.mxu1 %v3658_v34 }
 0x113   :  { %1056 = vmatpush.bf16.msrb.mxu2 %v3788_v14 }
 0x114   :  { %1117 = vmatpush.bf16.msra.mxu3 %v3950_v21  ;;  %1079 = vmatpush.bf16.msra.mxu0 %v3800_v18 }
 0x116   :  { %1092 = vmatpush.bf16.msra.mxu1 %v3693_v46 }
 0x117   :  { %1057 = vmatpush.bf16.msrb.mxu2 %v3827_v29 }
 0x118   :  { %1118 = vmatpush.bf16.msra.mxu3 %v3982_v41  ;;  %1080 = vmatpush.bf16.msra.mxu0 %v3839_v36 }
 0x11a   :  { %1093 = vmatpush.bf16.msra.mxu1 %v3723_v56 }
 0x11b   :  { %1058 = vmatpush.bf16.msrb.mxu2 %v3871_v49 }
 0x11c   :  { %1119 = vmatpush.bf16.msra.mxu3 %v4004_v61  ;;  %1081 = vmatpush.bf16.msra.mxu0 %v3885_v55 }
 0x11e   :  { %1094 = vmatpush.bf16.msra.mxu1 %v3762_v5 }
 0x11f   :  { %1103 = vmatpush.bf16.msra.mxu2 %v3890_v58 }
 0x120   :  { %1120 = vmatpush.bf16.msra.mxu3 %v4025_v13  ;;  %1082 = vmatpush.bf16.msra.mxu0 %v3934_v15 }
 0x122   :  { %1095 = vmatpush.bf16.msra.mxu1 %v3803_v19 }
 0x123   :  { %1104 = vmatpush.bf16.msra.mxu2 %v3926_v10 }
 0x124   :  { %1121 = vmatpush.bf16.msra.mxu3 %v4046_v27  ;;  %1083 = vmatpush.bf16.msra.mxu0 %v3968_v31 }
 0x126   :  { %1096 = vmatpush.bf16.msra.mxu1 %v3842_v37 }
 0x127   :  { %1105 = vmatpush.bf16.msra.mxu2 %v3956_v23 }
 0x128   :  { %1122 = vmatpush.bf16.msra.mxu3 %v4066_v45  ;;  %1084 = vmatpush.bf16.msra.mxu0 %v3994_v54 }
 0x12a   :  { %1097 = vmatpush.bf16.msra.mxu1 %v3888_v57 }
 0x12b   :  { %1106 = vmatpush.bf16.msra.mxu2 %v3985_v44 }
 0x12c   :  { %1250 = vmatpush.bf16.msrb.mxu0 %v3629_v24  ;;  %1123 = vmatpush.bf16.msra.mxu3 %v4080_v2 }
 0x12e   :  { %1263 = vmatpush.bf16.msrb.mxu1 %v3660_v35 }
 0x12f   :  { %1107 = vmatpush.bf16.msra.mxu2 %v4007_v0 }
 0x130   :  { %1251 = vmatpush.bf16.msrb.mxu0 %v3652_v32 }
 0x132   :  { %1264 = vmatpush.bf16.msrb.mxu1 %v3681_v42 }
 0x133   :  { %1108 = vmatpush.bf16.msra.mxu2 %v4029_v16 }
 0x134   :  { %1252 = vmatpush.bf16.msrb.mxu0 %v3684_v43 }
 0x136   :  { %1265 = vmatpush.bf16.msrb.mxu1 %v3708_v51  ;;  %v4161_v51 = vperm.slane %v588_v4, 2 }
 0x137   :  { %1109 = vmatpush.bf16.msra.mxu2 %v4049_v30 }
 0x138   :  { %1253 = vmatpush.bf16.msrb.mxu0 %v3711_v52  ;;  %4803 = vst [vmem:[#allocation31_spill] sm:$0xff] %v4161_v51 }
 0x13a   :  { %1266 = vmatpush.bf16.msrb.mxu1 %v3743_v63 }
 0x13b   :  { %1110 = vmatpush.bf16.msra.mxu2 %v4069_v53 }
 0x13c   :  { %1254 = vmatpush.bf16.msrb.mxu0 %v3749_v1 }
 0x13e   :  { %1267 = vmatpush.bf16.msrb.mxu1 %v3779_v11 }
 0x140   :  { %1255 = vmatpush.bf16.msrb.mxu0 %v3788_v14 }
 0x142   :  { %1268 = vmatpush.bf16.msrb.mxu1 %v3821_v26 }
 0x144   :  { %1256 = vmatpush.bf16.msrb.mxu0 %v3827_v29 }
 0x146   :  { %1269 = vmatpush.bf16.msrb.mxu1 %v3868_v48  ;;  %v947_v48 = vld [vmem:[#allocation2 + $0xb4] sm:$0xff] }
 0x148   :  { %1257 = vmatpush.bf16.msrb.mxu0 %v3871_v49 }
 0x14a   :  { %1270 = vmatpush.bf16.msrb.mxu1 %v3915_v6  ;;  %v596_v6 = vld [vmem:[%s4736_s7] sm:$0x7] }
 0x14b   :  { %v4151_v26 = vperm.slane %v596_v6, 0 }
 0x14d   :  { %4801 = vst [vmem:[#allocation29_spill] sm:$0xff] %v4151_v26 }
 0x168   :  { %v861_v17 = vpop.f32.mrf.mxu0 }
 0x169   :  { %v930_v20 = vadd.f32 %v861_v17, %v4142_v9  ;;  %v949_v17 = vunpack.c.l.bf16 %v947_v48 }
 0x16a   :  { %v874_v33 = vpop.f32.mrf.mxu1 }
 0x16b   :  { %v952_v22 = vadd.f32 %v941_v12, %v930_v20  ;;  %v931_v40 = vadd.f32 %v874_v33, %v4145_v25 }
 0x16d   :  { %v3009_v38 = vmul.f32 -1.442695, %v952_v22  ;;  %v972_v49 = vadd.f32 %v942_v59, %v931_v40 }
 0x16f   :  { %3255 = vpow2.f32 %v3009_v38  ;;  %v3010_v20 = vmul.f32 -1.442695, %v972_v49 }
 0x170   :  { %v863_v60 = vpop.f32.mrf.mxu0 }
 0x171   :  { %3257 = vpow2.f32 %v3010_v20 }
 0x172   :  { %v900_v39 = vpop.f32.mrf.mxu3  ;;  %v876_v29 = vpop.f32.mrf.mxu1 }
 0x175   :  { %v3256_v12 = vpop.eup %3255 }
 0x176   :  { %v956_v22 = vadd.f32 1.0, %v3256_v12  ;;  %v4157_v12 = vperm.slane %v596_v6, 1 }
 0x177   :  { %v3258_v60 = vpop.eup %3257 }
 0x178   :  { %3259 = vrcp.f32 %v956_v22  ;;  %v4154_v29 = vadd.f32 1.0, %v3258_v60  ;;  %4802 = vst [vmem:[#allocation30_spill] sm:$0xff] %v4157_v12  ;;  %vm962_vm0 = vweird.f32 %v956_v22  ;;  %v968_v60 = vand.u32 2147483648, %v956_v22 }
 0x17a   :  { %v901_v9 = vpop.f32.mrf.mxu3  ;;  %vm982_vm7 = vweird.f32 %v4154_v29 }
 0x17b   :  { %v933_v38 = vadd.f32 %v901_v9, %v4151_v26 }
 0x17d   :  { %v999_v39 = vadd.f32 %v949_v17, %v933_v38  ;;  %v950_v17 = vunpack.c.h.bf16 %v947_v48 }
 0x17e   :  { %v3260_v25 = vpop.eup %3259 }
 0x17f   :  { %v3011_v33 = vmul.f32 -1.442695, %v999_v39  ;;  %v958_v1 = vmul.f32 %v3260_v25, %v956_v22  ;;  %vm963_vm1 = vweird.f32 %v3260_v25 }
 0x180   :  { %vm964_vm2 = vmor %vm962_vm0, %vm963_vm1 }
 0x181   :  { %v887_v3 = vpop.f32.mrf.mxu2  ;;  %3261 = vpow2.f32 %v3011_v33  ;;  %v959_v9 = vsub.f32 1.0, %v958_v1 }
 0x183   :  { %v960_v38 = vmul.f32 %v3260_v25, %v959_v9  ;;  %v969_v9 = vor.u32 1.1754944e-38, %v968_v60 }
 0x185   :  { %v961_v63 = vadd.f32 %v3260_v25, %v960_v38 }
 0x187   :  { %v3262_v59 = vpop.eup %3261  ;;  %v965_v43 = vsel %vm964_vm2, %v3260_v25, %v961_v63 }
 0x188   :  { %v1003_v14 = vadd.f32 1.0, %v3262_v59  ;;  %v913_v11 = vpop.f32.mrf.mxu0 }
 0x189   :  { %v889_v40 = vpop.f32.mrf.mxu2 }
 0x18a   :  { %3263 = vrcp.f32 %v1003_v14  ;;  %v926_v49 = vpop.f32.mrf.mxu1  ;;  %vm1009_vm4 = vweird.f32 %v1003_v14 }
 0x18b   :  { %3265 = vrcp.f32 %v4154_v29  ;;  %v966_v49 = vand.u32 2147483647, %v956_v22  ;;  %v1015_v22 = vand.u32 2147483648, %v1003_v14 }
 0x18d   :  { %vm967_vm3 = vcmp.eq.f32.partialorder %v966_v49, 8.507059e+37  ;;  %v986_v49 = vand.u32 2147483647, %v4154_v29 }
 0x18e   :  { %v970_v38 = vsel %vm967_vm3, %v969_v9, %v965_v43  ;;  %v1016_v43 = vor.u32 1.1754944e-38, %v1015_v22 }
 0x18f   :  { %vm987_vm11 = vcmp.eq.f32.partialorder %v986_v49, 8.507059e+37 }
 0x190   :  { %v3264_v20 = vpop.eup %3263  ;;  %v914_v39 = vpop.f32.mrf.mxu0 }
 0x191   :  { %v934_v33 = vadd.f32 %v914_v39, %v4157_v12  ;;  %v1005_v40 = vmul.f32 %v3264_v20, %v1003_v14  ;;  %v3266_v26 = vpop.eup %3265  ;;  %v932_v12 = vadd.f32 %v887_v3, %v4161_v51  ;;  %vm1010_vm5 = vweird.f32 %v3264_v20 }
 0x192   :  { %v978_v52 = vmul.f32 %v3266_v26, %v4154_v29  ;;  %v927_v32 = vpop.f32.mrf.mxu1  ;;  %vm4166_vm6 = vmor %vm1009_vm4, %vm1010_vm5  ;;  %vm983_vm8 = vweird.f32 %v3266_v26 }
 0x193   :  { %v1019_v11 = vadd.f32 %v950_v17, %v934_v33  ;;  %v1006_v59 = vsub.f32 1.0, %v1005_v40  ;;  %v940_v17 = vld [vmem:[#allocation2 + $0x8] sm:$0xf]  ;;  %v4164_v33 = vperm.slane %v596_v6, 2  ;;  %v1013_v40 = vand.u32 2147483647, %v1003_v14  ;;  %vm984_vm10 = vmor %vm982_vm7, %vm983_vm8 }
 0x194   :  { %v979_v39 = vsub.f32 1.0, %v978_v52  ;;  %v943_v63 = vunpack.c.l.bf16 %v940_v17  ;;  %v992_v52 = vmul.f32 %v970_v38, %v932_v12  ;;  %v988_v6 = vand.u32 2147483648, %v4154_v29 }
 0x195   :  { %v3012_v1 = vmul.f32 -1.442695, %v1019_v11  ;;  %v1007_v48 = vmul.f32 %v3264_v20, %v1006_v59  ;;  %4804 = vst [vmem:[#allocation32_spill] sm:$0xff] %v4164_v33  ;;  %v935_v14 = vadd.f32 %v927_v32, %v4164_v33  ;;  %vm1014_vm9 = vcmp.eq.f32.partialorder %v1013_v40, 8.507059e+37 }
 0x196   :  { %v980_v4 = vmul.f32 %v3266_v26, %v979_v39  ;;  %v993_v12 = vadd.f32 %v992_v52, %v943_v63  ;;  %v989_v9 = vor.u32 1.1754944e-38, %v988_v6 }
 0x197   :  { %3267 = vpow2.f32 %v3012_v1  ;;  %v1008_v42 = vadd.f32 %v3264_v20, %v1007_v48  ;;  %v948_v1 = vld [vmem:[#allocation2 + $0xbc] sm:$0xf] }
 0x198   :  { %v981_v59 = vadd.f32 %v3266_v26, %v980_v4  ;;  %v951_v39 = vunpack.c.l.bf16 %v948_v1 }
 0x199   :  { %v1012_v3 = vsel %vm4166_vm6, %v3264_v20, %v1008_v42 }
 0x19a   :  { %v1017_v48 = vsel %vm1014_vm9, %v1016_v43, %v1012_v3  ;;  %v985_v20 = vsel %vm984_vm10, %v3266_v26, %v981_v59  ;;  %v4177_v59 = vpop.permute.xlu0 %606 }
 0x19b   :  { %v1039_v42 = vmul.f32 %v1017_v48, %v935_v14  ;;  %v990_v22 = vsel %vm987_vm11, %v989_v9, %v985_v20  ;;  %vm1046_vm0 = vcmp.gt.s32.totalorder %v4177_v59, 0  ;;  %vm1048_vm1 = vcmp.gt.s32.totalorder %v4177_v59, 7  ;;  %v4810_v20 = vld [vmem:[#allocation16_spill] sm:$0xff] }
 0x19c   :  { %v995_v40 = vsub.f32 1.0, %v990_v22  ;;  %v997_v26 = vmul.f32 %v990_v22, %v3866_v47  ;;  %v4813_v22 = vld [vmem:[#allocation19_spill] sm:$0xff] }
 0x19d   :  { %v3268_v11 = vpop.eup %3267 }
 0x19e   :  { %v1023_v25 = vadd.f32 1.0, %v3268_v11  ;;  %v1040_v11 = vadd.f32 %v1039_v42, %v951_v39  ;;  %v4809_v42 = vld [vmem:[#allocation15_spill] sm:$0xff] }
 0x1a0   :  { %3269 = vrcp.f32 %v1023_v25  ;;  %v1035_v32 = vand.u32 2147483648, %v1023_v25  ;;  %v1033_v29 = vand.u32 2147483647, %v1023_v25  ;;  %vm1029_vm13 = vweird.f32 %v1023_v25 }
 0x1a1   :  { %3271 = vtanh.f32 %v993_v12 }
 0x1a2   :  { %3273 = vtanh.f32 %v1040_v11  ;;  %v1036_v52 = vor.u32 1.1754944e-38, %v1035_v32  ;;  %vm1034_vm15 = vcmp.eq.f32.partialorder %v1033_v29, 8.507059e+37  ;;  %v4814_v11 = vld [vmem:[#allocation20_spill] sm:$0xff]  ;;  %v4816_v32 = vld [vmem:[#allocation22_spill] sm:$0xff]  ;;  %v4819_v29 = vld [vmem:[#allocation25_spill] sm:$0xff] }
 0x1a6   :  { %v3270_v17 = vpop.eup %3269 }
 0x1a7   :  { %v1025_v38 = vmul.f32 %v3270_v17, %v1023_v25  ;;  %vm1030_vm12 = vweird.f32 %v3270_v17  ;;  %v3272_v33 = vpop.eup %3271 }
 0x1a8   :  { %vm1031_vm14 = vmor %vm1029_vm13, %vm1030_vm12  ;;  %v996_v3 = vmul.f32 %v3272_v33, %v995_v40  ;;  %v3274_v49 = vpop.eup %3273  ;;  %v4817_v40 = vld [vmem:[#allocation23_spill] sm:$0xff] }
 0x1a9   :  { %v1026_v60 = vsub.f32 1.0, %v1025_v38  ;;  %v4812_v38 = vld [vmem:[#allocation18_spill] sm:$0xff] }
 0x1aa   :  { %v998_v1 = vadd.f32 %v997_v26, %v996_v3  ;;  %v1138_v26 = vld [vmem:[#allocation2 + $0x18] sm:$0xff] }
 0x1ab   :  { %v1027_v4 = vmul.f32 %v3270_v17, %v1026_v60  ;;  %v4815_v60 = vld [vmem:[#allocation21_spill] sm:$0xff] }
 0x1ac   :  { %v4185_v33 = vsel %vm1046_vm0, %v998_v1, %v3866_v47  ;;  %v4807_v47 = vld [vmem:[#allocation12_spill] sm:$0xff] }
 0x1ad   :  { %v1028_v63 = vadd.f32 %v3270_v17, %v1027_v4  ;;  %v4818_v4 = vld [vmem:[#allocation24_spill] sm:$0xff] }
 0x1af   :  { %v1032_v43 = vsel %vm1031_vm14, %v3270_v17, %v1028_v63  ;;  %v4811_v17 = vld [vmem:[#allocation17_spill] sm:$0xff]  ;;  %v4820_v63 = vld [vmem:[#allocation26_spill] sm:$0xff] }
 0x1b0   :  { %v1037_v6 = vsel %vm1034_vm15, %v1036_v52, %v1032_v43  ;;  %v1140_v43 = vunpack.c.l.bf16 %v1138_v26 }
 0x1b1   :  { %v1042_v14 = vsub.f32 1.0, %v1037_v6  ;;  %v1044_v12 = vmul.f32 %v3876_v50, %v1037_v6  ;;  %v1141_v6 = vunpack.c.h.bf16 %v1138_v26 }
 0x1b3   :  { %v1043_v48 = vmul.f32 %v3274_v49, %v1042_v14  ;;  %v1146_v14 = vld [vmem:[#allocation2 + $0x9c] sm:$0xff] }
 0x1b5   :  { %v1045_v25 = vadd.f32 %v1044_v12, %v1043_v48  ;;  %v4821_v48 = vld [vmem:[#allocation27_spill] sm:$0xff] }
 0x1b7   :  { %v4190_v9 = vsel %vm1048_vm1, %v1045_v25, %v3876_v50  ;;  %v4808_v50 = vld [vmem:[#allocation14_spill] sm:$0xff]  ;;  %v4822_v25 = vld [vmem:[#allocation28_spill] sm:$0xff] }
 0x1b8   :  { %v1050_v39 = vpack.c.bf16 %v4190_v9, %v4185_v33 }
 0x1ba   :  { %1059 = vmatmul.bf16.vlgmr.msrb.gmra.mxu2 %v1050_v39  ;;  %1072 = vmatmul.bf16.vlgmr.msrb.gmra.mxu3 %v1050_v39 }
 0x1bb   :  { %1085 = vmatmul.bf16.vlgmr.msra.gmra.mxu0 %v1050_v39  ;;  %1098 = vmatmul.bf16.vlgmr.msra.gmra.mxu1 %v1050_v39 }
 0x1bc   :  { %1276 = vmatpush.bf16.msrb.mxu2 %v3740_v62  ;;  %1289 = vmatpush.bf16.msrb.mxu3 %v3640_v28 }
 0x1bd   :  { %1302 = vmatpush.bf16.msra.mxu0 %v3890_v58  ;;  %1315 = vmatpush.bf16.msra.mxu1 %v3918_v7 }
 0x1c0   :  { %1277 = vmatpush.bf16.msrb.mxu2 %v3770_v8  ;;  %1290 = vmatpush.bf16.msrb.mxu3 %v3658_v34 }
 0x1c1   :  { %1303 = vmatpush.bf16.msra.mxu0 %v3926_v10  ;;  %1316 = vmatpush.bf16.msra.mxu1 %v3950_v21 }
 0x1c4   :  { %1278 = vmatpush.bf16.msrb.mxu2 %v3800_v18  ;;  %1291 = vmatpush.bf16.msrb.mxu3 %v3693_v46 }
 0x1c5   :  { %1304 = vmatpush.bf16.msra.mxu0 %v3956_v23  ;;  %1317 = vmatpush.bf16.msra.mxu1 %v3982_v41 }
 0x1c8   :  { %1279 = vmatpush.bf16.msrb.mxu2 %v3839_v36  ;;  %1292 = vmatpush.bf16.msrb.mxu3 %v3723_v56 }
 0x1c9   :  { %1305 = vmatpush.bf16.msra.mxu0 %v3985_v44  ;;  %1318 = vmatpush.bf16.msra.mxu1 %v4004_v61 }
 0x1ca   :  { %1111 = vmatmul.bf16.vlgmr.msra.gmra.mxu2 %v1050_v39  ;;  %1124 = vmatmul.bf16.vlgmr.msra.gmra.mxu3 %v1050_v39 }
 0x1cc   :  { %1280 = vmatpush.bf16.msrb.mxu2 %v3885_v55  ;;  %1293 = vmatpush.bf16.msrb.mxu3 %v3762_v5 }
 0x1cd   :  { %1306 = vmatpush.bf16.msra.mxu0 %v4007_v0  ;;  %1319 = vmatpush.bf16.msra.mxu1 %v4025_v13 }
 0x1d0   :  { %1281 = vmatpush.bf16.msrb.mxu2 %v3934_v15  ;;  %1294 = vmatpush.bf16.msrb.mxu3 %v3803_v19 }
 0x1d1   :  { %1307 = vmatpush.bf16.msra.mxu0 %v4029_v16  ;;  %1320 = vmatpush.bf16.msra.mxu1 %v4046_v27 }
 0x1d4   :  { %1282 = vmatpush.bf16.msrb.mxu2 %v3968_v31  ;;  %1295 = vmatpush.bf16.msrb.mxu3 %v3842_v37 }
 0x1d5   :  { %1308 = vmatpush.bf16.msra.mxu0 %v4049_v30  ;;  %1321 = vmatpush.bf16.msra.mxu1 %v4066_v45 }
 0x1d8   :  { %1283 = vmatpush.bf16.msrb.mxu2 %v3994_v54  ;;  %1296 = vmatpush.bf16.msrb.mxu3 %v3888_v57 }
 0x1d9   :  { %1309 = vmatpush.bf16.msra.mxu0 %v4069_v53  ;;  %1322 = vmatpush.bf16.msra.mxu1 %v4080_v2 }
 0x1dc   :  { %1449 = vmatpush.bf16.msra.mxu2 %v3629_v24  ;;  %1462 = vmatpush.bf16.msra.mxu3 %v3660_v35 }
 0x1e0   :  { %1450 = vmatpush.bf16.msra.mxu2 %v4807_v47  ;;  %1463 = vmatpush.bf16.msra.mxu3 %v4808_v50 }
 0x1e4   :  { %1451 = vmatpush.bf16.msra.mxu2 %v4809_v42  ;;  %1464 = vmatpush.bf16.msra.mxu3 %v4810_v20 }
 0x1e8   :  { %1452 = vmatpush.bf16.msra.mxu2 %v4811_v17  ;;  %1465 = vmatpush.bf16.msra.mxu3 %v4812_v38 }
 0x1ec   :  { %1453 = vmatpush.bf16.msra.mxu2 %v4813_v22  ;;  %1466 = vmatpush.bf16.msra.mxu3 %v4814_v11  ;;  %v4823_v11 = vld [vmem:[#allocation29_spill] sm:$0xff] }
 0x1f0   :  { %1454 = vmatpush.bf16.msra.mxu2 %v4815_v60  ;;  %1467 = vmatpush.bf16.msra.mxu3 %v4816_v32 }
 0x1f4   :  { %1455 = vmatpush.bf16.msra.mxu2 %v4817_v40  ;;  %1468 = vmatpush.bf16.msra.mxu3 %v4818_v4  ;;  %v1148_v40 = vunpack.c.l.bf16 %v1146_v14 }
 0x1f8   :  { %1456 = vmatpush.bf16.msra.mxu2 %v4819_v29  ;;  %1469 = vmatpush.bf16.msra.mxu3 %v4820_v63 }
 0x238   :  { %v4242_v52 = vpop.f32.mrf.mxu0  ;;  %v1099_v3 = vpop.f32.mrf.mxu1 }
 0x23d   :  { %v1060_v49 = vpop.f32.mrf.mxu2  ;;  %v1073_v1 = vpop.f32.mrf.mxu3 }
 0x23e   :  { %v1129_v12 = vadd.f32 %v1060_v49, %v4821_v48  ;;  %v1130_v39 = vadd.f32 %v1073_v1, %v4822_v25 }
 0x240   :  { %v1151_v32 = vadd.f32 %v1140_v43, %v1129_v12  ;;  %v1171_v4 = vadd.f32 %v1141_v6, %v1130_v39  ;;  %v1088_v60 = vpop.f32.mrf.mxu0  ;;  %v1100_v29 = vpop.f32.mrf.mxu1 }
 0x241   :  { %v1132_v63 = vadd.f32 %v1100_v29, %v4823_v11 }
 0x242   :  { %v3013_v22 = vmul.f32 -1.442695, %v1151_v32  ;;  %v3014_v38 = vmul.f32 -1.442695, %v1171_v4 }
 0x243   :  { %v1198_v3 = vadd.f32 %v1148_v40, %v1132_v63  ;;  %v1149_v40 = vunpack.c.h.bf16 %v1146_v14 }
 0x244   :  { %3275 = vpow2.f32 %v3013_v22 }
 0x245   :  { %v3015_v17 = vmul.f32 -1.442695, %v1198_v3  ;;  %v1062_v26 = vpop.f32.mrf.mxu2  ;;  %v1075_v20 = vpop.f32.mrf.mxu3  ;;  %3277 = vpow2.f32 %v3014_v38  ;;  %v4824_v38 = vld [vmem:[#allocation30_spill] sm:$0xff] }
 0x247   :  { %3279 = vpow2.f32 %v3015_v17 }
 0x24a   :  { %v3276_v42 = vpop.eup %3275 }
 0x24b   :  { %v1155_v49 = vadd.f32 1.0, %v3276_v42  ;;  %v3278_v48 = vpop.eup %3277 }
 0x24c   :  { %v4247_v60 = vadd.f32 1.0, %v3278_v48 }
 0x24d   :  { %v3280_v1 = vpop.eup %3279  ;;  %3281 = vrcp.f32 %v1155_v49  ;;  %v1112_v43 = vpop.f32.mrf.mxu2  ;;  %v1167_v48 = vand.u32 2147483648, %v1155_v49  ;;  %vm1161_vm3 = vweird.f32 %v1155_v49 }
 0x24e   :  { %v1125_v6 = vpop.f32.mrf.mxu3  ;;  %v1202_v12 = vadd.f32 1.0, %v3280_v1  ;;  %vm1181_vm11 = vweird.f32 %v4247_v60 }
 0x24f   :  { %v1165_v6 = vand.u32 2147483647, %v1155_v49  ;;  %v1168_v25 = vor.u32 1.1754944e-38, %v1167_v48 }
 0x250   :  { %3283 = vrcp.f32 %v1202_v12  ;;  %vm1208_vm7 = vweird.f32 %v1202_v12 }
 0x251   :  { %3285 = vrcp.f32 %v4247_v60  ;;  %vm1166_vm5 = vcmp.eq.f32.partialorder %v1165_v6, 8.507059e+37  ;;  %v1147_v6 = vld [vmem:[#allocation2 + $0xa4] sm:$0xf] }
 0x253   :  { %v3282_v32 = vpop.eup %3281 }
 0x254   :  { %v1157_v22 = vmul.f32 %v3282_v32, %v1155_v49  ;;  %vm1162_vm2 = vweird.f32 %v3282_v32 }
 0x255   :  { %v1113_v4 = vpop.f32.mrf.mxu2  ;;  %vm1163_vm4 = vmor %vm1161_vm3, %vm1162_vm2 }
 0x256   :  { %v1158_v20 = vsub.f32 1.0, %v1157_v22  ;;  %v1133_v17 = vadd.f32 %v1113_v4, %v4824_v38  ;;  %v3284_v29 = vpop.eup %3283  ;;  %v1214_v38 = vand.u32 2147483648, %v1202_v12 }
 0x257   :  { %v1204_v39 = vmul.f32 %v3284_v29, %v1202_v12  ;;  %v3286_v3 = vpop.eup %3285  ;;  %vm1209_vm6 = vweird.f32 %v3284_v29 }
 0x258   :  { %v1159_v42 = vmul.f32 %v3282_v32, %v1158_v20  ;;  %v1218_v63 = vadd.f32 %v1149_v40, %v1133_v17  ;;  %v1177_v11 = vmul.f32 %v3286_v3, %v4247_v60  ;;  %v1139_v40 = vld [vmem:[#allocation2 + $0x20] sm:$0xf]  ;;  %vm1210_vm8 = vmor %vm1208_vm7, %vm1209_vm6  ;;  %v1215_v48 = vor.u32 1.1754944e-38, %v1214_v38 }
 0x259   :  { %v1205_v1 = vsub.f32 1.0, %v1204_v39  ;;  %v1142_v39 = vunpack.c.l.bf16 %v1139_v40  ;;  %vm1182_vm10 = vweird.f32 %v3286_v3 }
 0x25a   :  { %v1160_v26 = vadd.f32 %v3282_v32, %v1159_v42  ;;  %v3016_v43 = vmul.f32 -1.442695, %v1218_v63  ;;  %v1178_v17 = vsub.f32 1.0, %v1177_v11  ;;  %v1131_v42 = vadd.f32 %v4242_v52, %v4161_v51  ;;  %vm1183_vm12 = vmor %vm1181_vm11, %vm1182_vm10 }
 0x25b   :  { %v1206_v14 = vmul.f32 %v3284_v29, %v1205_v1  ;;  %v1212_v63 = vand.u32 2147483647, %v1202_v12  ;;  %v1187_v52 = vand.u32 2147483648, %v4247_v60  ;;  %v1150_v12 = vunpack.c.l.bf16 %v1147_v6 }
 0x25c   :  { %3287 = vpow2.f32 %v3016_v43  ;;  %v1164_v22 = vsel %vm1163_vm4, %v3282_v32, %v1160_v26  ;;  %v1179_v32 = vmul.f32 %v3286_v3, %v1178_v17  ;;  %v1126_v26 = vpop.f32.mrf.mxu3  ;;  %vm1245_vm4 = vcmp.gt.s32.totalorder %v4177_v59, 1 }
 0x25d   :  { %v1207_v4 = vadd.f32 %v3284_v29, %v1206_v14  ;;  %v1169_v20 = vsel %vm1166_vm5, %v1168_v25, %v1164_v22  ;;  %vm1213_vm9 = vcmp.eq.f32.partialorder %v1212_v63, 8.507059e+37  ;;  %v4825_v14 = vld [vmem:[#allocation32_spill] sm:$0xff]  ;;  %vm1247_vm5 = vcmp.gt.s32.totalorder %v4177_v59, 6 }
 0x25e   :  { %v1191_v50 = vmul.f32 %v1169_v20, %v1131_v42  ;;  %v1134_v22 = vadd.f32 %v1126_v26, %v4825_v14  ;;  %v1180_v47 = vadd.f32 %v3286_v3, %v1179_v32  ;;  %v1188_v20 = vor.u32 1.1754944e-38, %v1187_v52 }
 0x25f   :  { %v1211_v1 = vsel %vm1210_vm8, %v3284_v29, %v1207_v4  ;;  %v1185_v29 = vand.u32 2147483647, %v4247_v60 }
 0x260   :  { %v1216_v25 = vsel %vm1213_vm9, %v1215_v48, %v1211_v1  ;;  %v1192_v11 = vadd.f32 %v1191_v50, %v1142_v39  ;;  %v1184_v38 = vsel %vm1183_vm12, %v3286_v3, %v1180_v47 }
 0x261   :  { %v1238_v51 = vmul.f32 %v1216_v25, %v1134_v22  ;;  %vm1186_vm13 = vcmp.eq.f32.partialorder %v1185_v29, 8.507059e+37 }
 0x262   :  { %v3288_v49 = vpop.eup %3287  ;;  %v1189_v42 = vsel %vm1186_vm13, %v1188_v20, %v1184_v38  ;;  %v4828_v38 = vld [vmem:[#allocation15_spill] sm:$0xff]  ;;  %v4830_v20 = vld [vmem:[#allocation17_spill] sm:$0xff] }
 0x263   :  { %v1222_v43 = vadd.f32 1.0, %v3288_v49  ;;  %v1239_v17 = vadd.f32 %v1238_v51, %v1150_v12  ;;  %v1194_v32 = vsub.f32 1.0, %v1189_v42  ;;  %v1196_v51 = vmul.f32 %v1189_v42, %v4185_v33  ;;  %v4833_v42 = vld [vmem:[#allocation20_spill] sm:$0xff] }
 0x265   :  { %3289 = vrcp.f32 %v1222_v43  ;;  %v1234_v63 = vand.u32 2147483648, %v1222_v43  ;;  %v1232_v39 = vand.u32 2147483647, %v1222_v43  ;;  %vm1228_vm15 = vweird.f32 %v1222_v43 }
 0x266   :  { %3291 = vtanh.f32 %v1192_v11 }
 0x267   :  { %3293 = vtanh.f32 %v1239_v17  ;;  %v1235_v60 = vor.u32 1.1754944e-38, %v1234_v63  ;;  %vm1233_vm3 = vcmp.eq.f32.partialorder %v1232_v39, 8.507059e+37  ;;  %v4831_v17 = vld [vmem:[#allocation18_spill] sm:$0xff]  ;;  %v4834_v63 = vld [vmem:[#allocation21_spill] sm:$0xff]  ;;  %v4836_v39 = vld [vmem:[#allocation23_spill] sm:$0xff] }
 0x26b   :  { %v3290_v4 = vpop.eup %3289 }
 0x26c   :  { %v1224_v40 = vmul.f32 %v3290_v4, %v1222_v43  ;;  %vm1229_vm14 = vweird.f32 %v3290_v4  ;;  %v3292_v1 = vpop.eup %3291 }
 0x26d   :  { %vm1230_vm2 = vmor %vm1228_vm15, %vm1229_vm14  ;;  %v1195_v48 = vmul.f32 %v3292_v1, %v1194_v32  ;;  %v3294_v25 = vpop.eup %3293  ;;  %v4837_v1 = vld [vmem:[#allocation24_spill] sm:$0xff]  ;;  %v4838_v32 = vld [vmem:[#allocation25_spill] sm:$0xff] }
 0x26e   :  { %v1225_v50 = vsub.f32 1.0, %v1224_v40  ;;  %v4829_v40 = vld [vmem:[#allocation16_spill] sm:$0xff] }
 0x26f   :  { %v1197_v11 = vadd.f32 %v1196_v51, %v1195_v48 }
 0x270   :  { %v1226_v49 = vmul.f32 %v3290_v4, %v1225_v50  ;;  %v4832_v50 = vld [vmem:[#allocation19_spill] sm:$0xff] }
 0x271   :  { %v4270_v29 = vsel %vm1245_vm4, %v1197_v11, %v4185_v33  ;;  %v4826_v33 = vld [vmem:[#allocation12_spill] sm:$0xff] }
 0x272   :  { %v1227_v26 = vadd.f32 %v3290_v4, %v1226_v49  ;;  %v4835_v49 = vld [vmem:[#allocation22_spill] sm:$0xff]  ;;  %v4841_v11 = vld [vmem:[#allocation28_spill] sm:$0xff] }
 0x274   :  { %v1231_v6 = vsel %vm1230_vm2, %v3290_v4, %v1227_v26  ;;  %v4839_v26 = vld [vmem:[#allocation26_spill] sm:$0xff] }
 0x275   :  { %v1236_v47 = vsel %vm1233_vm3, %v1235_v60, %v1231_v6  ;;  %v1337_v60 = vld [vmem:[#allocation2 + $0x30] sm:$0xff] }
 0x276   :  { %v1241_v3 = vsub.f32 1.0, %v1236_v47  ;;  %v1243_v52 = vmul.f32 %v1236_v47, %v4190_v9  ;;  %v1339_v48 = vunpack.c.l.bf16 %v1337_v60  ;;  %v1340_v6 = vunpack.c.h.bf16 %v1337_v60 }
 0x278   :  { %v1242_v22 = vmul.f32 %v3294_v25, %v1241_v3  ;;  %v4840_v3 = vld [vmem:[#allocation27_spill] sm:$0xff] }
 0x27a   :  { %v1244_v12 = vadd.f32 %v1243_v52, %v1242_v22 }
 0x27c   :  { %v4265_v43 = vsel %vm1247_vm5, %v1244_v12, %v4190_v9  ;;  %v4827_v9 = vld [vmem:[#allocation14_spill] sm:$0xff] }
 0x27d   :  { %v1249_v4 = vpack.c.bf16 %v4265_v43, %v4270_v29 }
 0x27f   :  { %1258 = vmatmul.bf16.vlgmr.msrb.gmra.mxu0 %v1249_v4  ;;  %1271 = vmatmul.bf16.vlgmr.msrb.gmra.mxu1 %v1249_v4 }
 0x280   :  { %1284 = vmatmul.bf16.vlgmr.msrb.gmra.mxu2 %v1249_v4  ;;  %1297 = vmatmul.bf16.vlgmr.msrb.gmra.mxu3 %v1249_v4 }
 0x281   :  { %1475 = vmatpush.bf16.msrb.mxu0 %v3740_v62  ;;  %1488 = vmatpush.bf16.msrb.mxu1 %v3640_v28 }
 0x282   :  { %1501 = vmatpush.bf16.msrb.mxu2 %v3890_v58  ;;  %1514 = vmatpush.bf16.msrb.mxu3 %v3918_v7 }
 0x285   :  { %1476 = vmatpush.bf16.msrb.mxu0 %v3770_v8  ;;  %1489 = vmatpush.bf16.msrb.mxu1 %v3658_v34 }
 0x286   :  { %1502 = vmatpush.bf16.msrb.mxu2 %v3926_v10  ;;  %1515 = vmatpush.bf16.msrb.mxu3 %v3950_v21 }
 0x289   :  { %1477 = vmatpush.bf16.msrb.mxu0 %v3800_v18  ;;  %1490 = vmatpush.bf16.msrb.mxu1 %v3693_v46 }
 0x28a   :  { %1503 = vmatpush.bf16.msrb.mxu2 %v3956_v23  ;;  %1516 = vmatpush.bf16.msrb.mxu3 %v3982_v41 }
 0x28d   :  { %1478 = vmatpush.bf16.msrb.mxu0 %v3839_v36  ;;  %1491 = vmatpush.bf16.msrb.mxu1 %v3723_v56 }
 0x28e   :  { %1504 = vmatpush.bf16.msrb.mxu2 %v3985_v44  ;;  %1517 = vmatpush.bf16.msrb.mxu3 %v4004_v61 }
 0x28f   :  { %1310 = vmatmul.bf16.vlgmr.msra.gmra.mxu0 %v1249_v4  ;;  %1323 = vmatmul.bf16.vlgmr.msra.gmra.mxu1 %v1249_v4 }
 0x291   :  { %1479 = vmatpush.bf16.msrb.mxu0 %v3885_v55  ;;  %1492 = vmatpush.bf16.msrb.mxu1 %v3762_v5 }
 0x292   :  { %1505 = vmatpush.bf16.msrb.mxu2 %v4007_v0  ;;  %1518 = vmatpush.bf16.msrb.mxu3 %v4025_v13 }
 0x295   :  { %1480 = vmatpush.bf16.msrb.mxu0 %v3934_v15  ;;  %1493 = vmatpush.bf16.msrb.mxu1 %v3803_v19 }
 0x296   :  { %1506 = vmatpush.bf16.msrb.mxu2 %v4029_v16  ;;  %1519 = vmatpush.bf16.msrb.mxu3 %v4046_v27 }
 0x299   :  { %1481 = vmatpush.bf16.msrb.mxu0 %v3968_v31  ;;  %1494 = vmatpush.bf16.msrb.mxu1 %v3842_v37 }
 0x29a   :  { %1507 = vmatpush.bf16.msrb.mxu2 %v4049_v30  ;;  %1520 = vmatpush.bf16.msrb.mxu3 %v4066_v45 }
 0x29d   :  { %1482 = vmatpush.bf16.msrb.mxu0 %v3994_v54  ;;  %1495 = vmatpush.bf16.msrb.mxu1 %v3888_v57 }
 0x29e   :  { %1508 = vmatpush.bf16.msrb.mxu2 %v4069_v53  ;;  %1521 = vmatpush.bf16.msrb.mxu3 %v4080_v2 }
 0x2a1   :  { %1648 = vmatpush.bf16.msra.mxu0 %v3629_v24  ;;  %1661 = vmatpush.bf16.msra.mxu1 %v3660_v35 }
 0x2a5   :  { %1649 = vmatpush.bf16.msra.mxu0 %v4826_v33  ;;  %1662 = vmatpush.bf16.msra.mxu1 %v4827_v9 }
 0x2a9   :  { %1650 = vmatpush.bf16.msra.mxu0 %v4828_v38  ;;  %1663 = vmatpush.bf16.msra.mxu1 %v4829_v40 }
 0x2ad   :  { %1651 = vmatpush.bf16.msra.mxu0 %v4830_v20  ;;  %1664 = vmatpush.bf16.msra.mxu1 %v4831_v17 }
 0x2b1   :  { %1652 = vmatpush.bf16.msra.mxu0 %v4832_v50  ;;  %1665 = vmatpush.bf16.msra.mxu1 %v4833_v42  ;;  %v1345_v42 = vld [vmem:[#allocation2 + $0x84] sm:$0xff] }
 0x2b5   :  { %1653 = vmatpush.bf16.msra.mxu0 %v4834_v63  ;;  %1666 = vmatpush.bf16.msra.mxu1 %v4835_v49 }
 0x2b9   :  { %1654 = vmatpush.bf16.msra.mxu0 %v4836_v39  ;;  %1667 = vmatpush.bf16.msra.mxu1 %v4837_v1 }
 0x2bd   :  { %1655 = vmatpush.bf16.msra.mxu0 %v4838_v32  ;;  %1668 = vmatpush.bf16.msra.mxu1 %v4839_v26 }
 0x2fc   :  { %v1259_v47 = vpop.f32.mrf.mxu0  ;;  %v1272_v51 = vpop.f32.mrf.mxu1 }
 0x2fd   :  { %v1328_v25 = vadd.f32 %v1259_v47, %v4840_v3  ;;  %v1329_v22 = vadd.f32 %v1272_v51, %v4841_v11  ;;  %v1347_v47 = vunpack.c.l.bf16 %v1345_v42 }
 0x2ff   :  { %v1350_v52 = vadd.f32 %v1339_v48, %v1328_v25  ;;  %v1370_v12 = vadd.f32 %v1340_v6, %v1329_v22  ;;  %v4842_v48 = vld [vmem:[#allocation29_spill] sm:$0xff] }
 0x301   :  { %v3017_v4 = vmul.f32 -1.442695, %v1350_v52  ;;  %v3018_v49 = vmul.f32 -1.442695, %v1370_v12  ;;  %v4843_v12 = vld [vmem:[#allocation30_spill] sm:$0xff] }
 0x303   :  { %3295 = vpow2.f32 %v3017_v4  ;;  %v1285_v39 = vpop.f32.mrf.mxu2  ;;  %v1298_v1 = vpop.f32.mrf.mxu3 }
 0x304   :  { %v1261_v63 = vpop.f32.mrf.mxu0  ;;  %v1274_v32 = vpop.f32.mrf.mxu1  ;;  %3297 = vpow2.f32 %v3018_v49  ;;  %v1348_v49 = vunpack.c.h.bf16 %v1345_v42 }
 0x309   :  { %v3296_v26 = vpop.eup %3295 }
 0x30a   :  { %v1354_v50 = vadd.f32 1.0, %v3296_v26  ;;  %v3298_v20 = vpop.eup %3297 }
 0x30b   :  { %v1287_v60 = vpop.f32.mrf.mxu2  ;;  %v1299_v17 = vpop.f32.mrf.mxu3  ;;  %v4325_v25 = vadd.f32 1.0, %v3298_v20 }
 0x30c   :  { %3299 = vrcp.f32 %v1354_v50  ;;  %v1311_v3 = vpop.f32.mrf.mxu0  ;;  %v1324_v51 = vpop.f32.mrf.mxu1  ;;  %v1331_v6 = vadd.f32 %v1299_v17, %v4842_v48  ;;  %vm1360_vm7 = vweird.f32 %v1354_v50 }
 0x30d   :  { %3301 = vrcp.f32 %v4325_v25  ;;  %vm1380_vm12 = vweird.f32 %v4325_v25 }
 0x30e   :  { %v1397_v22 = vadd.f32 %v1347_v47, %v1331_v6  ;;  %v1366_v47 = vand.u32 2147483648, %v1354_v50 }
 0x310   :  { %v3019_v1 = vmul.f32 -1.442695, %v1397_v22  ;;  %v1364_v22 = vand.u32 2147483647, %v1354_v50 }
 0x312   :  { %v3300_v52 = vpop.eup %3299  ;;  %3303 = vpow2.f32 %v3019_v1  ;;  %vm1365_vm9 = vcmp.eq.f32.partialorder %v1364_v22, 8.507059e+37 }
 0x313   :  { %v1356_v63 = vmul.f32 %v3300_v52, %v1354_v50  ;;  %v4329_v3 = vpop.eup %3301  ;;  %vm1361_vm6 = vweird.f32 %v3300_v52 }
 0x314   :  { %v1312_v32 = vpop.f32.mrf.mxu0  ;;  %v1376_v42 = vmul.f32 %v4329_v3, %v4325_v25  ;;  %vm1362_vm8 = vmor %vm1360_vm7, %vm1361_vm6  ;;  %vm1381_vm11 = vweird.f32 %v4329_v3 }
 0x315   :  { %v1357_v26 = vsub.f32 1.0, %v1356_v63  ;;  %v1332_v4 = vadd.f32 %v1312_v32, %v4843_v12  ;;  %v1367_v63 = vor.u32 1.1754944e-38, %v1366_v47  ;;  %vm4340_vm15 = vmor %vm1380_vm12, %vm1381_vm11  ;;  %vm1446_vm11 = vcmp.gt.s32.totalorder %v4177_v59, 5 }
 0x316   :  { %v1377_v32 = vsub.f32 1.0, %v1376_v42 }
 0x317   :  { %v1358_v60 = vmul.f32 %v3300_v52, %v1357_v26  ;;  %v1417_v11 = vadd.f32 %v1348_v49, %v1332_v4  ;;  %v1338_v26 = vld [vmem:[#allocation2 + $0x38] sm:$0xf]  ;;  %v4844_v4 = vld [vmem:[#allocation31_spill] sm:$0xff] }
 0x318   :  { %v3304_v17 = vpop.eup %3303  ;;  %v1378_v40 = vmul.f32 %v4329_v3, %v1377_v32 }
 0x319   :  { %v3020_v51 = vmul.f32 -1.442695, %v1417_v11  ;;  %v1359_v20 = vadd.f32 %v3300_v52, %v1358_v60  ;;  %v1401_v6 = vadd.f32 1.0, %v3304_v17  ;;  %v1330_v60 = vadd.f32 %v1285_v39, %v4844_v4  ;;  %v1325_v39 = vpop.f32.mrf.mxu1 }
 0x31a   :  { %v1341_v17 = vunpack.c.l.bf16 %v1338_v26  ;;  %v1379_v22 = vadd.f32 %v4329_v3, %v1378_v40  ;;  %v1333_v40 = vadd.f32 %v1325_v39, %v4825_v14 }
 0x31b   :  { %3305 = vpow2.f32 %v3020_v51  ;;  %v1363_v1 = vsel %vm1362_vm8, %v3300_v52, %v1359_v20  ;;  %v1413_v9 = vand.u32 2147483648, %v1401_v6  ;;  %v1346_v52 = vld [vmem:[#allocation2 + $0x8c] sm:$0xf]  ;;  %v1411_v47 = vand.u32 2147483647, %v1401_v6 }
 0x31c   :  { %3307 = vrcp.f32 %v1401_v6  ;;  %v1368_v11 = vsel %vm1365_vm9, %v1367_v63, %v1363_v1  ;;  %v1386_v1 = vand.u32 2147483648, %v4325_v25  ;;  %vm1407_vm13 = vweird.f32 %v1401_v6 }
 0x31d   :  { %v1390_v51 = vmul.f32 %v1368_v11, %v1330_v60  ;;  %v1349_v26 = vunpack.c.l.bf16 %v1346_v52  ;;  %vm1412_vm2 = vcmp.eq.f32.partialorder %v1411_v47, 8.507059e+37 }
 0x31f   :  { %v1391_v33 = vadd.f32 %v1390_v51, %v1341_v17  ;;  %v1383_v17 = vsel %vm4340_vm15, %v4329_v3, %v1379_v22 }
 0x321   :  { %v3306_v49 = vpop.eup %3305 }
 0x322   :  { %v1421_v12 = vadd.f32 1.0, %v3306_v49  ;;  %v3308_v48 = vpop.eup %3307  ;;  %v1384_v49 = vand.u32 2147483647, %v4325_v25  ;;  %v1387_v25 = vor.u32 1.1754944e-38, %v1386_v1 }
 0x323   :  { %v1403_v50 = vmul.f32 %v3308_v48, %v1401_v6  ;;  %vm1408_vm10 = vweird.f32 %v3308_v48 }
 0x324   :  { %3309 = vrcp.f32 %v1421_v12  ;;  %vm1409_vm14 = vmor %vm1407_vm13, %vm1408_vm10  ;;  %vm1385_vm3 = vcmp.eq.f32.partialorder %v1384_v49, 8.507059e+37  ;;  %vm1427_vm7 = vweird.f32 %v1421_v12  ;;  %vm1444_vm10 = vcmp.gt.s32.totalorder %v4177_v59, 2 }
 0x325   :  { %v1404_v38 = vsub.f32 1.0, %v1403_v50  ;;  %3311 = vtanh.f32 %v1391_v33  ;;  %v1433_v50 = vand.u32 2147483648, %v1421_v12  ;;  %v1388_v4 = vsel %vm1385_vm3, %v1387_v25, %v1383_v17  ;;  %v4851_v17 = vld [vmem:[#allocation16_spill] sm:$0xff]  ;;  %v4854_v25 = vld [vmem:[#allocation19_spill] sm:$0xff] }
 0x326   :  { %v1393_v47 = vsub.f32 1.0, %v1388_v4 }
 0x327   :  { %v1405_v20 = vmul.f32 %v3308_v48, %v1404_v38  ;;  %v1414_v38 = vor.u32 1.1754944e-38, %v1413_v9 }
 0x329   :  { %v1406_v63 = vadd.f32 %v3308_v48, %v1405_v20  ;;  %v1431_v20 = vand.u32 2147483647, %v1421_v12 }
 0x32a   :  { %v3310_v42 = vpop.eup %3309 }
 0x32b   :  { %v1423_v32 = vmul.f32 %v3310_v42, %v1421_v12  ;;  %v1410_v60 = vsel %vm1409_vm14, %v3308_v48, %v1406_v63  ;;  %vm1428_vm6 = vweird.f32 %v3310_v42  ;;  %v3312_v39 = vpop.eup %3311  ;;  %v1434_v48 = vor.u32 1.1754944e-38, %v1433_v50  ;;  %v4855_v50 = vld [vmem:[#allocation20_spill] sm:$0xff] }
 0x32c   :  { %v1415_v51 = vsel %vm1412_vm2, %v1414_v38, %v1410_v60  ;;  %vm1429_vm8 = vmor %vm1427_vm7, %vm1428_vm6  ;;  %vm1432_vm9 = vcmp.eq.f32.partialorder %v1431_v20, 8.507059e+37  ;;  %v1394_v22 = vmul.f32 %v3312_v39, %v1393_v47  ;;  %v4850_v60 = vld [vmem:[#allocation15_spill] sm:$0xff]  ;;  %v4860_v39 = vld [vmem:[#allocation25_spill] sm:$0xff] }
 0x32d   :  { %v1424_v6 = vsub.f32 1.0, %v1423_v32  ;;  %v1437_v52 = vmul.f32 %v1415_v51, %v1333_v40  ;;  %v1395_v32 = vmul.f32 %v1388_v4, %v4270_v29  ;;  %v4853_v51 = vld [vmem:[#allocation18_spill] sm:$0xff]  ;;  %v4858_v20 = vld [vmem:[#allocation23_spill] sm:$0xff] }
 0x32f   :  { %v1425_v9 = vmul.f32 %v3310_v42, %v1424_v6  ;;  %v1438_v35 = vadd.f32 %v1437_v52, %v1349_v26  ;;  %v1396_v38 = vadd.f32 %v1395_v32, %v1394_v22  ;;  %v4852_v6 = vld [vmem:[#allocation17_spill] sm:$0xff] }
 0x330   :  { %v4856_v52 = vld [vmem:[#allocation21_spill] sm:$0xff] }
 0x331   :  { %v1426_v33 = vadd.f32 %v3310_v42, %v1425_v9  ;;  %3313 = vtanh.f32 %v1438_v35  ;;  %v4355_v35 = vsel %vm1444_vm10, %v1396_v38, %v4270_v29  ;;  %v4848_v29 = vld [vmem:[#allocation12_spill] sm:$0xff]  ;;  %v4857_v9 = vld [vmem:[#allocation22_spill] sm:$0xff] }
 0x332   :  { %v1544_v32 = vld [vmem:[#allocation2 + $0x6c] sm:$0xff] }
 0x333   :  { %v1430_v63 = vsel %vm1429_vm8, %v3310_v42, %v1426_v33  ;;  %v4849_v42 = vld [vmem:[#allocation14_spill] sm:$0xff]  ;;  %v4859_v33 = vld [vmem:[#allocation24_spill] sm:$0xff] }
 0x334   :  { %v1435_v3 = vsel %vm1432_vm9, %v1434_v48, %v1430_v63  ;;  %v4861_v48 = vld [vmem:[#allocation26_spill] sm:$0xff] }
 0x335   :  { %v1440_v1 = vsub.f32 1.0, %v1435_v3  ;;  %v1442_v40 = vmul.f32 %v1435_v3, %v4265_v43  ;;  %v1536_v3 = vld [vmem:[#allocation2 + $0x48] sm:$0xff] }
 0x336   :  { %v1538_v22 = vunpack.c.l.bf16 %v1536_v3 }
 0x337   :  { %v3314_v49 = vpop.eup %3313 }
 0x338   :  { %v1441_v11 = vmul.f32 %v3314_v49, %v1440_v1  ;;  %v1539_v1 = vunpack.c.h.bf16 %v1536_v3 }
 0x33a   :  { %v1443_v26 = vadd.f32 %v1442_v40, %v1441_v11  ;;  %v4862_v11 = vld [vmem:[#allocation27_spill] sm:$0xff] }
 0x33c   :  { %v4360_v12 = vsel %vm1446_vm11, %v1443_v26, %v4265_v43  ;;  %v4847_v43 = vld [vmem:[#allocation13_spill] sm:$0xff]  ;;  %v4863_v26 = vld [vmem:[#allocation28_spill] sm:$0xff] }
 0x33d   :  { %v1448_v4 = vpack.c.bf16 %v4360_v12, %v4355_v35 }
 0x33f   :  { %1457 = vmatmul.bf16.vlgmr.msra.gmra.mxu2 %v1448_v4  ;;  %1470 = vmatmul.bf16.vlgmr.msra.gmra.mxu3 %v1448_v4 }
 0x340   :  { %1483 = vmatmul.bf16.vlgmr.msrb.gmra.mxu0 %v1448_v4  ;;  %1496 = vmatmul.bf16.vlgmr.msrb.gmra.mxu1 %v1448_v4 }
 0x341   :  { %1674 = vmatpush.bf16.msra.mxu2 %v3740_v62  ;;  %1687 = vmatpush.bf16.msra.mxu3 %v3640_v28 }
 0x342   :  { %1700 = vmatpush.bf16.msrb.mxu0 %v3890_v58  ;;  %1713 = vmatpush.bf16.msrb.mxu1 %v3918_v7 }
 0x345   :  { %1675 = vmatpush.bf16.msra.mxu2 %v3770_v8  ;;  %1688 = vmatpush.bf16.msra.mxu3 %v3658_v34 }
 0x346   :  { %1701 = vmatpush.bf16.msrb.mxu0 %v3926_v10  ;;  %1714 = vmatpush.bf16.msrb.mxu1 %v3950_v21 }
 0x349   :  { %1676 = vmatpush.bf16.msra.mxu2 %v3800_v18  ;;  %1689 = vmatpush.bf16.msra.mxu3 %v3693_v46 }
 0x34a   :  { %1702 = vmatpush.bf16.msrb.mxu0 %v3956_v23  ;;  %1715 = vmatpush.bf16.msrb.mxu1 %v3982_v41 }
 0x34d   :  { %1677 = vmatpush.bf16.msra.mxu2 %v3839_v36  ;;  %1690 = vmatpush.bf16.msra.mxu3 %v3723_v56 }
 0x34e   :  { %1703 = vmatpush.bf16.msrb.mxu0 %v3985_v44  ;;  %1716 = vmatpush.bf16.msrb.mxu1 %v4004_v61 }
 0x34f   :  { %1509 = vmatmul.bf16.vlgmr.msrb.gmra.mxu2 %v1448_v4  ;;  %1522 = vmatmul.bf16.vlgmr.msrb.gmra.mxu3 %v1448_v4 }
 0x351   :  { %1678 = vmatpush.bf16.msra.mxu2 %v3885_v55  ;;  %1691 = vmatpush.bf16.msra.mxu3 %v3762_v5 }
 0x352   :  { %1704 = vmatpush.bf16.msrb.mxu0 %v4007_v0  ;;  %1717 = vmatpush.bf16.msrb.mxu1 %v4025_v13 }
 0x355   :  { %1679 = vmatpush.bf16.msra.mxu2 %v3934_v15  ;;  %1692 = vmatpush.bf16.msra.mxu3 %v3803_v19 }
 0x356   :  { %1705 = vmatpush.bf16.msrb.mxu0 %v4029_v16  ;;  %1718 = vmatpush.bf16.msrb.mxu1 %v4046_v27 }
 0x359   :  { %1680 = vmatpush.bf16.msra.mxu2 %v3968_v31  ;;  %1693 = vmatpush.bf16.msra.mxu3 %v3842_v37 }
 0x35a   :  { %1706 = vmatpush.bf16.msrb.mxu0 %v4049_v30  ;;  %1719 = vmatpush.bf16.msrb.mxu1 %v4066_v45 }
 0x35d   :  { %1681 = vmatpush.bf16.msra.mxu2 %v3994_v54  ;;  %1694 = vmatpush.bf16.msra.mxu3 %v3888_v57 }
 0x35e   :  { %1707 = vmatpush.bf16.msrb.mxu0 %v4069_v53  ;;  %1720 = vmatpush.bf16.msrb.mxu1 %v4080_v2 }
 0x361   :  { %1839 = vmatpush.bf16.msrb.mxu2 %v3629_v24  ;;  %1852 = vmatpush.bf16.msrb.mxu3 %v4847_v43 }
 0x365   :  { %1840 = vmatpush.bf16.msrb.mxu2 %v4848_v29  ;;  %1853 = vmatpush.bf16.msrb.mxu3 %v4849_v42 }
 0x369   :  { %1841 = vmatpush.bf16.msrb.mxu2 %v4850_v60  ;;  %1854 = vmatpush.bf16.msrb.mxu3 %v4851_v17 }
 0x36d   :  { %1842 = vmatpush.bf16.msrb.mxu2 %v4852_v6  ;;  %1855 = vmatpush.bf16.msrb.mxu3 %v4853_v51 }
 0x371   :  { %1843 = vmatpush.bf16.msrb.mxu2 %v4854_v25  ;;  %1856 = vmatpush.bf16.msrb.mxu3 %v4855_v50  ;;  %v4864_v50 = vld [vmem:[#allocation29_spill] sm:$0xff] }
 0x375   :  { %1844 = vmatpush.bf16.msrb.mxu2 %v4856_v52  ;;  %1857 = vmatpush.bf16.msrb.mxu3 %v4857_v9 }
 0x379   :  { %1845 = vmatpush.bf16.msrb.mxu2 %v4858_v20  ;;  %1858 = vmatpush.bf16.msrb.mxu3 %v4859_v33  ;;  %v1546_v20 = vunpack.c.l.bf16 %v1544_v32 }
 0x37d   :  { %1846 = vmatpush.bf16.msrb.mxu2 %v4860_v39  ;;  %1859 = vmatpush.bf16.msrb.mxu3 %v4861_v48 }
 0x3bd   :  { %v4412_v47 = vpop.f32.mrf.mxu0  ;;  %v1497_v63 = vpop.f32.mrf.mxu1 }
 0x3c2   :  { %v1458_v49 = vpop.f32.mrf.mxu2  ;;  %v1471_v38 = vpop.f32.mrf.mxu3 }
 0x3c3   :  { %v1527_v40 = vadd.f32 %v1458_v49, %v4862_v11  ;;  %v1528_v4 = vadd.f32 %v1471_v38, %v4863_v26 }
 0x3c5   :  { %v1549_v9 = vadd.f32 %v1538_v22, %v1527_v40  ;;  %v1569_v33 = vadd.f32 %v1539_v1, %v1528_v4  ;;  %v1486_v52 = vpop.f32.mrf.mxu0  ;;  %v1498_v39 = vpop.f32.mrf.mxu1 }
 0x3c6   :  { %v1530_v48 = vadd.f32 %v1498_v39, %v4864_v50 }
 0x3c7   :  { %v3021_v25 = vmul.f32 -1.442695, %v1549_v9  ;;  %v3022_v51 = vmul.f32 -1.442695, %v1569_v33 }
 0x3c8   :  { %v1596_v63 = vadd.f32 %v1546_v20, %v1530_v48  ;;  %v1547_v20 = vunpack.c.h.bf16 %v1544_v32 }
 0x3c9   :  { %3315 = vpow2.f32 %v3021_v25 }
 0x3ca   :  { %v3023_v6 = vmul.f32 -1.442695, %v1596_v63  ;;  %v1460_v3 = vpop.f32.mrf.mxu2  ;;  %v1473_v17 = vpop.f32.mrf.mxu3  ;;  %3317 = vpow2.f32 %v3022_v51  ;;  %v4865_v51 = vld [vmem:[#allocation30_spill] sm:$0xff] }
 0x3cc   :  { %3319 = vpow2.f32 %v3023_v6 }
 0x3cf   :  { %v3316_v60 = vpop.eup %3315 }
 0x3d0   :  { %v1553_v49 = vadd.f32 1.0, %v3316_v60  ;;  %v3318_v11 = vpop.eup %3317 }
 0x3d1   :  { %v4417_v52 = vadd.f32 1.0, %v3318_v11 }
 0x3d2   :  { %v3320_v38 = vpop.eup %3319  ;;  %3321 = vrcp.f32 %v1553_v49  ;;  %v1510_v22 = vpop.f32.mrf.mxu2  ;;  %v1565_v11 = vand.u32 2147483648, %v1553_v49  ;;  %vm1559_vm13 = vweird.f32 %v1553_v49 }
 0x3d3   :  { %v1523_v1 = vpop.f32.mrf.mxu3  ;;  %v1600_v40 = vadd.f32 1.0, %v3320_v38  ;;  %vm1579_vm9 = vweird.f32 %v4417_v52 }
 0x3d4   :  { %v1563_v1 = vand.u32 2147483647, %v1553_v49  ;;  %v1566_v26 = vor.u32 1.1754944e-38, %v1565_v11 }
 0x3d5   :  { %3323 = vrcp.f32 %v1600_v40  ;;  %vm1606_vm3 = vweird.f32 %v1600_v40 }
 0x3d6   :  { %3325 = vrcp.f32 %v4417_v52  ;;  %vm1564_vm15 = vcmp.eq.f32.partialorder %v1563_v1, 8.507059e+37  ;;  %v1545_v1 = vld [vmem:[#allocation2 + $0x74] sm:$0xf] }
 0x3d8   :  { %v3322_v9 = vpop.eup %3321 }
 0x3d9   :  { %v1555_v25 = vmul.f32 %v3322_v9, %v1553_v49  ;;  %vm1560_vm12 = vweird.f32 %v3322_v9 }
 0x3da   :  { %v1511_v33 = vpop.f32.mrf.mxu2  ;;  %vm1561_vm14 = vmor %vm1559_vm13, %vm1560_vm12 }
 0x3db   :  { %v1556_v17 = vsub.f32 1.0, %v1555_v25  ;;  %v1531_v6 = vadd.f32 %v1511_v33, %v4865_v51  ;;  %v3324_v39 = vpop.eup %3323  ;;  %v1612_v51 = vand.u32 2147483648, %v1600_v40 }
 0x3dc   :  { %v1602_v4 = vmul.f32 %v3324_v39, %v1600_v40  ;;  %v3326_v63 = vpop.eup %3325  ;;  %vm1607_vm2 = vweird.f32 %v3324_v39 }
 0x3dd   :  { %v1557_v60 = vmul.f32 %v3322_v9, %v1556_v17  ;;  %v1616_v48 = vadd.f32 %v1547_v20, %v1531_v6  ;;  %v1575_v50 = vmul.f32 %v3326_v63, %v4417_v52  ;;  %v1537_v20 = vld [vmem:[#allocation2 + $0x50] sm:$0xf]  ;;  %vm1608_vm6 = vmor %vm1606_vm3, %vm1607_vm2  ;;  %v1613_v11 = vor.u32 1.1754944e-38, %v1612_v51 }
 0x3de   :  { %v1603_v38 = vsub.f32 1.0, %v1602_v4  ;;  %v1610_v4 = vand.u32 2147483647, %v1600_v40  ;;  %v1540_v42 = vunpack.c.l.bf16 %v1537_v20  ;;  %vm1580_vm8 = vweird.f32 %v3326_v63 }
 0x3df   :  { %v1558_v3 = vadd.f32 %v3322_v9, %v1557_v60  ;;  %v3024_v22 = vmul.f32 -1.442695, %v1616_v48  ;;  %v1576_v6 = vsub.f32 1.0, %v1575_v50  ;;  %v4866_v60 = vld [vmem:[#allocation31_spill] sm:$0xff]  ;;  %v1548_v40 = vunpack.c.l.bf16 %v1545_v1  ;;  %vm1581_vm12 = vmor %vm1579_vm9, %vm1580_vm8 }
 0x3e0   :  { %v1604_v32 = vmul.f32 %v3324_v39, %v1603_v38  ;;  %v1529_v48 = vadd.f32 %v4412_v47, %v4866_v60  ;;  %vm1611_vm7 = vcmp.eq.f32.partialorder %v1610_v4, 8.507059e+37  ;;  %v1585_v47 = vand.u32 2147483648, %v4417_v52 }
 0x3e1   :  { %3327 = vpow2.f32 %v3024_v22  ;;  %v1562_v25 = vsel %vm1561_vm14, %v3322_v9, %v1558_v3  ;;  %v1577_v9 = vmul.f32 %v3326_v63, %v1576_v6  ;;  %v1524_v3 = vpop.f32.mrf.mxu3 }
 0x3e2   :  { %v1605_v33 = vadd.f32 %v3324_v39, %v1604_v32  ;;  %v1567_v17 = vsel %vm1564_vm15, %v1566_v26, %v1562_v25  ;;  %v1532_v32 = vadd.f32 %v1524_v3, %v4825_v14 }
 0x3e3   :  { %v1589_v29 = vmul.f32 %v1567_v17, %v1529_v48  ;;  %v1578_v25 = vadd.f32 %v3326_v63, %v1577_v9  ;;  %v1586_v17 = vor.u32 1.1754944e-38, %v1585_v47 }
 0x3e4   :  { %v1609_v38 = vsel %vm1608_vm6, %v3324_v39, %v1605_v33  ;;  %v1583_v39 = vand.u32 2147483647, %v4417_v52  ;;  %vm1643_vm6 = vcmp.gt.s32.totalorder %v4177_v59, 3 }
 0x3e5   :  { %v1614_v26 = vsel %vm1611_vm7, %v1613_v11, %v1609_v38  ;;  %v1590_v50 = vadd.f32 %v1589_v29, %v1540_v42  ;;  %v1582_v51 = vsel %vm1581_vm12, %v3326_v63, %v1578_v25  ;;  %vm1645_vm7 = vcmp.gt.s32.totalorder %v4177_v59, 4 }
 0x3e6   :  { %v1636_v60 = vmul.f32 %v1614_v26, %v1532_v32  ;;  %vm1584_vm13 = vcmp.eq.f32.partialorder %v1583_v39, 8.507059e+37 }
 0x3e7   :  { %v3328_v49 = vpop.eup %3327  ;;  %v1587_v42 = vsel %vm1584_vm13, %v1586_v17, %v1582_v51  ;;  %v4869_v51 = vld [vmem:[#allocation15_spill] sm:$0xff]  ;;  %v4871_v17 = vld [vmem:[#allocation17_spill] sm:$0xff] }
 0x3e8   :  { %v1620_v22 = vadd.f32 1.0, %v3328_v49  ;;  %v1637_v6 = vadd.f32 %v1636_v60, %v1548_v40  ;;  %v1592_v9 = vsub.f32 1.0, %v1587_v42  ;;  %v1594_v60 = vmul.f32 %v1587_v42, %v4355_v35  ;;  %v4874_v42 = vld [vmem:[#allocation20_spill] sm:$0xff] }
 0x3ea   :  { %3329 = vrcp.f32 %v1620_v22  ;;  %v1632_v48 = vand.u32 2147483648, %v1620_v22  ;;  %v1630_v49 = vand.u32 2147483647, %v1620_v22  ;;  %vm1626_vm15 = vweird.f32 %v1620_v22 }
 0x3eb   :  { %3331 = vtanh.f32 %v1590_v50 }
 0x3ec   :  { %3333 = vtanh.f32 %v1637_v6  ;;  %v1633_v52 = vor.u32 1.1754944e-38, %v1632_v48  ;;  %vm1631_vm3 = vcmp.eq.f32.partialorder %v1630_v49, 8.507059e+37  ;;  %v4872_v6 = vld [vmem:[#allocation18_spill] sm:$0xff]  ;;  %v4875_v48 = vld [vmem:[#allocation21_spill] sm:$0xff]  ;;  %v4877_v49 = vld [vmem:[#allocation23_spill] sm:$0xff] }
 0x3f0   :  { %v3330_v33 = vpop.eup %3329 }
 0x3f1   :  { %v1622_v20 = vmul.f32 %v3330_v33, %v1620_v22  ;;  %vm1627_vm14 = vweird.f32 %v3330_v33  ;;  %v3332_v38 = vpop.eup %3331 }
 0x3f2   :  { %vm1628_vm2 = vmor %vm1626_vm15, %vm1627_vm14  ;;  %v1593_v11 = vmul.f32 %v3332_v38, %v1592_v9  ;;  %v3334_v50 = vpop.eup %3333  ;;  %v4878_v38 = vld [vmem:[#allocation24_spill] sm:$0xff]  ;;  %v4879_v9 = vld [vmem:[#allocation25_spill] sm:$0xff] }
 0x3f3   :  { %v1623_v29 = vsub.f32 1.0, %v1622_v20  ;;  %v4870_v20 = vld [vmem:[#allocation16_spill] sm:$0xff] }
 0x3f4   :  { %v1595_v32 = vadd.f32 %v1594_v60, %v1593_v11 }
 0x3f5   :  { %v1624_v4 = vmul.f32 %v3330_v33, %v1623_v29  ;;  %v4873_v29 = vld [vmem:[#allocation19_spill] sm:$0xff] }
 0x3f6   :  { %v4440_v39 = vsel %vm1643_vm6, %v1595_v32, %v4355_v35  ;;  %v4867_v35 = vld [vmem:[#allocation12_spill] sm:$0xff] }
 0x3f7   :  { %v1625_v3 = vadd.f32 %v3330_v33, %v1624_v4  ;;  %v4876_v4 = vld [vmem:[#allocation22_spill] sm:$0xff]  ;;  %v4882_v32 = vld [vmem:[#allocation28_spill] sm:$0xff] }
 0x3f9   :  { %v1629_v1 = vsel %vm1628_vm2, %v3330_v33, %v1625_v3  ;;  %v4880_v3 = vld [vmem:[#allocation26_spill] sm:$0xff] }
 0x3fa   :  { %v1634_v63 = vsel %vm1631_vm3, %v1633_v52, %v1629_v1  ;;  %v1732_v52 = vld [vmem:[#allocation2 + $0x60] sm:$0xff] }
 0x3fb   :  { %v1639_v26 = vsub.f32 1.0, %v1634_v63  ;;  %v1641_v47 = vmul.f32 %v1634_v63, %v4360_v12  ;;  %v1734_v11 = vunpack.c.l.bf16 %v1732_v52  ;;  %v1735_v1 = vunpack.c.h.bf16 %v1732_v52 }
 0x3fd   :  { %v1640_v25 = vmul.f32 %v3334_v50, %v1639_v26  ;;  %v4881_v26 = vld [vmem:[#allocation27_spill] sm:$0xff] }
 0x3ff   :  { %v1642_v40 = vadd.f32 %v1641_v47, %v1640_v25 }
 0x401   :  { %v4435_v22 = vsel %vm1645_vm7, %v1642_v40, %v4360_v12  ;;  %v4868_v12 = vld [vmem:[#allocation14_spill] sm:$0xff] }
 0x402   :  { %v1647_v33 = vpack.c.bf16 %v4435_v22, %v4440_v39 }
 0x404   :  { %1656 = vmatmul.bf16.vlgmr.msra.gmra.mxu0 %v1647_v33  ;;  %1669 = vmatmul.bf16.vlgmr.msra.gmra.mxu1 %v1647_v33 }
 0x405   :  { %1682 = vmatmul.bf16.vlgmr.msra.gmra.mxu2 %v1647_v33  ;;  %1695 = vmatmul.bf16.vlgmr.msra.gmra.mxu3 %v1647_v33 }
 0x406   :  { %1865 = vmatpush.bf16.msra.mxu0 %v3740_v62  ;;  %1878 = vmatpush.bf16.msra.mxu1 %v3640_v28 }
 0x407   :  { %1891 = vmatpush.bf16.msra.mxu2 %v3890_v58  ;;  %1904 = vmatpush.bf16.msra.mxu3 %v3918_v7 }
 0x40a   :  { %1866 = vmatpush.bf16.msra.mxu0 %v3770_v8  ;;  %1879 = vmatpush.bf16.msra.mxu1 %v3658_v34 }
 0x40b   :  { %1892 = vmatpush.bf16.msra.mxu2 %v3926_v10  ;;  %1905 = vmatpush.bf16.msra.mxu3 %v3950_v21 }
 0x40e   :  { %1867 = vmatpush.bf16.msra.mxu0 %v3800_v18  ;;  %1880 = vmatpush.bf16.msra.mxu1 %v3693_v46 }
 0x40f   :  { %1893 = vmatpush.bf16.msra.mxu2 %v3956_v23  ;;  %1906 = vmatpush.bf16.msra.mxu3 %v3982_v41 }
 0x412   :  { %1868 = vmatpush.bf16.msra.mxu0 %v3839_v36  ;;  %1881 = vmatpush.bf16.msra.mxu1 %v3723_v56 }
 0x413   :  { %1894 = vmatpush.bf16.msra.mxu2 %v3985_v44  ;;  %1907 = vmatpush.bf16.msra.mxu3 %v4004_v61 }
 0x414   :  { %1708 = vmatmul.bf16.vlgmr.msrb.gmra.mxu0 %v1647_v33  ;;  %1721 = vmatmul.bf16.vlgmr.msrb.gmra.mxu1 %v1647_v33 }
 0x416   :  { %1869 = vmatpush.bf16.msra.mxu0 %v3885_v55  ;;  %1882 = vmatpush.bf16.msra.mxu1 %v3762_v5 }
 0x417   :  { %1895 = vmatpush.bf16.msra.mxu2 %v4007_v0  ;;  %1908 = vmatpush.bf16.msra.mxu3 %v4025_v13 }
 0x41a   :  { %1870 = vmatpush.bf16.msra.mxu0 %v3934_v15  ;;  %1883 = vmatpush.bf16.msra.mxu1 %v3803_v19 }
 0x41b   :  { %1896 = vmatpush.bf16.msra.mxu2 %v4029_v16  ;;  %1909 = vmatpush.bf16.msra.mxu3 %v4046_v27 }
 0x41e   :  { %1871 = vmatpush.bf16.msra.mxu0 %v3968_v31  ;;  %1884 = vmatpush.bf16.msra.mxu1 %v3842_v37 }
 0x41f   :  { %1897 = vmatpush.bf16.msra.mxu2 %v4049_v30  ;;  %1910 = vmatpush.bf16.msra.mxu3 %v4066_v45 }
 0x422   :  { %1872 = vmatpush.bf16.msra.mxu0 %v3994_v54  ;;  %1885 = vmatpush.bf16.msra.mxu1 %v3888_v57 }
 0x423   :  { %1898 = vmatpush.bf16.msra.mxu2 %v4069_v53  ;;  %1911 = vmatpush.bf16.msra.mxu3 %v4080_v2 }
 0x426   :  { %2030 = vmatpush.bf16.msrb.mxu0 %v3629_v24  ;;  %2043 = vmatpush.bf16.msrb.mxu1 %v4847_v43 }
 0x42a   :  { %2031 = vmatpush.bf16.msrb.mxu0 %v4867_v35  ;;  %2044 = vmatpush.bf16.msrb.mxu1 %v4868_v12 }
 0x42e   :  { %2032 = vmatpush.bf16.msrb.mxu0 %v4869_v51  ;;  %2045 = vmatpush.bf16.msrb.mxu1 %v4870_v20 }
 0x432   :  { %2033 = vmatpush.bf16.msrb.mxu0 %v4871_v17  ;;  %2046 = vmatpush.bf16.msrb.mxu1 %v4872_v6 }
 0x436   :  { %2034 = vmatpush.bf16.msrb.mxu0 %v4873_v29  ;;  %2047 = vmatpush.bf16.msrb.mxu1 %v4874_v42  ;;  %v1737_v42 = vld [vmem:[#allocation2 + $0x54] sm:$0xff] }
 0x43a   :  { %2035 = vmatpush.bf16.msrb.mxu0 %v4875_v48  ;;  %2048 = vmatpush.bf16.msrb.mxu1 %v4876_v4 }
 0x43e   :  { %2036 = vmatpush.bf16.msrb.mxu0 %v4877_v49  ;;  %2049 = vmatpush.bf16.msrb.mxu1 %v4878_v38 }
 0x442   :  { %2037 = vmatpush.bf16.msrb.mxu0 %v4879_v9  ;;  %2050 = vmatpush.bf16.msrb.mxu1 %v4880_v3 }
 0x481   :  { %v1657_v63 = vpop.f32.mrf.mxu0  ;;  %v1670_v60 = vpop.f32.mrf.mxu1 }
 0x482   :  { %v1726_v50 = vadd.f32 %v1657_v63, %v4881_v26  ;;  %v1727_v25 = vadd.f32 %v1670_v60, %v4882_v32  ;;  %v1739_v63 = vunpack.c.l.bf16 %v1737_v42 }
 0x484   :  { %v1742_v47 = vadd.f32 %v1734_v11, %v1726_v50  ;;  %v1762_v40 = vadd.f32 %v1735_v1, %v1727_v25  ;;  %v4883_v11 = vld [vmem:[#allocation29_spill] sm:$0xff] }
 0x486   :  { %v3025_v33 = vmul.f32 -1.442695, %v1742_v47  ;;  %v3026_v4 = vmul.f32 -1.442695, %v1762_v40  ;;  %v4884_v40 = vld [vmem:[#allocation30_spill] sm:$0xff] }
 0x488   :  { %3335 = vpow2.f32 %v3025_v33  ;;  %v1683_v49 = vpop.f32.mrf.mxu2  ;;  %v1696_v38 = vpop.f32.mrf.mxu3 }
 0x489   :  { %v1659_v48 = vpop.f32.mrf.mxu0  ;;  %v1672_v9 = vpop.f32.mrf.mxu1  ;;  %3337 = vpow2.f32 %v3026_v4  ;;  %v1740_v4 = vunpack.c.h.bf16 %v1737_v42 }
 0x48e   :  { %v3336_v3 = vpop.eup %3335 }
 0x48f   :  { %v1746_v29 = vadd.f32 1.0, %v3336_v3  ;;  %v3338_v17 = vpop.eup %3337 }
 0x490   :  { %v1685_v52 = vpop.f32.mrf.mxu2  ;;  %v1697_v6 = vpop.f32.mrf.mxu3  ;;  %v4495_v50 = vadd.f32 1.0, %v3338_v17 }
 0x491   :  { %3339 = vrcp.f32 %v1746_v29  ;;  %v1709_v26 = vpop.f32.mrf.mxu0  ;;  %v1722_v60 = vpop.f32.mrf.mxu1  ;;  %v1729_v1 = vadd.f32 %v1697_v6, %v4883_v11  ;;  %vm1752_vm9 = vweird.f32 %v1746_v29 }
 0x492   :  { %3341 = vrcp.f32 %v4495_v50  ;;  %vm1772_vm2 = vweird.f32 %v4495_v50 }
 0x493   :  { %v1789_v25 = vadd.f32 %v1739_v63, %v1729_v1  ;;  %v1758_v63 = vand.u32 2147483648, %v1746_v29 }
 0x495   :  { %v3027_v38 = vmul.f32 -1.442695, %v1789_v25  ;;  %v1756_v25 = vand.u32 2147483647, %v1746_v29 }
 0x497   :  { %v3340_v47 = vpop.eup %3339  ;;  %3343 = vpow2.f32 %v3027_v38  ;;  %vm1757_vm13 = vcmp.eq.f32.partialorder %v1756_v25, 8.507059e+37 }
 0x498   :  { %v1748_v48 = vmul.f32 %v3340_v47, %v1746_v29  ;;  %v4499_v26 = vpop.eup %3341  ;;  %vm1753_vm8 = vweird.f32 %v3340_v47 }
 0x499   :  { %v1710_v9 = vpop.f32.mrf.mxu0  ;;  %v1768_v42 = vmul.f32 %v4499_v26, %v4495_v50  ;;  %vm1754_vm12 = vmor %vm1752_vm9, %vm1753_vm8  ;;  %vm1773_vm15 = vweird.f32 %v4499_v26 }
 0x49a   :  { %v1749_v3 = vsub.f32 1.0, %v1748_v48  ;;  %v1730_v33 = vadd.f32 %v1710_v9, %v4884_v40  ;;  %v1759_v48 = vor.u32 1.1754944e-38, %v1758_v63  ;;  %vm4510_vm9 = vmor %vm1772_vm2, %vm1773_vm15 }
 0x49b   :  { %v1769_v9 = vsub.f32 1.0, %v1768_v42 }
 0x49c   :  { %v1750_v52 = vmul.f32 %v3340_v47, %v1749_v3  ;;  %v1809_v32 = vadd.f32 %v1740_v4, %v1730_v33  ;;  %v1733_v3 = vld [vmem:[#allocation2 + $0x68] sm:$0xf]  ;;  %v4885_v33 = vld [vmem:[#allocation31_spill] sm:$0xff] }
 0x49d   :  { %v3344_v6 = vpop.eup %3343  ;;  %v1770_v20 = vmul.f32 %v4499_v26, %v1769_v9 }
 0x49e   :  { %v3028_v60 = vmul.f32 -1.442695, %v1809_v32  ;;  %v1751_v17 = vadd.f32 %v3340_v47, %v1750_v52  ;;  %v1793_v1 = vadd.f32 1.0, %v3344_v6  ;;  %v1728_v52 = vadd.f32 %v1683_v49, %v4885_v33  ;;  %v1723_v49 = vpop.f32.mrf.mxu1 }
 0x49f   :  { %v1736_v6 = vunpack.c.l.bf16 %v1733_v3  ;;  %v1771_v25 = vadd.f32 %v4499_v26, %v1770_v20  ;;  %v1731_v20 = vadd.f32 %v1723_v49, %v4825_v14 }
 0x4a0   :  { %3345 = vpow2.f32 %v3028_v60  ;;  %v1755_v38 = vsel %vm1754_vm12, %v3340_v47, %v1751_v17  ;;  %v1805_v12 = vand.u32 2147483648, %v1793_v1  ;;  %v1738_v47 = vld [vmem:[#allocation2 + $0x5c] sm:$0xf]  ;;  %v1803_v63 = vand.u32 2147483647, %v1793_v1 }
 0x4a1   :  { %3347 = vrcp.f32 %v1793_v1  ;;  %v1760_v32 = vsel %vm1757_vm13, %v1759_v48, %v1755_v38  ;;  %v1778_v38 = vand.u32 2147483648, %v4495_v50  ;;  %vm1799_vm3 = vweird.f32 %v1793_v1 }
 0x4a2   :  { %v1782_v60 = vmul.f32 %v1760_v32, %v1728_v52  ;;  %v1741_v3 = vunpack.c.l.bf16 %v1738_v47  ;;  %vm1804_vm12 = vcmp.eq.f32.partialorder %v1803_v63, 8.507059e+37 }
 0x4a4   :  { %v1783_v35 = vadd.f32 %v1782_v60, %v1736_v6  ;;  %v1775_v6 = vsel %vm4510_vm9, %v4499_v26, %v1771_v25 }
 0x4a6   :  { %v3346_v4 = vpop.eup %3345 }
 0x4a7   :  { %v1813_v40 = vadd.f32 1.0, %v3346_v4  ;;  %v3348_v11 = vpop.eup %3347  ;;  %v1776_v4 = vand.u32 2147483647, %v4495_v50  ;;  %v1779_v50 = vor.u32 1.1754944e-38, %v1778_v38 }
 0x4a8   :  { %v1795_v29 = vmul.f32 %v3348_v11, %v1793_v1  ;;  %vm1800_vm14 = vweird.f32 %v3348_v11 }
 0x4a9   :  { %3349 = vrcp.f32 %v1813_v40  ;;  %vm1801_vm8 = vmor %vm1799_vm3, %vm1800_vm14  ;;  %vm1777_vm13 = vcmp.eq.f32.partialorder %v1776_v4, 8.507059e+37  ;;  %vm1819_vm15 = vweird.f32 %v1813_v40 }
 0x4aa   :  { %v1796_v51 = vsub.f32 1.0, %v1795_v29  ;;  %3351 = vtanh.f32 %v1783_v35  ;;  %v1825_v29 = vand.u32 2147483648, %v1813_v40  ;;  %v1780_v33 = vsel %vm1777_vm13, %v1779_v50, %v1775_v6  ;;  %v4892_v6 = vld [vmem:[#allocation16_spill] sm:$0xff]  ;;  %v4895_v50 = vld [vmem:[#allocation19_spill] sm:$0xff] }
 0x4ab   :  { %v1785_v63 = vsub.f32 1.0, %v1780_v33 }
 0x4ac   :  { %v1797_v17 = vmul.f32 %v3348_v11, %v1796_v51  ;;  %v1806_v51 = vor.u32 1.1754944e-38, %v1805_v12 }
 0x4ae   :  { %v1798_v48 = vadd.f32 %v3348_v11, %v1797_v17  ;;  %v1823_v17 = vand.u32 2147483647, %v1813_v40 }
 0x4af   :  { %v3350_v42 = vpop.eup %3349 }
 0x4b0   :  { %v1815_v9 = vmul.f32 %v3350_v42, %v1813_v40  ;;  %v1802_v52 = vsel %vm1801_vm8, %v3348_v11, %v1798_v48  ;;  %vm1820_vm14 = vweird.f32 %v3350_v42  ;;  %v3352_v49 = vpop.eup %3351  ;;  %v1826_v11 = vor.u32 1.1754944e-38, %v1825_v29  ;;  %v4896_v29 = vld [vmem:[#allocation20_spill] sm:$0xff] }
 0x4b1   :  { %v1807_v60 = vsel %vm1804_vm12, %v1806_v51, %v1802_v52  ;;  %vm1821_vm2 = vmor %vm1819_vm15, %vm1820_vm14  ;;  %vm1824_vm3 = vcmp.eq.f32.partialorder %v1823_v17, 8.507059e+37  ;;  %v1786_v25 = vmul.f32 %v3352_v49, %v1785_v63  ;;  %v4891_v52 = vld [vmem:[#allocation15_spill] sm:$0xff]  ;;  %v4900_v17 = vld [vmem:[#allocation24_spill] sm:$0xff] }
 0x4b2   :  { %v1816_v1 = vsub.f32 1.0, %v1815_v9  ;;  %v1829_v47 = vmul.f32 %v1807_v60, %v1731_v20  ;;  %v1787_v9 = vmul.f32 %v1780_v33, %v4440_v39  ;;  %v4890_v33 = vld [vmem:[#allocation14_spill] sm:$0xff] }
 0x4b3   :  { %v4894_v60 = vld [vmem:[#allocation18_spill] sm:$0xff] }
 0x4b4   :  { %v1817_v12 = vmul.f32 %v3350_v42, %v1816_v1  ;;  %v1830_v43 = vadd.f32 %v1829_v47, %v1741_v3  ;;  %v1788_v51 = vadd.f32 %v1787_v9, %v1786_v25  ;;  %v4893_v1 = vld [vmem:[#allocation17_spill] sm:$0xff]  ;;  %v4902_v49 = vld [vmem:[#allocation26_spill] sm:$0xff] }
 0x4b5   :  { %v4897_v47 = vld [vmem:[#allocation21_spill] sm:$0xff] }
 0x4b6   :  { %v1818_v35 = vadd.f32 %v3350_v42, %v1817_v12  ;;  %3353 = vtanh.f32 %v1830_v43  ;;  %v4523_v40 = vsel %vm1645_vm7, %v1788_v51, %v4440_v39  ;;  %v4889_v39 = vld [vmem:[#allocation12_spill] sm:$0xff]  ;;  %v4899_v12 = vld [vmem:[#allocation23_spill] sm:$0xff] }
 0x4b7   :  { %v4903_v51 = vld [vmem:[#allocation27_spill] sm:$0xff] }
 0x4b8   :  { %v1822_v48 = vsel %vm1821_vm2, %v3350_v42, %v1818_v35  ;;  %v4901_v35 = vld [vmem:[#allocation25_spill] sm:$0xff] }
 0x4b9   :  { %v1827_v26 = vsel %vm1824_vm3, %v1826_v11, %v1822_v48  ;;  %v1923_v48 = vld [vmem:[#allocation2 + $0x78] sm:$0xff] }
 0x4ba   :  { %v1832_v38 = vsub.f32 1.0, %v1827_v26  ;;  %v1834_v20 = vmul.f32 %v1827_v26, %v4435_v22  ;;  %v1925_v26 = vunpack.c.l.bf16 %v1923_v48  ;;  %v1926_v25 = vunpack.c.h.bf16 %v1923_v48 }
 0x4bc   :  { %v3354_v4 = vpop.eup %3353 }
 0x4bd   :  { %v1833_v32 = vmul.f32 %v3354_v4, %v1832_v38  ;;  %v1928_v38 = vld [vmem:[#allocation2 + $0x3c] sm:$0xff] }
 0x4bf   :  { %v1835_v3 = vadd.f32 %v1834_v20, %v1833_v32  ;;  %v4904_v20 = vld [vmem:[#allocation28_spill] sm:$0xff] }
 0x4c1   :  { %v4528_v43 = vsel %vm1643_vm6, %v1835_v3, %v4435_v22  ;;  %v4888_v22 = vld [vmem:[#allocation13_spill] sm:$0xff] }
 0x4c2   :  { %v1838_v42 = vpack.c.bf16 %v4528_v43, %v4523_v40 }
 0x4c4   :  { %1847 = vmatmul.bf16.vlgmr.msrb.gmra.mxu2 %v1838_v42  ;;  %1860 = vmatmul.bf16.vlgmr.msrb.gmra.mxu3 %v1838_v42 }
 0x4c5   :  { %1873 = vmatmul.bf16.vlgmr.msra.gmra.mxu0 %v1838_v42  ;;  %1886 = vmatmul.bf16.vlgmr.msra.gmra.mxu1 %v1838_v42 }
 0x4c6   :  { %2056 = vmatpush.bf16.msrb.mxu2 %v3740_v62  ;;  %2069 = vmatpush.bf16.msrb.mxu3 %v3640_v28 }
 0x4c7   :  { %2082 = vmatpush.bf16.msra.mxu0 %v3890_v58  ;;  %2095 = vmatpush.bf16.msra.mxu1 %v3918_v7 }
 0x4ca   :  { %2057 = vmatpush.bf16.msrb.mxu2 %v3770_v8  ;;  %2070 = vmatpush.bf16.msrb.mxu3 %v3658_v34 }
 0x4cb   :  { %2083 = vmatpush.bf16.msra.mxu0 %v3926_v10  ;;  %2096 = vmatpush.bf16.msra.mxu1 %v3950_v21 }
 0x4ce   :  { %2058 = vmatpush.bf16.msrb.mxu2 %v3800_v18  ;;  %2071 = vmatpush.bf16.msrb.mxu3 %v3693_v46 }
 0x4cf   :  { %2084 = vmatpush.bf16.msra.mxu0 %v3956_v23  ;;  %2097 = vmatpush.bf16.msra.mxu1 %v3982_v41 }
 0x4d2   :  { %2059 = vmatpush.bf16.msrb.mxu2 %v3839_v36  ;;  %2072 = vmatpush.bf16.msrb.mxu3 %v3723_v56 }
 0x4d3   :  { %2085 = vmatpush.bf16.msra.mxu0 %v3985_v44  ;;  %2098 = vmatpush.bf16.msra.mxu1 %v4004_v61 }
 0x4d4   :  { %1899 = vmatmul.bf16.vlgmr.msra.gmra.mxu2 %v1838_v42  ;;  %1912 = vmatmul.bf16.vlgmr.msra.gmra.mxu3 %v1838_v42  ;;  %v1930_v42 = vunpack.c.l.bf16 %v1928_v38 }
 0x4d6   :  { %2060 = vmatpush.bf16.msrb.mxu2 %v3885_v55  ;;  %2073 = vmatpush.bf16.msrb.mxu3 %v3762_v5 }
 0x4d7   :  { %2086 = vmatpush.bf16.msra.mxu0 %v4007_v0  ;;  %2099 = vmatpush.bf16.msra.mxu1 %v4025_v13 }
 0x4da   :  { %2061 = vmatpush.bf16.msrb.mxu2 %v3934_v15  ;;  %2074 = vmatpush.bf16.msrb.mxu3 %v3803_v19 }
 0x4db   :  { %2087 = vmatpush.bf16.msra.mxu0 %v4029_v16  ;;  %2100 = vmatpush.bf16.msra.mxu1 %v4046_v27 }
 0x4de   :  { %2062 = vmatpush.bf16.msrb.mxu2 %v3968_v31  ;;  %2075 = vmatpush.bf16.msrb.mxu3 %v3842_v37 }
 0x4df   :  { %2088 = vmatpush.bf16.msra.mxu0 %v4049_v30  ;;  %2101 = vmatpush.bf16.msra.mxu1 %v4066_v45 }
 0x4e2   :  { %2063 = vmatpush.bf16.msrb.mxu2 %v3994_v54  ;;  %2076 = vmatpush.bf16.msrb.mxu3 %v3888_v57 }
 0x4e3   :  { %2089 = vmatpush.bf16.msra.mxu0 %v4069_v53  ;;  %2102 = vmatpush.bf16.msra.mxu1 %v4080_v2 }
 0x4e6   :  { %2221 = vmatpush.bf16.msra.mxu2 %v3629_v24  ;;  %2234 = vmatpush.bf16.msra.mxu3 %v4888_v22  ;;  %v4898_v24 = vld [vmem:[#allocation22_spill] sm:$0xff] }
 0x4ea   :  { %2222 = vmatpush.bf16.msra.mxu2 %v4889_v39  ;;  %2235 = vmatpush.bf16.msra.mxu3 %v4890_v33 }
 0x4ee   :  { %2223 = vmatpush.bf16.msra.mxu2 %v4891_v52  ;;  %2236 = vmatpush.bf16.msra.mxu3 %v4892_v6  ;;  %v4905_v6 = vld [vmem:[#allocation29_spill] sm:$0xff] }
 0x4f2   :  { %2224 = vmatpush.bf16.msra.mxu2 %v4893_v1  ;;  %2237 = vmatpush.bf16.msra.mxu3 %v4894_v60 }
 0x4f6   :  { %2225 = vmatpush.bf16.msra.mxu2 %v4895_v50  ;;  %2238 = vmatpush.bf16.msra.mxu3 %v4896_v29 }
 0x4fa   :  { %2226 = vmatpush.bf16.msra.mxu2 %v4897_v47  ;;  %2239 = vmatpush.bf16.msra.mxu3 %v4898_v24 }
 0x4fe   :  { %2227 = vmatpush.bf16.msra.mxu2 %v4899_v12  ;;  %2240 = vmatpush.bf16.msra.mxu3 %v4900_v17 }
 0x502   :  { %2228 = vmatpush.bf16.msra.mxu2 %v4901_v35  ;;  %2241 = vmatpush.bf16.msra.mxu3 %v4902_v49 }
 0x542   :  { %v4580_v11 = vpop.f32.mrf.mxu0  ;;  %v1887_v63 = vpop.f32.mrf.mxu1 }
 0x547   :  { %v1848_v9 = vpop.f32.mrf.mxu2  ;;  %v1861_v4 = vpop.f32.mrf.mxu3 }
 0x548   :  { %v1917_v32 = vadd.f32 %v1848_v9, %v4903_v51  ;;  %v1918_v3 = vadd.f32 %v1861_v4, %v4904_v20 }
 0x54a   :  { %v1933_v22 = vadd.f32 %v1925_v26, %v1917_v32  ;;  %v1953_v39 = vadd.f32 %v1926_v25, %v1918_v3  ;;  %v1876_v33 = vpop.f32.mrf.mxu0  ;;  %v1888_v52 = vpop.f32.mrf.mxu1  ;;  %v1931_v3 = vunpack.c.h.bf16 %v1928_v38 }
 0x54b   :  { %v1920_v1 = vadd.f32 %v1888_v52, %v4905_v6 }
 0x54c   :  { %v3029_v60 = vmul.f32 -1.442695, %v1933_v22  ;;  %v3030_v50 = vmul.f32 -1.442695, %v1953_v39  ;;  %v4906_v39 = vld [vmem:[#allocation30_spill] sm:$0xff] }
 0x54d   :  { %v1980_v29 = vadd.f32 %v1930_v42, %v1920_v1 }
 0x54e   :  { %3355 = vpow2.f32 %v3029_v60 }
 0x54f   :  { %v3031_v47 = vmul.f32 -1.442695, %v1980_v29  ;;  %v1850_v24 = vpop.f32.mrf.mxu2  ;;  %v1863_v12 = vpop.f32.mrf.mxu3  ;;  %3357 = vpow2.f32 %v3030_v50 }
 0x551   :  { %3359 = vpow2.f32 %v3031_v47 }
 0x554   :  { %v3356_v17 = vpop.eup %3355 }
 0x555   :  { %v1937_v35 = vadd.f32 1.0, %v3356_v17  ;;  %v3358_v49 = vpop.eup %3357 }
 0x556   :  { %v4585_v25 = vadd.f32 1.0, %v3358_v49 }
 0x557   :  { %v3360_v63 = vpop.eup %3359  ;;  %3361 = vrcp.f32 %v1937_v35  ;;  %v1900_v48 = vpop.f32.mrf.mxu2  ;;  %v1949_v24 = vand.u32 2147483648, %v1937_v35  ;;  %vm1943_vm7 = vweird.f32 %v1937_v35  ;;  %v1947_v49 = vand.u32 2147483647, %v1937_v35 }
 0x558   :  { %v1913_v26 = vpop.f32.mrf.mxu3  ;;  %v1984_v9 = vadd.f32 1.0, %v3360_v63  ;;  %vm1963_vm3 = vweird.f32 %v4585_v25 }
 0x559   :  { %v1950_v26 = vor.u32 1.1754944e-38, %v1949_v24  ;;  %vm1948_vm9 = vcmp.eq.f32.partialorder %v1947_v49, 8.507059e+37  ;;  %v1929_v49 = vld [vmem:[#allocation2 + $0x44] sm:$0xf] }
 0x55a   :  { %3363 = vrcp.f32 %v1984_v9  ;;  %vm1990_vm13 = vweird.f32 %v1984_v9 }
 0x55b   :  { %3365 = vrcp.f32 %v4585_v25 }
 0x55d   :  { %v3362_v4 = vpop.eup %3361 }
 0x55e   :  { %v1939_v32 = vmul.f32 %v3362_v4, %v1937_v35  ;;  %vm1944_vm6 = vweird.f32 %v3362_v4 }
 0x55f   :  { %v1901_v42 = vpop.f32.mrf.mxu2  ;;  %vm1945_vm8 = vmor %vm1943_vm7, %vm1944_vm6 }
 0x560   :  { %v1940_v22 = vsub.f32 1.0, %v1939_v32  ;;  %v1921_v33 = vadd.f32 %v1901_v42, %v4906_v39  ;;  %v3364_v52 = vpop.eup %3363 }
 0x561   :  { %v1986_v50 = vmul.f32 %v3364_v52, %v1984_v9  ;;  %v3366_v29 = vpop.eup %3365  ;;  %vm1991_vm12 = vweird.f32 %v3364_v52 }
 0x562   :  { %v1941_v1 = vmul.f32 %v3362_v4, %v1940_v22  ;;  %v2000_v60 = vadd.f32 %v1931_v3, %v1921_v33  ;;  %v1959_v63 = vmul.f32 %v3366_v29, %v4585_v25  ;;  %v1924_v3 = vld [vmem:[#allocation2 + $0x80] sm:$0xf]  ;;  %v1996_v33 = vand.u32 2147483648, %v1984_v9  ;;  %vm1992_vm14 = vmor %vm1990_vm13, %vm1991_vm12 }
 0x563   :  { %v1987_v17 = vsub.f32 1.0, %v1986_v50  ;;  %v1994_v50 = vand.u32 2147483647, %v1984_v9  ;;  %v1927_v39 = vunpack.c.l.bf16 %v1924_v3  ;;  %vm1964_vm2 = vweird.f32 %v3366_v29 }
 0x564   :  { %v1942_v47 = vadd.f32 %v3362_v4, %v1941_v1  ;;  %v3032_v12 = vmul.f32 -1.442695, %v2000_v60  ;;  %v1960_v22 = vsub.f32 1.0, %v1959_v63  ;;  %v4907_v1 = vld [vmem:[#allocation31_spill] sm:$0xff]  ;;  %v1997_v24 = vor.u32 1.1754944e-38, %v1996_v33  ;;  %vm1965_vm6 = vmor %vm1963_vm3, %vm1964_vm2 }
 0x565   :  { %v1988_v38 = vmul.f32 %v3364_v52, %v1987_v17  ;;  %v1919_v60 = vadd.f32 %v4580_v11, %v4907_v1  ;;  %vm1995_vm15 = vcmp.eq.f32.partialorder %v1994_v50, 8.507059e+37  ;;  %v1969_v11 = vand.u32 2147483648, %v4585_v25 }
 0x566   :  { %3367 = vpow2.f32 %v3032_v12  ;;  %v1946_v48 = vsel %vm1945_vm8, %v3362_v4, %v1942_v47  ;;  %v1961_v4 = vmul.f32 %v3366_v29, %v1960_v22  ;;  %v1914_v47 = vpop.f32.mrf.mxu3  ;;  %v1932_v9 = vunpack.c.l.bf16 %v1929_v49 }
 0x567   :  { %v1989_v32 = vadd.f32 %v3364_v52, %v1988_v38  ;;  %v1951_v42 = vsel %vm1948_vm9, %v1950_v26, %v1946_v48  ;;  %v1922_v48 = vadd.f32 %v1914_v47, %v4825_v14  ;;  %v1970_v22 = vor.u32 1.1754944e-38, %v1969_v11 }
 0x568   :  { %v1973_v6 = vmul.f32 %v1951_v42, %v1919_v60  ;;  %v1962_v26 = vadd.f32 %v3366_v29, %v1961_v4 }
 0x569   :  { %v1993_v17 = vsel %vm1992_vm14, %v3364_v52, %v1989_v32  ;;  %v1967_v52 = vand.u32 2147483647, %v4585_v25 }
 0x56a   :  { %v1998_v38 = vsel %vm1995_vm15, %v1997_v24, %v1993_v17  ;;  %v1974_v63 = vadd.f32 %v1973_v6, %v1927_v39  ;;  %v1966_v3 = vsel %vm1965_vm6, %v3366_v29, %v1962_v26 }
 0x56b   :  { %v2020_v1 = vmul.f32 %v1998_v38, %v1922_v48  ;;  %vm1968_vm7 = vcmp.eq.f32.partialorder %v1967_v52, 8.507059e+37 }
 0x56c   :  { %v3368_v35 = vpop.eup %3367  ;;  %v1971_v39 = vsel %vm1968_vm7, %v1970_v22, %v1966_v3  ;;  %v4909_v3 = vld [vmem:[#allocation30_spill] sm:$0xff] }
 0x56d   :  { %v2004_v12 = vadd.f32 1.0, %v3368_v35  ;;  %v2021_v33 = vadd.f32 %v2020_v1, %v1932_v9  ;;  %v1976_v4 = vsub.f32 1.0, %v1971_v39  ;;  %v1978_v1 = vmul.f32 %v1971_v39, %v4523_v40 }
 0x56f   :  { %3369 = vrcp.f32 %v2004_v12  ;;  %v2016_v60 = vand.u32 2147483648, %v2004_v12  ;;  %v2014_v35 = vand.u32 2147483647, %v2004_v12  ;;  %vm2010_vm9 = vweird.f32 %v2004_v12 }
 0x570   :  { %3371 = vtanh.f32 %v1974_v63 }
 0x571   :  { %3373 = vtanh.f32 %v2021_v33  ;;  %v2017_v25 = vor.u32 1.1754944e-38, %v2016_v60  ;;  %vm2015_vm13 = vcmp.eq.f32.partialorder %v2014_v35, 8.507059e+37 }
 0x575   :  { %v3370_v32 = vpop.eup %3369 }
 0x576   :  { %v2006_v42 = vmul.f32 %v3370_v32, %v2004_v12  ;;  %vm2011_vm8 = vweird.f32 %v3370_v32  ;;  %v3372_v17 = vpop.eup %3371 }
 0x577   :  { %vm2012_vm12 = vmor %vm2010_vm9, %vm2011_vm8  ;;  %v1977_v24 = vmul.f32 %v3372_v17, %v1976_v4  ;;  %v3374_v63 = vpop.eup %3373 }
 0x578   :  { %v2007_v6 = vsub.f32 1.0, %v2006_v42 }
 0x579   :  { %v1979_v48 = vadd.f32 %v1978_v1, %v1977_v24  ;;  %v2115_v1 = vld [vmem:[#allocation2 + $0x98] sm:$0xf] }
 0x57a   :  { %v2008_v50 = vmul.f32 %v3370_v32, %v2007_v6 }
 0x57b   :  { %v4606_v52 = vsel %vm1446_vm11, %v1979_v48, %v4523_v40 }
 0x57c   :  { %v2009_v47 = vadd.f32 %v3370_v32, %v2008_v50 }
 0x57e   :  { %v2013_v49 = vsel %vm2012_vm12, %v3370_v32, %v2009_v47 }
 0x57f   :  { %v2018_v29 = vsel %vm2015_vm13, %v2017_v25, %v2013_v49 }
 0x580   :  { %v2023_v38 = vsub.f32 1.0, %v2018_v29  ;;  %v2025_v11 = vmul.f32 %v2018_v29, %v4528_v43 }
 0x582   :  { %v2024_v26 = vmul.f32 %v3374_v63, %v2023_v38  ;;  %v4910_v63 = vld [vmem:[#allocation31_spill] sm:$0xff] }
 0x584   :  { %v2026_v9 = vadd.f32 %v2025_v11, %v2024_v26 }
 0x586   :  { %v4601_v12 = vsel %vm1444_vm10, %v2026_v9, %v4528_v43  ;;  %v2118_v9 = vunpack.c.l.bf16 %v2115_v1  ;;  %v3211_v1 = vld [vmem:[#allocation6 + $0x30] sm:$0xff] }
 0x587   :  { %v2029_v32 = vpack.c.bf16 %v4601_v12, %v4606_v52 }
 0x589   :  { %2038 = vmatmul.bf16.vlgmr.msrb.gmra.mxu0 %v2029_v32  ;;  %2051 = vmatmul.bf16.vlgmr.msrb.gmra.mxu1 %v2029_v32 }
 0x58a   :  { %2064 = vmatmul.bf16.vlgmr.msrb.gmra.mxu2 %v2029_v32  ;;  %2077 = vmatmul.bf16.vlgmr.msrb.gmra.mxu3 %v2029_v32 }
 0x58b   :  { %2247 = vmatpush.bf16.msrb.mxu0 %v3740_v62  ;;  %2260 = vmatpush.bf16.msrb.mxu1 %v3640_v28  ;;  %v2114_v28 = vld [vmem:[#allocation2 + $0x90] sm:$0xff] }
 0x58c   :  { %2273 = vmatpush.bf16.msrb.mxu2 %v3890_v58  ;;  %2286 = vmatpush.bf16.msrb.mxu3 %v3918_v7 }
 0x58f   :  { %2248 = vmatpush.bf16.msrb.mxu0 %v3770_v8  ;;  %2261 = vmatpush.bf16.msrb.mxu1 %v3658_v34  ;;  %v2116_v34 = vunpack.c.l.bf16 %v2114_v28 }
 0x590   :  { %2274 = vmatpush.bf16.msrb.mxu2 %v3926_v10  ;;  %2287 = vmatpush.bf16.msrb.mxu3 %v3950_v21 }
 0x593   :  { %2249 = vmatpush.bf16.msrb.mxu0 %v3800_v18  ;;  %2262 = vmatpush.bf16.msrb.mxu1 %v3693_v46  ;;  %v2117_v46 = vunpack.c.h.bf16 %v2114_v28 }
 0x594   :  { %2275 = vmatpush.bf16.msrb.mxu2 %v3956_v23  ;;  %2288 = vmatpush.bf16.msrb.mxu3 %v3982_v41 }
 0x597   :  { %2250 = vmatpush.bf16.msrb.mxu0 %v3839_v36  ;;  %2263 = vmatpush.bf16.msrb.mxu1 %v3723_v56 }
 0x598   :  { %2276 = vmatpush.bf16.msrb.mxu2 %v3985_v44  ;;  %2289 = vmatpush.bf16.msrb.mxu3 %v4004_v61 }
 0x599   :  { %2090 = vmatmul.bf16.vlgmr.msra.gmra.mxu0 %v2029_v32  ;;  %2103 = vmatmul.bf16.vlgmr.msra.gmra.mxu1 %v2029_v32 }
 0x59b   :  { %2251 = vmatpush.bf16.msrb.mxu0 %v3885_v55  ;;  %2264 = vmatpush.bf16.msrb.mxu1 %v3762_v5 }
 0x59c   :  { %2277 = vmatpush.bf16.msrb.mxu2 %v4007_v0  ;;  %2290 = vmatpush.bf16.msrb.mxu3 %v4025_v13  ;;  %v4908_v0 = vld [vmem:[#allocation29_spill] sm:$0xff] }
 0x59f   :  { %2252 = vmatpush.bf16.msrb.mxu0 %v3934_v15  ;;  %2265 = vmatpush.bf16.msrb.mxu1 %v3803_v19  ;;  %v2119_v15 = vld [vmem:[#allocation2 + $0x24] sm:$0xff] }
 0x5a0   :  { %2278 = vmatpush.bf16.msrb.mxu2 %v4029_v16  ;;  %2291 = vmatpush.bf16.msrb.mxu3 %v4046_v27  ;;  %v2121_v44 = vunpack.c.l.bf16 %v2119_v15 }
 0x5a3   :  { %2253 = vmatpush.bf16.msrb.mxu0 %v3968_v31  ;;  %2266 = vmatpush.bf16.msrb.mxu1 %v3842_v37 }
 0x5a4   :  { %2279 = vmatpush.bf16.msrb.mxu2 %v4049_v30  ;;  %2292 = vmatpush.bf16.msrb.mxu3 %v4066_v45 }
 0x5a7   :  { %2254 = vmatpush.bf16.msrb.mxu0 %v3994_v54  ;;  %2267 = vmatpush.bf16.msrb.mxu1 %v3888_v57 }
 0x5a8   :  { %2280 = vmatpush.bf16.msrb.mxu2 %v4069_v53  ;;  %2293 = vmatpush.bf16.msrb.mxu3 %v4080_v2  ;;  %v2122_v2 = vunpack.c.h.bf16 %v2119_v15 }
 0x606   :  { %v2039_v56 = vpop.f32.mrf.mxu0  ;;  %v2052_v62 = vpop.f32.mrf.mxu1 }
 0x607   :  { %v2108_v5 = vadd.f32 %v2039_v56, %v4903_v51  ;;  %v2109_v8 = vadd.f32 %v2052_v62, %v4904_v20 }
 0x609   :  { %v2124_v18 = vadd.f32 %v2116_v34, %v2108_v5  ;;  %v2144_v19 = vadd.f32 %v2117_v46, %v2109_v8  ;;  %v2120_v5 = vld [vmem:[#allocation2 + $0x2c] sm:$0xf] }
 0x60b   :  { %v3033_v36 = vmul.f32 -1.442695, %v2124_v18  ;;  %v3034_v37 = vmul.f32 -1.442695, %v2144_v19 }
 0x60d   :  { %3375 = vpow2.f32 %v3033_v36  ;;  %v2065_v55 = vpop.f32.mrf.mxu2  ;;  %v2078_v57 = vpop.f32.mrf.mxu3 }
 0x60e   :  { %v2041_v58 = vpop.f32.mrf.mxu0  ;;  %v2054_v7 = vpop.f32.mrf.mxu1  ;;  %3377 = vpow2.f32 %v3034_v37  ;;  %v2110_v48 = vadd.f32 %v2065_v55, %v4910_v63 }
 0x613   :  { %v3376_v10 = vpop.eup %3375 }
 0x614   :  { %v2128_v21 = vadd.f32 1.0, %v3376_v10  ;;  %v3378_v41 = vpop.eup %3377  ;;  %v2123_v10 = vunpack.c.l.bf16 %v2120_v5 }
 0x615   :  { %v2067_v23 = vpop.f32.mrf.mxu2  ;;  %v2079_v31 = vpop.f32.mrf.mxu3  ;;  %v4645_v16 = vadd.f32 1.0, %v3378_v41 }
 0x616   :  { %3379 = vrcp.f32 %v2128_v21  ;;  %v2091_v54 = vpop.f32.mrf.mxu0  ;;  %v2104_v61 = vpop.f32.mrf.mxu1  ;;  %v2111_v13 = vadd.f32 %v2079_v31, %v4908_v0  ;;  %v2140_v35 = vand.u32 2147483648, %v2128_v21  ;;  %vm2134_vm11 = vweird.f32 %v2128_v21 }
 0x617   :  { %3381 = vrcp.f32 %v4645_v16  ;;  %v2138_v4 = vand.u32 2147483647, %v2128_v21  ;;  %vm2154_vm6 = vweird.f32 %v4645_v16  ;;  %v2160_v55 = vand.u32 2147483648, %v4645_v16 }
 0x618   :  { %v2171_v27 = vadd.f32 %v2121_v44, %v2111_v13  ;;  %v2141_v24 = vor.u32 1.1754944e-38, %v2140_v35  ;;  %v2158_v58 = vand.u32 2147483647, %v4645_v16 }
 0x619   :  { %vm2139_vm15 = vcmp.eq.f32.partialorder %v2138_v4, 8.507059e+37  ;;  %v2161_v61 = vor.u32 1.1754944e-38, %v2160_v55  ;;  %v3208_v55 = vld [vmem:[#allocation6 + $0x18] sm:$0xff] }
 0x61a   :  { %v3035_v45 = vmul.f32 -1.442695, %v2171_v27  ;;  %vm2159_vm13 = vcmp.eq.f32.partialorder %v2158_v58, 8.507059e+37 }
 0x61c   :  { %v3380_v30 = vpop.eup %3379  ;;  %3383 = vpow2.f32 %v3035_v45 }
 0x61d   :  { %v2130_v53 = vmul.f32 %v3380_v30, %v2128_v21  ;;  %v4649_v6 = vpop.eup %3381  ;;  %vm2135_vm10 = vweird.f32 %v3380_v30  ;;  %v3207_v21 = vld [vmem:[#allocation6 + $0x10] sm:$0xff] }
 0x61e   :  { %v2092_v40 = vpop.f32.mrf.mxu0  ;;  %v2150_v47 = vmul.f32 %v4649_v6, %v4645_v16  ;;  %vm2136_vm14 = vmor %vm2134_vm11, %vm2135_vm10  ;;  %vm2155_vm3 = vweird.f32 %v4649_v6  ;;  %v2105_v36 = vpop.f32.mrf.mxu1 }
 0x61f   :  { %v2131_v43 = vsub.f32 1.0, %v2130_v53  ;;  %v2112_v42 = vadd.f32 %v2092_v40, %v4909_v3  ;;  %vm4660_vm9 = vmor %vm2154_vm6, %vm2155_vm3  ;;  %v2113_v23 = vadd.f32 %v2105_v36, %v4825_v14  ;;  %v3220_v36 = vld [vmem:[#allocation6 + $0x78] sm:$0xff] }
 0x620   :  { %v2151_v29 = vsub.f32 1.0, %v2150_v47  ;;  %2561 = vmatpush.bf16.msra.mxu1 %v3220_v36 }
 0x621   :  { %v2132_v22 = vmul.f32 %v3380_v30, %v2131_v43  ;;  %v2191_v33 = vadd.f32 %v2122_v2, %v2112_v42 }
 0x622   :  { %v3384_v60 = vpop.eup %3383  ;;  %v2152_v34 = vmul.f32 %v4649_v6, %v2151_v29  ;;  %v3212_v29 = vld [vmem:[#allocation6 + $0x38] sm:$0xff] }
 0x623   :  { %v3036_v39 = vmul.f32 -1.442695, %v2191_v33  ;;  %v2133_v50 = vadd.f32 %v3380_v30, %v2132_v22  ;;  %v2175_v17 = vadd.f32 1.0, %v3384_v60  ;;  %2548 = vmatpush.bf16.msra.mxu0 %v3212_v29 }
 0x624   :  { %v2153_v19 = vadd.f32 %v4649_v6, %v2152_v34  ;;  %v3209_v34 = vld [vmem:[#allocation6 + $0x20] sm:$0xff] }
 0x625   :  { %3385 = vpow2.f32 %v3036_v39  ;;  %v2137_v25 = vsel %vm2136_vm14, %v3380_v30, %v2133_v50  ;;  %v2187_v56 = vand.u32 2147483648, %v2175_v17  ;;  %v2185_v18 = vand.u32 2147483647, %v2175_v17 }
 0x626   :  { %3387 = vrcp.f32 %v2175_v17  ;;  %v2142_v38 = vsel %vm2139_vm15, %v2141_v24, %v2137_v25  ;;  %vm2181_vm7 = vweird.f32 %v2175_v17  ;;  %v2157_v41 = vsel %vm4660_vm9, %v4649_v6, %v2153_v19 }
 0x627   :  { %v2164_v32 = vmul.f32 %v2142_v38, %v2110_v48  ;;  %v2188_v15 = vor.u32 1.1754944e-38, %v2187_v56  ;;  %vm2186_vm12 = vcmp.eq.f32.partialorder %v2185_v18, 8.507059e+37  ;;  %v2162_v45 = vsel %vm2159_vm13, %v2161_v61, %v2157_v41  ;;  %2549 = vmatpush.bf16.msra.mxu0 %v3211_v1  ;;  %v2305_v48 = vld [vmem:[#allocation2 + $0xa8] sm:$0xff]  ;;  %v3217_v61 = vld [vmem:[#allocation6 + $0x60] sm:$0xff] }
 0x628   :  { %v2167_v42 = vsub.f32 1.0, %v2162_v45  ;;  %v2169_v60 = vmul.f32 %v2162_v45, %v4606_v52 }
 0x629   :  { %v2165_v62 = vadd.f32 %v2164_v32, %v2118_v9  ;;  %v4684_v9 = vld [vmem:[#allocation2 + $0xc] sm:$0xff] }
 0x62b   :  { %v3386_v49 = vpop.eup %3385 }
 0x62c   :  { %v2195_v26 = vadd.f32 1.0, %v3386_v49  ;;  %v3388_v11 = vpop.eup %3387 }
 0x62d   :  { %v2177_v28 = vmul.f32 %v3388_v11, %v2175_v17  ;;  %vm2182_vm2 = vweird.f32 %v3388_v11 }
 0x62e   :  { %3389 = vrcp.f32 %v2195_v26  ;;  %vm2183_vm8 = vmor %vm2181_vm7, %vm2182_vm2  ;;  %v2207_v13 = vand.u32 2147483648, %v2195_v26  ;;  %v2205_v30 = vand.u32 2147483647, %v2195_v26  ;;  %vm2201_vm11 = vweird.f32 %v2195_v26 }
 0x62f   :  { %v2178_v46 = vsub.f32 1.0, %v2177_v28  ;;  %3391 = vtanh.f32 %v2165_v62  ;;  %v2312_v62 = vunpack.c.l.bf16 %v4684_v9 }
 0x630   :  { %v2208_v43 = vor.u32 1.1754944e-38, %v2207_v13  ;;  %vm2206_vm15 = vcmp.eq.f32.partialorder %v2205_v30, 8.507059e+37  ;;  %v3205_v30 = vld [vmem:[#allocation6] sm:$0xff] }
 0x631   :  { %v2179_v8 = vmul.f32 %v3388_v11, %v2178_v46 }
 0x633   :  { %v2180_v57 = vadd.f32 %v3388_v11, %v2179_v8 }
 0x634   :  { %v3390_v37 = vpop.eup %3389 }
 0x635   :  { %v2197_v7 = vmul.f32 %v3390_v37, %v2195_v26  ;;  %v2184_v31 = vsel %vm2183_vm8, %v3388_v11, %v2180_v57  ;;  %vm2202_vm10 = vweird.f32 %v3390_v37  ;;  %v3392_v40 = vpop.eup %3391  ;;  %v3210_v26 = vld [vmem:[#allocation6 + $0x28] sm:$0xff]  ;;  %v2308_v11 = vunpack.c.h.bf16 %v2305_v48 }
 0x636   :  { %v2189_v54 = vsel %vm2186_vm12, %v2188_v15, %v2184_v31  ;;  %vm2203_vm14 = vmor %vm2201_vm11, %vm2202_vm10  ;;  %v2168_v6 = vmul.f32 %v3392_v40, %v2167_v42  ;;  %2550 = vmatpush.bf16.msra.mxu0 %v3210_v26  ;;  %v3206_v31 = vld [vmem:[#allocation6 + $0x8] sm:$0xff]  ;;  %v2313_v42 = vunpack.c.h.bf16 %v4684_v9  ;;  %v3213_v9 = vld [vmem:[#allocation6 + $0x40] sm:$0xff] }
 0x637   :  { %v2198_v44 = vsub.f32 1.0, %v2197_v7  ;;  %v2211_v16 = vmul.f32 %v2189_v54, %v2113_v23  ;;  %v3218_v23 = vld [vmem:[#allocation6 + $0x68] sm:$0xff] }
 0x638   :  { %v2170_v35 = vadd.f32 %v2169_v60, %v2168_v6 }
 0x639   :  { %v2199_v27 = vmul.f32 %v3390_v37, %v2198_v44  ;;  %v2212_v53 = vadd.f32 %v2211_v16, %v2123_v10 }
 0x63a   :  { %v4673_v25 = vsel %vm1247_vm5, %v2170_v35, %v4606_v52  ;;  %2551 = vmatpush.bf16.msra.mxu0 %v3209_v34 }
 0x63b   :  { %v2200_v2 = vadd.f32 %v3390_v37, %v2199_v27  ;;  %3393 = vtanh.f32 %v2212_v53  ;;  %v3216_v53 = vld [vmem:[#allocation6 + $0x58] sm:$0xff] }
 0x63d   :  { %v2204_v22 = vsel %vm2203_vm14, %v3390_v37, %v2200_v2 }
 0x63e   :  { %v2209_v33 = vsel %vm2206_vm15, %v2208_v43, %v2204_v22  ;;  %2552 = vmatpush.bf16.msra.mxu0 %v3208_v55  ;;  %v3215_v22 = vld [vmem:[#allocation6 + $0x50] sm:$0xff] }
 0x63f   :  { %v2214_v39 = vsub.f32 1.0, %v2209_v33  ;;  %v2216_v4 = vmul.f32 %v2209_v33, %v4601_v12 }
 0x641   :  { %v3394_v50 = vpop.eup %3393 }
 0x642   :  { %v2215_v17 = vmul.f32 %v3394_v50, %v2214_v39  ;;  %2553 = vmatpush.bf16.msra.mxu0 %v3207_v21 }
 0x644   :  { %v2217_v47 = vadd.f32 %v2216_v4, %v2215_v17 }
 0x646   :  { %v4678_v24 = vsel %vm1245_vm4, %v2217_v47, %v4601_v12  ;;  %v2307_v12 = vunpack.c.l.bf16 %v2305_v48  ;;  %2554 = vmatpush.bf16.msra.mxu0 %v3206_v31  ;;  %v2306_v47 = vld [vmem:[#allocation2 + $0xb0] sm:$0xf] }
 0x647   :  { %v2220_v49 = vpack.c.bf16 %v4678_v24, %v4673_v25 }
 0x649   :  { %2229 = vmatmul.bf16.vlgmr.msra.gmra.mxu2 %v2220_v49  ;;  %2242 = vmatmul.bf16.vlgmr.msra.gmra.mxu3 %v2220_v49 }
 0x64a   :  { %2255 = vmatmul.bf16.vlgmr.msrb.gmra.mxu0 %v2220_v49  ;;  %2268 = vmatmul.bf16.vlgmr.msrb.gmra.mxu1 %v2220_v49 }
 0x64b   :  { %2555 = vmatpush.bf16.msra.mxu0 %v3205_v30 }
 0x659   :  { %2281 = vmatmul.bf16.vlgmr.msrb.gmra.mxu2 %v2220_v49  ;;  %2294 = vmatmul.bf16.vlgmr.msrb.gmra.mxu3 %v2220_v49 }
 0x6c7   :  { %v4682_v52 = vpop.f32.mrf.mxu0  ;;  %v2269_v38 = vpop.f32.mrf.mxu1 }
 0x6c8   :  { %v3214_v38 = vld [vmem:[#allocation6 + $0x48] sm:$0xff] }
 0x6cc   :  { %v2230_v32 = vpop.f32.mrf.mxu2  ;;  %v2243_v28 = vpop.f32.mrf.mxu3 }
 0x6cd   :  { %v2299_v46 = vadd.f32 %v2230_v32, %v4903_v51  ;;  %v2300_v56 = vadd.f32 %v2243_v28, %v4904_v20  ;;  %v3219_v51 = vld [vmem:[#allocation6 + $0x70] sm:$0xff]  ;;  %v2309_v32 = vunpack.c.l.bf16 %v2306_v47 }
 0x6ce   :  { %2562 = vmatpush.bf16.msra.mxu1 %v3219_v51 }
 0x6cf   :  { %v2315_v5 = vadd.f32 %v2307_v12, %v2299_v46  ;;  %v2335_v8 = vadd.f32 %v2308_v11, %v2300_v56  ;;  %v2258_v18 = vpop.f32.mrf.mxu0  ;;  %v2270_v19 = vpop.f32.mrf.mxu1 }
 0x6d0   :  { %v2302_v37 = vadd.f32 %v2270_v19, %v4908_v0 }
 0x6d1   :  { %v3037_v57 = vmul.f32 -1.442695, %v2315_v5  ;;  %v3038_v58 = vmul.f32 -1.442695, %v2335_v8 }
 0x6d2   :  { %v2362_v7 = vadd.f32 %v2312_v62, %v2302_v37  ;;  %2563 = vmatpush.bf16.msra.mxu1 %v3218_v23 }
 0x6d3   :  { %3395 = vpow2.f32 %v3037_v57 }
 0x6d4   :  { %3397 = vpow2.f32 %v3038_v58  ;;  %v3039_v20 = vmul.f32 -1.442695, %v2362_v7  ;;  %v2232_v10 = vpop.f32.mrf.mxu2  ;;  %v2245_v15 = vpop.f32.mrf.mxu3 }
 0x6d5   :  { %v2311_v15 = vld [vmem:[#allocation2 + $0x14] sm:$0xf] }
 0x6d6   :  { %3399 = vpow2.f32 %v3039_v20  ;;  %2564 = vmatpush.bf16.msra.mxu1 %v3217_v61 }
 0x6d9   :  { %v3396_v41 = vpop.eup %3395 }
 0x6da   :  { %v3398_v0 = vpop.eup %3397  ;;  %v2319_v44 = vadd.f32 1.0, %v3396_v41  ;;  %2565 = vmatpush.bf16.msra.mxu1 %v3216_v53 }
 0x6db   :  { %v4690_v54 = vadd.f32 1.0, %v3398_v0  ;;  %v2314_v0 = vunpack.c.l.bf16 %v2311_v15 }
 0x6dc   :  { %v3400_v13 = vpop.eup %3399  ;;  %3401 = vrcp.f32 %v2319_v44  ;;  %v2282_v16 = vpop.f32.mrf.mxu2  ;;  %v2329_v35 = vand.u32 2147483647, %v2319_v44  ;;  %v2331_v17 = vand.u32 2147483648, %v2319_v44  ;;  %vm2325_vm5 = vweird.f32 %v2319_v44 }
 0x6dd   :  { %v2295_v27 = vpop.f32.mrf.mxu3  ;;  %3403 = vrcp.f32 %v4690_v54  ;;  %v4693_v45 = vadd.f32 1.0, %v3400_v13  ;;  %v2351_v8 = vand.u32 2147483648, %v4690_v54  ;;  %vm2345_vm7 = vweird.f32 %v4690_v54 }
 0x6de   :  { %2566 = vmatpush.bf16.msra.mxu1 %v3215_v22  ;;  %v2332_v28 = vor.u32 1.1754944e-38, %v2331_v17  ;;  %vm2330_vm3 = vcmp.eq.f32.partialorder %v2329_v35, 8.507059e+37  ;;  %v2349_v18 = vand.u32 2147483647, %v4690_v54 }
 0x6df   :  { %3405 = vrcp.f32 %v4693_v45  ;;  %vm2372_vm12 = vweird.f32 %v4693_v45  ;;  %v2376_v37 = vand.u32 2147483647, %v4693_v45  ;;  %v2352_v57 = vor.u32 1.1754944e-38, %v2351_v8 }
 0x6e0   :  { %vm2350_vm10 = vcmp.eq.f32.partialorder %v2349_v18, 8.507059e+37 }
 0x6e1   :  { %vm2377_vm11 = vcmp.eq.f32.partialorder %v2376_v37, 8.507059e+37 }
 0x6e2   :  { %v3402_v2 = vpop.eup %3401  ;;  %2567 = vmatpush.bf16.msra.mxu1 %v3214_v38 }
 0x6e3   :  { %v3404_v40 = vpop.eup %3403  ;;  %v2321_v43 = vmul.f32 %v3402_v2, %v2319_v44  ;;  %vm2326_vm4 = vweird.f32 %v3402_v2 }
 0x6e4   :  { %v2341_v33 = vmul.f32 %v3404_v40, %v4690_v54  ;;  %v2283_v6 = vpop.f32.mrf.mxu2  ;;  %vm2327_vm2 = vmor %vm2325_vm5, %vm2326_vm4  ;;  %vm2346_vm6 = vweird.f32 %v3404_v40 }
 0x6e5   :  { %v2322_v39 = vsub.f32 1.0, %v2321_v43  ;;  %v2303_v60 = vadd.f32 %v2283_v6, %v4909_v3  ;;  %v3406_v50 = vpop.eup %3405  ;;  %v2301_v3 = vadd.f32 %v4682_v52, %v4910_v63  ;;  %vm2347_vm9 = vmor %vm2345_vm7, %vm2346_vm6  ;;  %v2378_v52 = vand.u32 2147483648, %v4693_v45  ;;  %v2296_v51 = vpop.f32.mrf.mxu3 }
 0x6e6   :  { %v2342_v4 = vsub.f32 1.0, %v2341_v33  ;;  %v2368_v1 = vmul.f32 %v3406_v50, %v4693_v45  ;;  %2568 = vmatpush.bf16.msra.mxu1 %v3213_v9  ;;  %vm2373_vm8 = vweird.f32 %v3406_v50  ;;  %v2304_v23 = vadd.f32 %v2296_v51, %v4825_v14 }
 0x6e7   :  { %v2323_v49 = vmul.f32 %v3402_v2, %v2322_v39  ;;  %v2382_v29 = vadd.f32 %v2313_v42, %v2303_v60  ;;  %vm2374_vm13 = vmor %vm2372_vm12, %vm2373_vm8  ;;  %v2379_v20 = vor.u32 1.1754944e-38, %v2378_v52 }
 0x6e8   :  { %v2343_v48 = vmul.f32 %v3404_v40, %v2342_v4  ;;  %v2369_v11 = vsub.f32 1.0, %v2368_v1 }
 0x6e9   :  { %v2324_v26 = vadd.f32 %v3402_v2, %v2323_v49  ;;  %v3040_v12 = vmul.f32 -1.442695, %v2382_v29  ;;  %v3254_v29 = vld [vmem:[%s4738_s9] ss:$0 sm:$0xff] }
 0x6ea   :  { %v2370_v46 = vmul.f32 %v3406_v50, %v2369_v11  ;;  %v2344_v62 = vadd.f32 %v3404_v40, %v2343_v48 }
 0x6eb   :  { %v2328_v34 = vsel %vm2327_vm2, %v3402_v2, %v2324_v26  ;;  %3407 = vpow2.f32 %v3040_v12 }
 0x6ec   :  { %v2333_v56 = vsel %vm2330_vm3, %v2332_v28, %v2328_v34  ;;  %v2371_v19 = vadd.f32 %v3406_v50, %v2370_v46  ;;  %v2348_v36 = vsel %vm2347_vm9, %v3404_v40, %v2344_v62 }
 0x6ed   :  { %v2355_v5 = vmul.f32 %v2333_v56, %v2301_v3  ;;  %v2353_v10 = vsel %vm2350_vm10, %v2352_v57, %v2348_v36 }
 0x6ee   :  { %v2375_v7 = vsel %vm2374_vm13, %v3406_v50, %v2371_v19  ;;  %v2358_v31 = vsub.f32 1.0, %v2353_v10  ;;  %v2360_v61 = vmul.f32 %v2353_v10, %v4673_v25 }
 0x6ef   :  { %v2356_v63 = vadd.f32 %v2355_v5, %v2309_v32  ;;  %v2380_v21 = vsel %vm2377_vm11, %v2379_v20, %v2375_v7 }
 0x6f0   :  { %v2402_v44 = vmul.f32 %v2380_v21, %v2304_v23 }
 0x6f1   :  { %v3408_v55 = vpop.eup %3407  ;;  %3409 = vtanh.f32 %v2356_v63 }
 0x6f2   :  { %v2386_v58 = vadd.f32 1.0, %v3408_v55  ;;  %v2403_v30 = vadd.f32 %v2402_v44, %v2314_v0 }
 0x6f4   :  { %3411 = vrcp.f32 %v2386_v58  ;;  %v2398_v2 = vand.u32 2147483648, %v2386_v58  ;;  %v2396_v43 = vand.u32 2147483647, %v2386_v58  ;;  %vm2392_vm15 = vweird.f32 %v2386_v58 }
 0x6f5   :  { %3413 = vtanh.f32 %v2403_v30 }
 0x6f6   :  { %v2399_v22 = vor.u32 1.1754944e-38, %v2398_v2  ;;  %vm2397_vm5 = vcmp.eq.f32.partialorder %v2396_v43, 8.507059e+37 }
 0x6f7   :  { %v3410_v41 = vpop.eup %3409 }
 0x6f8   :  { %v2359_v54 = vmul.f32 %v3410_v41, %v2358_v31 }
 0x6fa   :  { %v3412_v13 = vpop.eup %3411  ;;  %v2361_v16 = vadd.f32 %v2360_v61, %v2359_v54 }
 0x6fb   :  { %v2388_v27 = vmul.f32 %v3412_v13, %v2386_v58  ;;  %vm2393_vm14 = vweird.f32 %v3412_v13  ;;  %v3414_v39 = vpop.eup %3413 }
 0x6fc   :  { %v2409_v45 = vsel %vm1048_vm1, %v2361_v16, %v4673_v25  ;;  %vm2394_vm4 = vmor %vm2392_vm15, %vm2393_vm14 }
 0x6fd   :  { %v2389_v53 = vsub.f32 1.0, %v2388_v27  ;;  %2411 = vst [vmem:[%s4740_s11] sm:$0xff] %v2409_v45  ;;  %v2414_v14 = vpack.c.bf16 %v2409_v45, %v2409_v45 }
 0x6ff   :  { %v2390_v40 = vmul.f32 %v3412_v13, %v2389_v53  ;;  %2556 = vmatmul.bf16.vlgmr.msra.gmra.mxu0 %v2414_v14 }
 0x701   :  { %v2391_v42 = vadd.f32 %v3412_v13, %v2390_v40 }
 0x703   :  { %v2395_v33 = vsel %vm2394_vm4, %v3412_v13, %v2391_v42 }
 0x704   :  { %v2400_v6 = vsel %vm2397_vm5, %v2399_v22, %v2395_v33 }
 0x705   :  { %v2405_v25 = vsub.f32 1.0, %v2400_v6  ;;  %v2407_v50 = vmul.f32 %v2400_v6, %v4678_v24 }
 0x707   :  { %v2406_v60 = vmul.f32 %v3414_v39, %v2405_v25 }
 0x709   :  { %v2408_v35 = vadd.f32 %v2407_v50, %v2406_v60 }
 0x70b   :  { %v2410_v17 = vsel %vm1046_vm0, %v2408_v35, %v4678_v24 }
 0x70c   :  { %3041 = vst [vmem:[%s4740_s11 + $0x8] sm:$0xff] %v2410_v17  ;;  %v2415_v4 = vpack.c.bf16 %v2410_v17, %v2410_v17 }
 0x70e   :  { %2569 = vmatmul.bf16.vlgmr.msra.gmra.mxu1 %v2415_v4 }
 0x77c   :  { %v2557_v47 = vpop.f32.mrf.mxu0 }
 0x77d   :  { %v2558_v59 = vadd.f32 %v3254_v29, %v2557_v47 }
 0x784   :  { %v2559_v49 = vpop.f32.mrf.mxu0 }
 0x78b   :  { %v2570_v24 = vpop.f32.mrf.mxu1 }
 0x78c   :  { %v2571_v1 = vadd.f32 %v2570_v24, %v2558_v59 }
 0x78e   :  { %2574 = vst [vmem:[#allocation8] sm:$0xff] %v2571_v1 }
 0x78f   :  { %2585 = dma.vmem_to_hbm [thread:$0]  %s2581_s0, 128, %s2583_s16, [#allocation5]  }
 0x793   :  { %v2572_v38 = vpop.f32.mrf.mxu1 }
 0x794   :  { %3495 = dma.done.wait [#allocation5], 128  }
 0x795   :  { %3496 = vsyncadd [#allocation5], 4294967168 }
 0x796   :  { %2594 = vsyncpa [#allocation4], 1 }
 0x797   :  { %2595 = vsyncpa [#allocation7], 1 }
 0x798   :  { %2596 = vsyncpa [#allocation5], 1 }

</bundles_post_ra>
